<compile_context>
chip_gen: v6e
topology: v6e:2x2x1
jax: 0.10.0
libtpu: 0.0.40
codegen_flags: <defaults>
</compile_context>

<pallas_src>
import jax
import jax.numpy as jnp
from jax.experimental import pallas as pl
from jax.experimental.pallas import tpu as pltpu


def _pick_tile(dim, candidates):
    for c in candidates:
        if c <= dim and dim % c == 0:
            return c
    return dim


# ----------------------------------------------------------------------------
# Full-K tiled matmul + bias Pallas kernel:  out = a @ b + bias
#   a: (M, K), b: (K, N)  (bf16 inputs, f32 MXU accumulation)
#   bias: (1, N) per-column  or  (M, 1) per-row
# K is kept whole in every block (K <= 1152 here) so there is no reduction
# grid axis; the output tile is written exactly once, lane-dense along N.
# ----------------------------------------------------------------------------
def _matmul_bias_kernel(a_ref, b_ref, bias_ref, o_ref):
    acc = jnp.dot(a_ref[...], b_ref[...], preferred_element_type=jnp.float32)
    o_ref[...] = (acc + bias_ref[...]).astype(o_ref.dtype)


def matmul_bias(a, b, bias, out_dtype=jnp.float32):
    M, K = a.shape
    K2, N = b.shape
    assert K == K2
    tm = _pick_tile(M, (128,))
    tn = _pick_tile(N, (256, 128))

    if bias.shape == (1, N):
        bias_spec = pl.BlockSpec((1, tn), lambda i, j: (0, j))
    elif bias.shape == (M, 1):
        bias_spec = pl.BlockSpec((tm, 1), lambda i, j: (i, 0))
    else:
        raise ValueError("bias must be (1, N) or (M, 1)")

    return pl.pallas_call(
        _matmul_bias_kernel,
        out_shape=jax.ShapeDtypeStruct((M, N), out_dtype),
        grid_spec=pltpu.PrefetchScalarGridSpec(
            num_scalar_prefetch=0,
            grid=(M // tm, N // tn),
            in_specs=[
                pl.BlockSpec((tm, K), lambda i, j: (i, 0)),
                pl.BlockSpec((K, tn), lambda i, j: (0, j)),
                bias_spec,
            ],
            out_specs=pl.BlockSpec((tm, tn), lambda i, j: (i, j)),
        ),
        compiler_params=pltpu.CompilerParams(
            dimension_semantics=("parallel", "parallel")),
    )(a, b, bias)


# ----------------------------------------------------------------------------
# Fused BatchNorm2d (training-mode batch stats, biased var) + ReLU.
# Input is channel-major (C, S) with S = N*H*W lane-dense; two-pass grid so
# VMEM usage is bounded by one (C, tile) block regardless of batch size.
# ----------------------------------------------------------------------------
def bn_relu_cmajor(x, gamma_col, beta_col, eps=1e-5, out_dtype=jnp.bfloat16):
    C, S = x.shape
    ts = _pick_tile(S, (512, 256, 128))
    inv_count = 1.0 / float(S)

    def kernel(x_ref, g_ref, b_ref, o_ref, sum_ref, sq_ref):
        p = pl.program_id(0)
        t = pl.program_id(1)

        @pl.when(jnp.logical_and(p == 0, t == 0))
        def _():
            sum_ref[...] = jnp.zeros_like(sum_ref)
            sq_ref[...] = jnp.zeros_like(sq_ref)

        xv = x_ref[...]

        @pl.when(p == 0)
        def _():
            sum_ref[...] += jnp.sum(xv, axis=1, keepdims=True)
            sq_ref[...] += jnp.sum(xv * xv, axis=1, keepdims=True)

        @pl.when(p == 1)
        def _():
            mean = sum_ref[...] * inv_count
            # E[x^2]-E[x]^2 (single extra streaming pass); fine at these scales.
            var = sq_ref[...] * inv_count - mean * mean
            scale = jax.lax.rsqrt(var + eps) * g_ref[...]
            shift = b_ref[...] - mean * scale
            o_ref[...] = jnp.maximum(xv * scale + shift, 0.0).astype(o_ref.dtype)

    return pl.pallas_call(
        kernel,
        out_shape=jax.ShapeDtypeStruct((C, S), out_dtype),
        grid_spec=pltpu.PrefetchScalarGridSpec(
            num_scalar_prefetch=0,
            grid=(2, S // ts),
            in_specs=[
                pl.BlockSpec((C, ts), lambda p, t: (0, t)),
                pl.BlockSpec((C, 1), lambda p, t: (0, 0)),
                pl.BlockSpec((C, 1), lambda p, t: (0, 0)),
            ],
            out_specs=pl.BlockSpec((C, ts), lambda p, t: (0, t)),
            scratch_shapes=[pltpu.VMEM((C, 1), jnp.float32),
                            pltpu.VMEM((C, 1), jnp.float32)],
        ),
        compiler_params=pltpu.CompilerParams(
            dimension_semantics=("arbitrary", "arbitrary")),
    )(x, gamma_col, beta_col)


# ----------------------------------------------------------------------------
# ConvTranspose2d(kernel=4, stride=2, padding=1) via phase decomposition.
# out[co, n, 2p+py, 2q+px] = sum_{dy,dx in {0,1}, ci}
#       x_pad[ci, n, p+py+dy, q+px+dx] * w[ci, co, 3-py-2dy, 3-px-2dx] + b[co]
# ----------------------------------------------------------------------------
def _deconv_phase_weight(w):
    """PyTorch ConvTranspose2d weight (Cin, Cout, 4, 4) -> (4*Cout, 9*Cin) GEMM
    matrix. Rows = (cout, phase_y, phase_x); cols = (win_y, win_x, cin) over the
    3x3 window of the 1-padded input (only the 2x2 taps per phase are nonzero)."""
    Cin, Cout = w.shape[0], w.shape[1]
    wb = jnp.zeros((Cout, 2, 2, 3, 3, Cin), jnp.float32)
    for py in range(2):
        for px in range(2):
            for dy in range(2):
                for dx in range(2):
                    wy, wx = py + dy, px + dx
                    ky, kx = 3 - py - 2 * dy, 3 - px - 2 * dx
                    wb = wb.at[:, py, px, wy, wx, :].set(w[:, :, ky, kx].T)
    return wb.reshape(Cout * 4, 9 * Cin)


def _build_patches(x_cm):
    """x_cm (Cin, N, H, W) -> patches (9*Cin, N*H*W) in bf16 (3x3 window of the
    1-padded input, shared by all 4 output phases; no inserted zeros)."""
    Cin, N, H, W = x_cm.shape
    xp = jnp.pad(x_cm.astype(jnp.bfloat16), ((0, 0), (0, 0), (1, 1), (1, 1)))
    taps = [xp[:, :, wy:wy + H, wx:wx + W] for wy in range(3) for wx in range(3)]
    return jnp.stack(taps, axis=0).reshape(9 * Cin, N * H * W)


def _phase_to_spatial(h, Cout, N, H, W):
    """(cout, py, px, n, p, q)-ordered values -> channel-major (Cout, N, 2H, 2W)."""
    h = h.reshape(Cout, 2, 2, N, H, W).transpose(0, 3, 4, 1, 5, 2)
    return h.reshape(Cout, N, 2 * H, 2 * W)


def deconv_bn_relu(x_cm, wmat, bias_col, gamma_col, beta_col):
    _, N, H, W = x_cm.shape
    Cout = wmat.shape[0] // 4
    y = matmul_bias(wmat, _build_patches(x_cm), bias_col)          # (4Cout, NHW) f32
    h = bn_relu_cmajor(y.reshape(Cout, 4 * N * H * W), gamma_col, beta_col)
    return _phase_to_spatial(h, Cout, N, H, W)                      # bf16


def deconv(x_cm, wmat, bias_col):
    _, N, H, W = x_cm.shape
    Cout = wmat.shape[0] // 4
    y = matmul_bias(wmat, _build_patches(x_cm), bias_col)          # f32
    return _phase_to_spatial(y, Cout, N, H, W)


# ----------------------------------------------------------------------------
# Parameters (synthetic, deterministic) + one-time GEMM packing
# ----------------------------------------------------------------------------
def init_params(key, latent_dim, n_in_channels, n_classes):
    nch = 16
    emb_size = 512
    flat_dim = nch * 8 * 4 * 4
    keys = jax.random.split(key, 17)

    def rnd(k, shape, scale=0.02):
        return scale * jax.random.normal(k, shape, jnp.float32)

    return {
        "emb": rnd(keys[0], (n_classes, emb_size), 1.0),
        "fc_w": rnd(keys[1], (latent_dim + emb_size, flat_dim)),
        "fc_b": rnd(keys[2], (flat_dim,)),
        # ConvTranspose2d weights, PyTorch layout (Cin, Cout, 4, 4)
        "w1": rnd(keys[3], (nch * 8, nch * 4, 4, 4)), "b1": rnd(keys[4], (nch * 4,)),
        "g1": 1.0 + rnd(keys[5], (nch * 4,)), "be1": rnd(keys[6], (nch * 4,)),
        "w2": rnd(keys[7], (nch * 4, nch * 2, 4, 4)), "b2": rnd(keys[8], (nch * 2,)),
        "g2": 1.0 + rnd(keys[9], (nch * 2,)), "be2": rnd(keys[10], (nch * 2,)),
        "w3": rnd(keys[11], (nch * 2, nch, 4, 4)), "b3": rnd(keys[12], (nch,)),
        "g3": 1.0 + rnd(keys[13], (nch,)), "be3": rnd(keys[14], (nch,)),
        "w4": rnd(keys[15], (nch, n_in_channels, 4, 4)),
        "b4": rnd(keys[16], (n_in_channels,)),
    }


def prepare_params(p):
    """One-time packing: phase GEMM matrices (bf16), column biases, BN columns.
    The jitted forward never pads/flips/reshapes parameters per call."""
    def conv_pack(w, b):
        return (_deconv_phase_weight(w).astype(jnp.bfloat16),
                jnp.repeat(b, 4).reshape(-1, 1))

    w1m, b1c = conv_pack(p["w1"], p["b1"])
    w2m, b2c = conv_pack(p["w2"], p["b2"])
    w3m, b3c = conv_pack(p["w3"], p["b3"])
    w4m, b4c = conv_pack(p["w4"], p["b4"])
    col = lambda v: v.reshape(-1, 1)
    return {
        "emb": p["emb"],
        "fc_w": p["fc_w"].astype(jnp.bfloat16),
        "fc_b": p["fc_b"].reshape(1, -1),
        "w1m": w1m, "b1c": b1c, "g1c": col(p["g1"]), "be1c": col(p["be1"]),
        "w2m": w2m, "b2c": b2c, "g2c": col(p["g2"]), "be2c": col(p["be2"]),
        "w3m": w3m, "b3c": b3c, "g3c": col(p["g3"]), "be3c": col(p["be3"]),
        "w4m": w4m, "b4c": b4c,
    }


# ----------------------------------------------------------------------------
# Generator forward (jitted at the call site)
# ----------------------------------------------------------------------------
def generator_forward(prep, z_key, y, latent_dim):
    n = y.shape[0]
    nch = 16
    z = jax.random.normal(z_key, (n, latent_dim), jnp.float32)
    embed = prep["emb"][y]                                     # (n, 512)
    zc = jnp.concatenate([z, embed], axis=1).astype(jnp.bfloat16)

    h = matmul_bias(zc, prep["fc_w"], prep["fc_b"])            # (n, 2048) f32
    x = h.reshape(n, nch * 8, 4, 4).transpose(1, 0, 2, 3)      # (128, n, 4, 4)

    x = deconv_bn_relu(x, prep["w1m"], prep["b1c"], prep["g1c"], prep["be1c"])  # (64, n, 8, 8)
    x = deconv_bn_relu(x, prep["w2m"], prep["b2c"], prep["g2c"], prep["be2c"])  # (32, n, 16, 16)
    x = deconv_bn_relu(x, prep["w3m"], prep["b3c"], prep["g3c"], prep["be3c"])  # (16, n, 32, 32)
    x = deconv(x, prep["w4m"], prep["b4c"])                                     # (C, n, 64, 64)

    return x.transpose(1, 0, 2, 3)                             # NCHW, f32


# ----------------------------------------------------------------------------
# Pure-JAX f32 reference of the PyTorch module (for a numerical self-check)
# ----------------------------------------------------------------------------
def _ref_deconv(x, w, b):
    w_oihw = jnp.flip(w, (2, 3)).transpose(1, 0, 2, 3)         # (Cout, Cin, 4, 4)
    out = jax.lax.conv_general_dilated(
        x, w_oihw, window_strides=(1, 1), padding=((2, 2), (2, 2)),
        lhs_dilation=(2, 2), rhs_dilation=(1, 1),
        dimension_numbers=("NCHW", "OIHW", "NCHW"))
    return out + b[None, :, None, None]


def _ref_bn_relu(x, g, b, eps=1e-5):
    mean = jnp.mean(x, axis=(0, 2, 3), keepdims=True)
    var = jnp.mean(jnp.square(x - mean), axis=(0, 2, 3), keepdims=True)
    y = (x - mean) * jax.lax.rsqrt(var + eps) * g[None, :, None, None] \
        + b[None, :, None, None]
    return jnp.maximum(y, 0.0)


def reference_forward(params, z_key, y, latent_dim):
    n = y.shape[0]
    z = jax.random.normal(z_key, (n, latent_dim), jnp.float32)
    embed = params["emb"][y]
    zc = jnp.concatenate([z, embed], axis=1)
    h = (zc @ params["fc_w"] + params["fc_b"]).reshape(n, 128, 4, 4)
    h = _ref_bn_relu(_ref_deconv(h, params["w1"], params["b1"]), params["g1"], params["be1"])
    h = _ref_bn_relu(_ref_deconv(h, params["w2"], params["b2"]), params["g2"], params["be2"])
    h = _ref_bn_relu(_ref_deconv(h, params["w3"], params["b3"]), params["g3"], params["be3"])
    return _ref_deconv(h, params["w4"], params["b4"])


if __name__ == "__main__":
    latent_dim = 64
    n_in_channels = 3
    n_classes = 10
    n = 2

    root = jax.random.PRNGKey(0)
    pkey, zkey, ykey = jax.random.split(root, 3)

    params = init_params(pkey, latent_dim, n_in_channels, n_classes)
    prep = prepare_params(params)
    y = jax.random.randint(ykey, (n,), 0, n_classes)

    fwd = jax.jit(lambda pr, k, labels: generator_forward(pr, k, labels, latent_dim))
    samples = jax.block_until_ready(fwd(prep, zkey, y))

    assert samples.shape == (n, n_in_channels, 64, 64), samples.shape
    assert samples.dtype == jnp.float32
    assert bool(jnp.all(jnp.isfinite(samples)))

    # Numerical self-check vs pure-JAX f32 reference (loose tolerance because
    # the Pallas path uses bf16 MXU inputs with f32 accumulation).
    ref = jax.block_until_ready(
        jax.jit(lambda pr, k, labels: reference_forward(pr, k, labels, latent_dim))(
            params, zkey, y))
    assert bool(jnp.allclose(samples, ref, rtol=5e-2, atol=5e-2)), \
        float(jnp.max(jnp.abs(samples - ref)))

    print("KERNEL_OK")
</pallas_src>

<mosaic_0001>
module attributes {stable_mosaic.version = 11 : i64} {
  func.func @_matmul_bias_kernel(%arg0: i32, %arg1: i32, %arg2: memref<2x576xbf16, #tpu.memory_space<vmem>>, %arg3: memref<576x256xbf16, #tpu.memory_space<vmem>>, %arg4: memref<1x256xf32, #tpu.memory_space<vmem>>, %arg5: memref<2x256xf32, #tpu.memory_space<vmem>>) attributes {dimension_semantics = [#tpu.dimension_semantics<parallel>, #tpu.dimension_semantics<parallel>], iteration_bounds = array<i64: 1, 8>, scalar_prefetch = 0 : i64, scratch_operands = 0 : i64, tpu.core_type = #tpu.core_type<tc>, window_params = [{transform_indices = @transform_0, window_bounds = array<i64: 2, 576>}, {transform_indices = @transform_1, window_bounds = array<i64: 576, 256>}, {transform_indices = @transform_2, window_bounds = array<i64: 1, 256>}, {transform_indices = @transform_3, window_bounds = array<i64: 2, 256>}]} {
    %c0 = arith.constant 0 : index
    %c0_0 = arith.constant 0 : index
    %0 = vector.load %arg2[%c0, %c0_0] : memref<2x576xbf16, #tpu.memory_space<vmem>>, vector<2x576xbf16>
    %c0_1 = arith.constant 0 : index
    %c0_2 = arith.constant 0 : index
    %1 = vector.load %arg3[%c0_1, %c0_2] : memref<576x256xbf16, #tpu.memory_space<vmem>>, vector<576x256xbf16>
    %cst = arith.constant dense<0.000000e+00> : vector<2x256xf32>
    %2 = tpu.matmul %0, %1, %cst {dimension_numbers = #tpu.dot_dimension_numbers<[1], [0], [0], [1], [0, 0, 1, 1], [], []>} : vector<2x576xbf16>, vector<576x256xbf16>, vector<2x256xf32> -> vector<2x256xf32>
    %c0_3 = arith.constant 0 : index
    %c0_4 = arith.constant 0 : index
    %3 = vector.load %arg4[%c0_3, %c0_4] : memref<1x256xf32, #tpu.memory_space<vmem>>, vector<1x256xf32>
    %4 = vector.broadcast %3 : vector<1x256xf32> to vector<2x256xf32>
    %5 = arith.addf %2, %4 : vector<2x256xf32>
    %c0_5 = arith.constant 0 : index
    %c0_6 = arith.constant 0 : index
    %6 = vector.load %arg5[%c0_5, %c0_6] : memref<2x256xf32, #tpu.memory_space<vmem>>, vector<2x256xf32>
    tpu.vector_store %arg5[%c0_5, %c0_6], %5 {strides = array<i32>} : memref<2x256xf32, #tpu.memory_space<vmem>>, vector<2x256xf32>,
    return
  }
  func.func @transform_0(%arg0: i32, %arg1: i32) -> (i32, i32) {
    %c0_i32 = arith.constant 0 : i32
    %c0_i32_0 = arith.constant 0 : i32
    return %arg0, %c0_i32 : i32, i32
  }
  func.func @transform_1(%arg0: i32, %arg1: i32) -> (i32, i32) {
    %c0_i32 = arith.constant 0 : i32
    %c0_i32_0 = arith.constant 0 : i32
    return %c0_i32, %arg1 : i32, i32
  }
  func.func @transform_2(%arg0: i32, %arg1: i32) -> (i32, i32) {
    %c0_i32 = arith.constant 0 : i32
    %c0_i32_0 = arith.constant 0 : i32
    return %c0_i32, %arg1 : i32, i32
  }
  func.func @transform_3(%arg0: i32, %arg1: i32) -> (i32, i32) {
    %c0_i32 = arith.constant 0 : i32
    return %arg0, %arg1 : i32, i32
  }
}

module attributes {stable_mosaic.version = 11 : i64} {
  func.func @_matmul_bias_kernel(%arg0: i32, %arg1: i32, %arg2: memref<128x1152xbf16, #tpu.memory_space<vmem>>, %arg3: memref<1152x32xbf16, #tpu.memory_space<vmem>>, %arg4: memref<128x1xf32, #tpu.memory_space<vmem>>, %arg5: memref<128x32xf32, #tpu.memory_space<vmem>>) attributes {dimension_semantics = [#tpu.dimension_semantics<parallel>, #tpu.dimension_semantics<parallel>], iteration_bounds = array<i64: 2, 1>, scalar_prefetch = 0 : i64, scratch_operands = 0 : i64, tpu.core_type = #tpu.core_type<tc>, window_params = [{transform_indices = @transform_0, window_bounds = array<i64: 128, 1152>}, {transform_indices = @transform_1, window_bounds = array<i64: 1152, 32>}, {transform_indices = @transform_2, window_bounds = array<i64: 128, 1>}, {transform_indices = @transform_3, window_bounds = array<i64: 128, 32>}]} {
    %c0 = arith.constant 0 : index
    %c0_0 = arith.constant 0 : index
    %0 = vector.load %arg2[%c0, %c0_0] : memref<128x1152xbf16, #tpu.memory_space<vmem>>, vector<128x1152xbf16>
    %c0_1 = arith.constant 0 : index
    %c0_2 = arith.constant 0 : index
    %1 = vector.load %arg3[%c0_1, %c0_2] : memref<1152x32xbf16, #tpu.memory_space<vmem>>, vector<1152x32xbf16>
    %cst = arith.constant dense<0.000000e+00> : vector<128x32xf32>
    %2 = tpu.matmul %0, %1, %cst {dimension_numbers = #tpu.dot_dimension_numbers<[1], [0], [0], [1], [0, 0, 1, 1], [], []>} : vector<128x1152xbf16>, vector<1152x32xbf16>, vector<128x32xf32> -> vector<128x32xf32>
    %c0_3 = arith.constant 0 : index
    %c0_4 = arith.constant 0 : index
    %3 = vector.load %arg4[%c0_3, %c0_4] : memref<128x1xf32, #tpu.memory_space<vmem>>, vector<128x1xf32>
    %4 = vector.broadcast %3 : vector<128x1xf32> to vector<128x32xf32>
    %5 = arith.addf %2, %4 : vector<128x32xf32>
    %c0_5 = arith.constant 0 : index
    %c0_6 = arith.constant 0 : index
    %6 = vector.load %arg5[%c0_5, %c0_6] : memref<128x32xf32, #tpu.memory_space<vmem>>, vector<128x32xf32>
    tpu.vector_store %arg5[%c0_5, %c0_6], %5 {strides = array<i32>} : memref<128x32xf32, #tpu.memory_space<vmem>>, vector<128x32xf32>,
    return
  }
  func.func @transform_0(%arg0: i32, %arg1: i32) -> (i32, i32) {
    %c0_i32 = arith.constant 0 : i32
    %c0_i32_0 = arith.constant 0 : i32
    return %arg0, %c0_i32 : i32, i32
  }
  func.func @transform_1(%arg0: i32, %arg1: i32) -> (i32, i32) {
    %c0_i32 = arith.constant 0 : i32
    %c0_i32_0 = arith.constant 0 : i32
    return %c0_i32, %arg1 : i32, i32
  }
  func.func @transform_2(%arg0: i32, %arg1: i32) -> (i32, i32) {
    %c0_i32 = arith.constant 0 : i32
    %c0_i32_0 = arith.constant 0 : i32
    return %arg0, %c0_i32 : i32, i32
  }
  func.func @transform_3(%arg0: i32, %arg1: i32) -> (i32, i32) {
    %c0_i32 = arith.constant 0 : i32
    return %arg0, %arg1 : i32, i32
  }
}

module attributes {stable_mosaic.version = 11 : i64} {
  func.func @kernel(%arg0: i32, %arg1: i32, %arg2: memref<64x128xf32, #tpu.memory_space<vmem>>, %arg3: memref<64x1xf32, #tpu.memory_space<vmem>>, %arg4: memref<64x1xf32, #tpu.memory_space<vmem>>, %arg5: memref<64x128xbf16, #tpu.memory_space<vmem>>, %arg6: memref<64x1xf32, #tpu.memory_space<vmem>>, %arg7: memref<64x1xf32, #tpu.memory_space<vmem>>) attributes {dimension_semantics = [#tpu.dimension_semantics<arbitrary>, #tpu.dimension_semantics<arbitrary>], iteration_bounds = array<i64: 2, 1>, scalar_prefetch = 0 : i64, scratch_operands = 2 : i64, tpu.core_type = #tpu.core_type<tc>, window_params = [{transform_indices = @transform_0, window_bounds = array<i64: 64, 128>}, {pipeline_mode = #tpu.pipeline_mode<synchronous>, transform_indices = @transform_1, window_bounds = array<i64: 64, 1>}, {pipeline_mode = #tpu.pipeline_mode<synchronous>, transform_indices = @transform_2, window_bounds = array<i64: 64, 1>}, {transform_indices = @transform_3, window_bounds = array<i64: 64, 128>}]} {
    %c0_i32 = arith.constant 0 : i32
    %0 = arith.cmpi eq, %arg0, %c0_i32 : i32
    %c0_i32_0 = arith.constant 0 : i32
    %1 = arith.cmpi eq, %arg1, %c0_i32_0 : i32
    %2 = arith.andi %0, %1 : i1
    %3 = arith.extui %2 : i1 to i32
    %c0_i32_1 = arith.constant 0 : i32
    %4 = arith.cmpi ne, %3, %c0_i32_1 : i32
    scf.if %4 {
      %cst = arith.constant 0.000000e+00 : f32
      %12 = vector.broadcast %cst : f32 to vector<64x1xf32>
      %c0_6 = arith.constant 0 : index
      %c0_7 = arith.constant 0 : index
      %13 = vector.load %arg6[%c0_6, %c0_7] : memref<64x1xf32, #tpu.memory_space<vmem>>, vector<64x1xf32>
      tpu.vector_store %arg6[%c0_6, %c0_7], %12 {strides = array<i32>} : memref<64x1xf32, #tpu.memory_space<vmem>>, vector<64x1xf32>,
      %cst_8 = arith.constant 0.000000e+00 : f32
      %14 = vector.broadcast %cst_8 : f32 to vector<64x1xf32>
      %c0_9 = arith.constant 0 : index
      %c0_10 = arith.constant 0 : index
      %15 = vector.load %arg7[%c0_9, %c0_10] : memref<64x1xf32, #tpu.memory_space<vmem>>, vector<64x1xf32>
      tpu.vector_store %arg7[%c0_9, %c0_10], %14 {strides = array<i32>} : memref<64x1xf32, #tpu.memory_space<vmem>>, vector<64x1xf32>,
    } else {
    }
    %c0 = arith.constant 0 : index
    %c0_2 = arith.constant 0 : index
    %5 = vector.load %arg2[%c0, %c0_2] : memref<64x128xf32, #tpu.memory_space<vmem>>, vector<64x128xf32>
    %c0_i32_3 = arith.constant 0 : i32
    %6 = arith.cmpi eq, %arg0, %c0_i32_3 : i32
    %7 = arith.extui %6 : i1 to i32
    %c0_i32_4 = arith.constant 0 : i32
    %8 = arith.cmpi ne, %7, %c0_i32_4 : i32
    scf.if %8 {
      %c0_6 = arith.constant 0 : index
      %c0_7 = arith.constant 0 : index
      %12 = vector.load %arg6[%c0_6, %c0_7] : memref<64x1xf32, #tpu.memory_space<vmem>>, vector<64x1xf32>
      %cst = arith.constant dense<0.000000e+00> : vector<64xf32>
      %13 = vector.multi_reduction <add>, %5, %cst [1] : vector<64x128xf32> to vector<64xf32>
      %14 = vector.shape_cast %13 : vector<64xf32> to vector<64x1xf32>
      %15 = arith.addf %12, %14 : vector<64x1xf32>
      %c0_8 = arith.constant 0 : index
      %c0_9 = arith.constant 0 : index
      %16 = vector.load %arg6[%c0_8, %c0_9] : memref<64x1xf32, #tpu.memory_space<vmem>>, vector<64x1xf32>
      tpu.vector_store %arg6[%c0_8, %c0_9], %15 {strides = array<i32>} : memref<64x1xf32, #tpu.memory_space<vmem>>, vector<64x1xf32>,
      %c0_10 = arith.constant 0 : index
      %c0_11 = arith.constant 0 : index
      %17 = vector.load %arg7[%c0_10, %c0_11] : memref<64x1xf32, #tpu.memory_space<vmem>>, vector<64x1xf32>
      %18 = arith.mulf %5, %5 : vector<64x128xf32>
      %cst_12 = arith.constant dense<0.000000e+00> : vector<64xf32>
      %19 = vector.multi_reduction <add>, %18, %cst_12 [1] : vector<64x128xf32> to vector<64xf32>
      %20 = vector.shape_cast %19 : vector<64xf32> to vector<64x1xf32>
      %21 = arith.addf %17, %20 : vector<64x1xf32>
      %c0_13 = arith.constant 0 : index
      %c0_14 = arith.constant 0 : index
      %22 = vector.load %arg7[%c0_13, %c0_14] : memref<64x1xf32, #tpu.memory_space<vmem>>, vector<64x1xf32>
      tpu.vector_store %arg7[%c0_13, %c0_14], %21 {strides = array<i32>} : memref<64x1xf32, #tpu.memory_space<vmem>>, vector<64x1xf32>,
    } else {
    }
    %c1_i32 = arith.constant 1 : i32
    %9 = arith.cmpi eq, %arg0, %c1_i32 : i32
    %10 = arith.extui %9 : i1 to i32
    %c0_i32_5 = arith.constant 0 : i32
    %11 = arith.cmpi ne, %10, %c0_i32_5 : i32
    scf.if %11 {
      %c0_6 = arith.constant 0 : index
      %c0_7 = arith.constant 0 : index
      %12 = vector.load %arg6[%c0_6, %c0_7] : memref<64x1xf32, #tpu.memory_space<vmem>>, vector<64x1xf32>
      %cst = arith.constant 7.812500e-03 : f32
      %13 = vector.broadcast %cst : f32 to vector<64x1xf32>
      %14 = arith.mulf %12, %13 : vector<64x1xf32>
      %c0_8 = arith.constant 0 : index
      %c0_9 = arith.constant 0 : index
      %15 = vector.load %arg7[%c0_8, %c0_9] : memref<64x1xf32, #tpu.memory_space<vmem>>, vector<64x1xf32>
      %cst_10 = arith.constant 7.812500e-03 : f32
      %16 = vector.broadcast %cst_10 : f32 to vector<64x1xf32>
      %17 = arith.mulf %15, %16 : vector<64x1xf32>
      %18 = arith.mulf %14, %14 : vector<64x1xf32>
      %19 = arith.subf %17, %18 : vector<64x1xf32>
      %cst_11 = arith.constant 9.99999974E-6 : f32
      %20 = vector.broadcast %cst_11 : f32 to vector<64x1xf32>
      %21 = arith.addf %19, %20 : vector<64x1xf32>
      %22 = math.rsqrt %21 : vector<64x1xf32>
      %c0_12 = arith.constant 0 : index
      %c0_13 = arith.constant 0 : index
      %23 = vector.load %arg3[%c0_12, %c0_13] : memref<64x1xf32, #tpu.memory_space<vmem>>, vector<64x1xf32>
      %24 = arith.mulf %22, %23 : vector<64x1xf32>
      %c0_14 = arith.constant 0 : index
      %c0_15 = arith.constant 0 : index
      %25 = vector.load %arg4[%c0_14, %c0_15] : memref<64x1xf32, #tpu.memory_space<vmem>>, vector<64x1xf32>
      %26 = arith.mulf %14, %24 : vector<64x1xf32>
      %27 = arith.subf %25, %26 : vector<64x1xf32>
      %28 = vector.broadcast %24 : vector<64x1xf32> to vector<64x128xf32>
      %29 = arith.mulf %5, %28 : vector<64x128xf32>
      %30 = vector.broadcast %27 : vector<64x1xf32> to vector<64x128xf32>
      %31 = arith.addf %29, %30 : vector<64x128xf32>
      %cst_16 = arith.constant 0.000000e+00 : f32
      %32 = vector.broadcast %cst_16 : f32 to vector<64x128xf32>
      %33 = arith.maximumf %31, %32 : vector<64x128xf32>
      %34 = arith.truncf %33 : vector<64x128xf32> to vector<64x128xbf16>
      %c0_17 = arith.constant 0 : index
      %c0_18 = arith.constant 0 : index
      %35 = vector.load %arg5[%c0_17, %c0_18] : memref<64x128xbf16, #tpu.memory_space<vmem>>, vector<64x128xbf16>
      tpu.vector_store %arg5[%c0_17, %c0_18], %34 {strides = array<i32>} : memref<64x128xbf16, #tpu.memory_space<vmem>>, vector<64x128xbf16>,
    } else {
    }
    return
  }
  func.func @transform_0(%arg0: i32, %arg1: i32) -> (i32, i32) {
    %c0_i32 = arith.constant 0 : i32
    %c0_i32_0 = arith.constant 0 : i32
    return %c0_i32, %arg1 : i32, i32
  }
  func.func @transform_1(%arg0: i32, %arg1: i32) -> (i32, i32) {
    %c0_i32 = arith.constant 0 : i32
    %c0_i32_0 = arith.constant 0 : i32
    %c0_i32_1 = arith.constant 0 : i32
    return %c0_i32, %c0_i32_0 : i32, i32
  }
  func.func @transform_2(%arg0: i32, %arg1: i32) -> (i32, i32) {
    %c0_i32 = arith.constant 0 : i32
    %c0_i32_0 = arith.constant 0 : i32
    %c0_i32_1 = arith.constant 0 : i32
    return %c0_i32, %c0_i32_0 : i32, i32
  }
  func.func @transform_3(%arg0: i32, %arg1: i32) -> (i32, i32) {
    %c0_i32 = arith.constant 0 : i32
    %c0_i32_0 = arith.constant 0 : i32
    return %c0_i32, %arg1 : i32, i32
  }
}

module attributes {stable_mosaic.version = 11 : i64} {
  func.func @_matmul_bias_kernel(%arg0: i32, %arg1: i32, %arg2: memref<128x576xbf16, #tpu.memory_space<vmem>>, %arg3: memref<576x128xbf16, #tpu.memory_space<vmem>>, %arg4: memref<128x1xf32, #tpu.memory_space<vmem>>, %arg5: memref<128x128xf32, #tpu.memory_space<vmem>>) attributes {dimension_semantics = [#tpu.dimension_semantics<parallel>, #tpu.dimension_semantics<parallel>], iteration_bounds = array<i64: 1, 1>, scalar_prefetch = 0 : i64, scratch_operands = 0 : i64, tpu.core_type = #tpu.core_type<tc>, window_params = [{transform_indices = @transform_0, window_bounds = array<i64: 128, 576>}, {transform_indices = @transform_1, window_bounds = array<i64: 576, 128>}, {transform_indices = @transform_2, window_bounds = array<i64: 128, 1>}, {transform_indices = @transform_3, window_bounds = array<i64: 128, 128>}]} {
    %c0 = arith.constant 0 : index
    %c0_0 = arith.constant 0 : index
    %0 = vector.load %arg2[%c0, %c0_0] : memref<128x576xbf16, #tpu.memory_space<vmem>>, vector<128x576xbf16>
    %c0_1 = arith.constant 0 : index
    %c0_2 = arith.constant 0 : index
    %1 = vector.load %arg3[%c0_1, %c0_2] : memref<576x128xbf16, #tpu.memory_space<vmem>>, vector<576x128xbf16>
    %cst = arith.constant dense<0.000000e+00> : vector<128x128xf32>
    %2 = tpu.matmul %0, %1, %cst {dimension_numbers = #tpu.dot_dimension_numbers<[1], [0], [0], [1], [0, 0, 1, 1], [], []>} : vector<128x576xbf16>, vector<576x128xbf16>, vector<128x128xf32> -> vector<128x128xf32>
    %c0_3 = arith.constant 0 : index
    %c0_4 = arith.constant 0 : index
    %3 = vector.load %arg4[%c0_3, %c0_4] : memref<128x1xf32, #tpu.memory_space<vmem>>, vector<128x1xf32>
    %4 = vector.broadcast %3 : vector<128x1xf32> to vector<128x128xf32>
    %5 = arith.addf %2, %4 : vector<128x128xf32>
    %c0_5 = arith.constant 0 : index
    %c0_6 = arith.constant 0 : index
    %6 = vector.load %arg5[%c0_5, %c0_6] : memref<128x128xf32, #tpu.memory_space<vmem>>, vector<128x128xf32>
    tpu.vector_store %arg5[%c0_5, %c0_6], %5 {strides = array<i32>} : memref<128x128xf32, #tpu.memory_space<vmem>>, vector<128x128xf32>,
    return
  }
  func.func @transform_0(%arg0: i32, %arg1: i32) -> (i32, i32) {
    %c0_i32 = arith.constant 0 : i32
    %c0_i32_0 = arith.constant 0 : i32
    return %arg0, %c0_i32 : i32, i32
  }
  func.func @transform_1(%arg0: i32, %arg1: i32) -> (i32, i32) {
    %c0_i32 = arith.constant 0 : i32
    %c0_i32_0 = arith.constant 0 : i32
    return %c0_i32, %arg1 : i32, i32
  }
  func.func @transform_2(%arg0: i32, %arg1: i32) -> (i32, i32) {
    %c0_i32 = arith.constant 0 : i32
    %c0_i32_0 = arith.constant 0 : i32
    return %arg0, %c0_i32 : i32, i32
  }
  func.func @transform_3(%arg0: i32, %arg1: i32) -> (i32, i32) {
    %c0_i32 = arith.constant 0 : i32
    return %arg0, %arg1 : i32, i32
  }
}

module attributes {stable_mosaic.version = 11 : i64} {
  func.func @kernel(%arg0: i32, %arg1: i32, %arg2: memref<32x512xf32, #tpu.memory_space<vmem>>, %arg3: memref<32x1xf32, #tpu.memory_space<vmem>>, %arg4: memref<32x1xf32, #tpu.memory_space<vmem>>, %arg5: memref<32x512xbf16, #tpu.memory_space<vmem>>, %arg6: memref<32x1xf32, #tpu.memory_space<vmem>>, %arg7: memref<32x1xf32, #tpu.memory_space<vmem>>) attributes {dimension_semantics = [#tpu.dimension_semantics<arbitrary>, #tpu.dimension_semantics<arbitrary>], iteration_bounds = array<i64: 2, 1>, scalar_prefetch = 0 : i64, scratch_operands = 2 : i64, tpu.core_type = #tpu.core_type<tc>, window_params = [{transform_indices = @transform_0, window_bounds = array<i64: 32, 512>}, {pipeline_mode = #tpu.pipeline_mode<synchronous>, transform_indices = @transform_1, window_bounds = array<i64: 32, 1>}, {pipeline_mode = #tpu.pipeline_mode<synchronous>, transform_indices = @transform_2, window_bounds = array<i64: 32, 1>}, {transform_indices = @transform_3, window_bounds = array<i64: 32, 512>}]} {
    %c0_i32 = arith.constant 0 : i32
    %0 = arith.cmpi eq, %arg0, %c0_i32 : i32
    %c0_i32_0 = arith.constant 0 : i32
    %1 = arith.cmpi eq, %arg1, %c0_i32_0 : i32
    %2 = arith.andi %0, %1 : i1
    %3 = arith.extui %2 : i1 to i32
    %c0_i32_1 = arith.constant 0 : i32
    %4 = arith.cmpi ne, %3, %c0_i32_1 : i32
    scf.if %4 {
      %cst = arith.constant 0.000000e+00 : f32
      %12 = vector.broadcast %cst : f32 to vector<32x1xf32>
      %c0_6 = arith.constant 0 : index
      %c0_7 = arith.constant 0 : index
      %13 = vector.load %arg6[%c0_6, %c0_7] : memref<32x1xf32, #tpu.memory_space<vmem>>, vector<32x1xf32>
      tpu.vector_store %arg6[%c0_6, %c0_7], %12 {strides = array<i32>} : memref<32x1xf32, #tpu.memory_space<vmem>>, vector<32x1xf32>,
      %cst_8 = arith.constant 0.000000e+00 : f32
      %14 = vector.broadcast %cst_8 : f32 to vector<32x1xf32>
      %c0_9 = arith.constant 0 : index
      %c0_10 = arith.constant 0 : index
      %15 = vector.load %arg7[%c0_9, %c0_10] : memref<32x1xf32, #tpu.memory_space<vmem>>, vector<32x1xf32>
      tpu.vector_store %arg7[%c0_9, %c0_10], %14 {strides = array<i32>} : memref<32x1xf32, #tpu.memory_space<vmem>>, vector<32x1xf32>,
    } else {
    }
    %c0 = arith.constant 0 : index
    %c0_2 = arith.constant 0 : index
    %5 = vector.load %arg2[%c0, %c0_2] : memref<32x512xf32, #tpu.memory_space<vmem>>, vector<32x512xf32>
    %c0_i32_3 = arith.constant 0 : i32
    %6 = arith.cmpi eq, %arg0, %c0_i32_3 : i32
    %7 = arith.extui %6 : i1 to i32
    %c0_i32_4 = arith.constant 0 : i32
    %8 = arith.cmpi ne, %7, %c0_i32_4 : i32
    scf.if %8 {
      %c0_6 = arith.constant 0 : index
      %c0_7 = arith.constant 0 : index
      %12 = vector.load %arg6[%c0_6, %c0_7] : memref<32x1xf32, #tpu.memory_space<vmem>>, vector<32x1xf32>
      %cst = arith.constant dense<0.000000e+00> : vector<32xf32>
      %13 = vector.multi_reduction <add>, %5, %cst [1] : vector<32x512xf32> to vector<32xf32>
      %14 = vector.shape_cast %13 : vector<32xf32> to vector<32x1xf32>
      %15 = arith.addf %12, %14 : vector<32x1xf32>
      %c0_8 = arith.constant 0 : index
      %c0_9 = arith.constant 0 : index
      %16 = vector.load %arg6[%c0_8, %c0_9] : memref<32x1xf32, #tpu.memory_space<vmem>>, vector<32x1xf32>
      tpu.vector_store %arg6[%c0_8, %c0_9], %15 {strides = array<i32>} : memref<32x1xf32, #tpu.memory_space<vmem>>, vector<32x1xf32>,
      %c0_10 = arith.constant 0 : index
      %c0_11 = arith.constant 0 : index
      %17 = vector.load %arg7[%c0_10, %c0_11] : memref<32x1xf32, #tpu.memory_space<vmem>>, vector<32x1xf32>
      %18 = arith.mulf %5, %5 : vector<32x512xf32>
      %cst_12 = arith.constant dense<0.000000e+00> : vector<32xf32>
      %19 = vector.multi_reduction <add>, %18, %cst_12 [1] : vector<32x512xf32> to vector<32xf32>
      %20 = vector.shape_cast %19 : vector<32xf32> to vector<32x1xf32>
      %21 = arith.addf %17, %20 : vector<32x1xf32>
      %c0_13 = arith.constant 0 : index
      %c0_14 = arith.constant 0 : index
      %22 = vector.load %arg7[%c0_13, %c0_14] : memref<32x1xf32, #tpu.memory_space<vmem>>, vector<32x1xf32>
      tpu.vector_store %arg7[%c0_13, %c0_14], %21 {strides = array<i32>} : memref<32x1xf32, #tpu.memory_space<vmem>>, vector<32x1xf32>,
    } else {
    }
    %c1_i32 = arith.constant 1 : i32
    %9 = arith.cmpi eq, %arg0, %c1_i32 : i32
    %10 = arith.extui %9 : i1 to i32
    %c0_i32_5 = arith.constant 0 : i32
    %11 = arith.cmpi ne, %10, %c0_i32_5 : i32
    scf.if %11 {
      %c0_6 = arith.constant 0 : index
      %c0_7 = arith.constant 0 : index
      %12 = vector.load %arg6[%c0_6, %c0_7] : memref<32x1xf32, #tpu.memory_space<vmem>>, vector<32x1xf32>
      %cst = arith.constant 0.001953125 : f32
      %13 = vector.broadcast %cst : f32 to vector<32x1xf32>
      %14 = arith.mulf %12, %13 : vector<32x1xf32>
      %c0_8 = arith.constant 0 : index
      %c0_9 = arith.constant 0 : index
      %15 = vector.load %arg7[%c0_8, %c0_9] : memref<32x1xf32, #tpu.memory_space<vmem>>, vector<32x1xf32>
      %cst_10 = arith.constant 0.001953125 : f32
      %16 = vector.broadcast %cst_10 : f32 to vector<32x1xf32>
      %17 = arith.mulf %15, %16 : vector<32x1xf32>
      %18 = arith.mulf %14, %14 : vector<32x1xf32>
      %19 = arith.subf %17, %18 : vector<32x1xf32>
      %cst_11 = arith.constant 9.99999974E-6 : f32
      %20 = vector.broadcast %cst_11 : f32 to vector<32x1xf32>
      %21 = arith.addf %19, %20 : vector<32x1xf32>
      %22 = math.rsqrt %21 : vector<32x1xf32>
      %c0_12 = arith.constant 0 : index
      %c0_13 = arith.constant 0 : index
      %23 = vector.load %arg3[%c0_12, %c0_13] : memref<32x1xf32, #tpu.memory_space<vmem>>, vector<32x1xf32>
      %24 = arith.mulf %22, %23 : vector<32x1xf32>
      %c0_14 = arith.constant 0 : index
      %c0_15 = arith.constant 0 : index
      %25 = vector.load %arg4[%c0_14, %c0_15] : memref<32x1xf32, #tpu.memory_space<vmem>>, vector<32x1xf32>
      %26 = arith.mulf %14, %24 : vector<32x1xf32>
      %27 = arith.subf %25, %26 : vector<32x1xf32>
      %28 = vector.broadcast %24 : vector<32x1xf32> to vector<32x512xf32>
      %29 = arith.mulf %5, %28 : vector<32x512xf32>
      %30 = vector.broadcast %27 : vector<32x1xf32> to vector<32x512xf32>
      %31 = arith.addf %29, %30 : vector<32x512xf32>
      %cst_16 = arith.constant 0.000000e+00 : f32
      %32 = vector.broadcast %cst_16 : f32 to vector<32x512xf32>
      %33 = arith.maximumf %31, %32 : vector<32x512xf32>
      %34 = arith.truncf %33 : vector<32x512xf32> to vector<32x512xbf16>
      %c0_17 = arith.constant 0 : index
      %c0_18 = arith.constant 0 : index
      %35 = vector.load %arg5[%c0_17, %c0_18] : memref<32x512xbf16, #tpu.memory_space<vmem>>, vector<32x512xbf16>
      tpu.vector_store %arg5[%c0_17, %c0_18], %34 {strides = array<i32>} : memref<32x512xbf16, #tpu.memory_space<vmem>>, vector<32x512xbf16>,
    } else {
    }
    return
  }
  func.func @transform_0(%arg0: i32, %arg1: i32) -> (i32, i32) {
    %c0_i32 = arith.constant 0 : i32
    %c0_i32_0 = arith.constant 0 : i32
    return %c0_i32, %arg1 : i32, i32
  }
  func.func @transform_1(%arg0: i32, %arg1: i32) -> (i32, i32) {
    %c0_i32 = arith.constant 0 : i32
    %c0_i32_0 = arith.constant 0 : i32
    %c0_i32_1 = arith.constant 0 : i32
    return %c0_i32, %c0_i32_0 : i32, i32
  }
  func.func @transform_2(%arg0: i32, %arg1: i32) -> (i32, i32) {
    %c0_i32 = arith.constant 0 : i32
    %c0_i32_0 = arith.constant 0 : i32
    %c0_i32_1 = arith.constant 0 : i32
    return %c0_i32, %c0_i32_0 : i32, i32
  }
  func.func @transform_3(%arg0: i32, %arg1: i32) -> (i32, i32) {
    %c0_i32 = arith.constant 0 : i32
    %c0_i32_0 = arith.constant 0 : i32
    return %c0_i32, %arg1 : i32, i32
  }
}

module attributes {stable_mosaic.version = 11 : i64} {
  func.func @_matmul_bias_kernel(%arg0: i32, %arg1: i32, %arg2: memref<64x288xbf16, #tpu.memory_space<vmem>>, %arg3: memref<288x256xbf16, #tpu.memory_space<vmem>>, %arg4: memref<64x1xf32, #tpu.memory_space<vmem>>, %arg5: memref<64x256xf32, #tpu.memory_space<vmem>>) attributes {dimension_semantics = [#tpu.dimension_semantics<parallel>, #tpu.dimension_semantics<parallel>], iteration_bounds = array<i64: 1, 2>, scalar_prefetch = 0 : i64, scratch_operands = 0 : i64, tpu.core_type = #tpu.core_type<tc>, window_params = [{transform_indices = @transform_0, window_bounds = array<i64: 64, 288>}, {transform_indices = @transform_1, window_bounds = array<i64: 288, 256>}, {transform_indices = @transform_2, window_bounds = array<i64: 64, 1>}, {transform_indices = @transform_3, window_bounds = array<i64: 64, 256>}]} {
    %c0 = arith.constant 0 : index
    %c0_0 = arith.constant 0 : index
    %0 = vector.load %arg2[%c0, %c0_0] : memref<64x288xbf16, #tpu.memory_space<vmem>>, vector<64x288xbf16>
    %c0_1 = arith.constant 0 : index
    %c0_2 = arith.constant 0 : index
    %1 = vector.load %arg3[%c0_1, %c0_2] : memref<288x256xbf16, #tpu.memory_space<vmem>>, vector<288x256xbf16>
    %cst = arith.constant dense<0.000000e+00> : vector<64x256xf32>
    %2 = tpu.matmul %0, %1, %cst {dimension_numbers = #tpu.dot_dimension_numbers<[1], [0], [0], [1], [0, 0, 1, 1], [], []>} : vector<64x288xbf16>, vector<288x256xbf16>, vector<64x256xf32> -> vector<64x256xf32>
    %c0_3 = arith.constant 0 : index
    %c0_4 = arith.constant 0 : index
    %3 = vector.load %arg4[%c0_3, %c0_4] : memref<64x1xf32, #tpu.memory_space<vmem>>, vector<64x1xf32>
    %4 = vector.broadcast %3 : vector<64x1xf32> to vector<64x256xf32>
    %5 = arith.addf %2, %4 : vector<64x256xf32>
    %c0_5 = arith.constant 0 : index
    %c0_6 = arith.constant 0 : index
    %6 = vector.load %arg5[%c0_5, %c0_6] : memref<64x256xf32, #tpu.memory_space<vmem>>, vector<64x256xf32>
    tpu.vector_store %arg5[%c0_5, %c0_6], %5 {strides = array<i32>} : memref<64x256xf32, #tpu.memory_space<vmem>>, vector<64x256xf32>,
    return
  }
  func.func @transform_0(%arg0: i32, %arg1: i32) -> (i32, i32) {
    %c0_i32 = arith.constant 0 : i32
    %c0_i32_0 = arith.constant 0 : i32
    return %arg0, %c0_i32 : i32, i32
  }
  func.func @transform_1(%arg0: i32, %arg1: i32) -> (i32, i32) {
    %c0_i32 = arith.constant 0 : i32
    %c0_i32_0 = arith.constant 0 : i32
    return %c0_i32, %arg1 : i32, i32
  }
  func.func @transform_2(%arg0: i32, %arg1: i32) -> (i32, i32) {
    %c0_i32 = arith.constant 0 : i32
    %c0_i32_0 = arith.constant 0 : i32
    return %arg0, %c0_i32 : i32, i32
  }
  func.func @transform_3(%arg0: i32, %arg1: i32) -> (i32, i32) {
    %c0_i32 = arith.constant 0 : i32
    return %arg0, %arg1 : i32, i32
  }
}

module attributes {stable_mosaic.version = 11 : i64} {
  func.func @kernel(%arg0: i32, %arg1: i32, %arg2: memref<16x512xf32, #tpu.memory_space<vmem>>, %arg3: memref<16x1xf32, #tpu.memory_space<vmem>>, %arg4: memref<16x1xf32, #tpu.memory_space<vmem>>, %arg5: memref<16x512xbf16, #tpu.memory_space<vmem>>, %arg6: memref<16x1xf32, #tpu.memory_space<vmem>>, %arg7: memref<16x1xf32, #tpu.memory_space<vmem>>) attributes {dimension_semantics = [#tpu.dimension_semantics<arbitrary>, #tpu.dimension_semantics<arbitrary>], iteration_bounds = array<i64: 2, 4>, scalar_prefetch = 0 : i64, scratch_operands = 2 : i64, tpu.core_type = #tpu.core_type<tc>, window_params = [{transform_indices = @transform_0, window_bounds = array<i64: 16, 512>}, {pipeline_mode = #tpu.pipeline_mode<synchronous>, transform_indices = @transform_1, window_bounds = array<i64: 16, 1>}, {pipeline_mode = #tpu.pipeline_mode<synchronous>, transform_indices = @transform_2, window_bounds = array<i64: 16, 1>}, {transform_indices = @transform_3, window_bounds = array<i64: 16, 512>}]} {
    %c0_i32 = arith.constant 0 : i32
    %0 = arith.cmpi eq, %arg0, %c0_i32 : i32
    %c0_i32_0 = arith.constant 0 : i32
    %1 = arith.cmpi eq, %arg1, %c0_i32_0 : i32
    %2 = arith.andi %0, %1 : i1
    %3 = arith.extui %2 : i1 to i32
    %c0_i32_1 = arith.constant 0 : i32
    %4 = arith.cmpi ne, %3, %c0_i32_1 : i32
    scf.if %4 {
      %cst = arith.constant 0.000000e+00 : f32
      %12 = vector.broadcast %cst : f32 to vector<16x1xf32>
      %c0_6 = arith.constant 0 : index
      %c0_7 = arith.constant 0 : index
      %13 = vector.load %arg6[%c0_6, %c0_7] : memref<16x1xf32, #tpu.memory_space<vmem>>, vector<16x1xf32>
      tpu.vector_store %arg6[%c0_6, %c0_7], %12 {strides = array<i32>} : memref<16x1xf32, #tpu.memory_space<vmem>>, vector<16x1xf32>,
      %cst_8 = arith.constant 0.000000e+00 : f32
      %14 = vector.broadcast %cst_8 : f32 to vector<16x1xf32>
      %c0_9 = arith.constant 0 : index
      %c0_10 = arith.constant 0 : index
      %15 = vector.load %arg7[%c0_9, %c0_10] : memref<16x1xf32, #tpu.memory_space<vmem>>, vector<16x1xf32>
      tpu.vector_store %arg7[%c0_9, %c0_10], %14 {strides = array<i32>} : memref<16x1xf32, #tpu.memory_space<vmem>>, vector<16x1xf32>,
    } else {
    }
    %c0 = arith.constant 0 : index
    %c0_2 = arith.constant 0 : index
    %5 = vector.load %arg2[%c0, %c0_2] : memref<16x512xf32, #tpu.memory_space<vmem>>, vector<16x512xf32>
    %c0_i32_3 = arith.constant 0 : i32
    %6 = arith.cmpi eq, %arg0, %c0_i32_3 : i32
    %7 = arith.extui %6 : i1 to i32
    %c0_i32_4 = arith.constant 0 : i32
    %8 = arith.cmpi ne, %7, %c0_i32_4 : i32
    scf.if %8 {
      %c0_6 = arith.constant 0 : index
      %c0_7 = arith.constant 0 : index
      %12 = vector.load %arg6[%c0_6, %c0_7] : memref<16x1xf32, #tpu.memory_space<vmem>>, vector<16x1xf32>
      %cst = arith.constant dense<0.000000e+00> : vector<16xf32>
      %13 = vector.multi_reduction <add>, %5, %cst [1] : vector<16x512xf32> to vector<16xf32>
      %14 = vector.shape_cast %13 : vector<16xf32> to vector<16x1xf32>
      %15 = arith.addf %12, %14 : vector<16x1xf32>
      %c0_8 = arith.constant 0 : index
      %c0_9 = arith.constant 0 : index
      %16 = vector.load %arg6[%c0_8, %c0_9] : memref<16x1xf32, #tpu.memory_space<vmem>>, vector<16x1xf32>
      tpu.vector_store %arg6[%c0_8, %c0_9], %15 {strides = array<i32>} : memref<16x1xf32, #tpu.memory_space<vmem>>, vector<16x1xf32>,
      %c0_10 = arith.constant 0 : index
      %c0_11 = arith.constant 0 : index
      %17 = vector.load %arg7[%c0_10, %c0_11] : memref<16x1xf32, #tpu.memory_space<vmem>>, vector<16x1xf32>
      %18 = arith.mulf %5, %5 : vector<16x512xf32>
      %cst_12 = arith.constant dense<0.000000e+00> : vector<16xf32>
      %19 = vector.multi_reduction <add>, %18, %cst_12 [1] : vector<16x512xf32> to vector<16xf32>
      %20 = vector.shape_cast %19 : vector<16xf32> to vector<16x1xf32>
      %21 = arith.addf %17, %20 : vector<16x1xf32>
      %c0_13 = arith.constant 0 : index
      %c0_14 = arith.constant 0 : index
      %22 = vector.load %arg7[%c0_13, %c0_14] : memref<16x1xf32, #tpu.memory_space<vmem>>, vector<16x1xf32>
      tpu.vector_store %arg7[%c0_13, %c0_14], %21 {strides = array<i32>} : memref<16x1xf32, #tpu.memory_space<vmem>>, vector<16x1xf32>,
    } else {
    }
    %c1_i32 = arith.constant 1 : i32
    %9 = arith.cmpi eq, %arg0, %c1_i32 : i32
    %10 = arith.extui %9 : i1 to i32
    %c0_i32_5 = arith.constant 0 : i32
    %11 = arith.cmpi ne, %10, %c0_i32_5 : i32
    scf.if %11 {
      %c0_6 = arith.constant 0 : index
      %c0_7 = arith.constant 0 : index
      %12 = vector.load %arg6[%c0_6, %c0_7] : memref<16x1xf32, #tpu.memory_space<vmem>>, vector<16x1xf32>
      %cst = arith.constant 4.8828125E-4 : f32
      %13 = vector.broadcast %cst : f32 to vector<16x1xf32>
      %14 = arith.mulf %12, %13 : vector<16x1xf32>
      %c0_8 = arith.constant 0 : index
      %c0_9 = arith.constant 0 : index
      %15 = vector.load %arg7[%c0_8, %c0_9] : memref<16x1xf32, #tpu.memory_space<vmem>>, vector<16x1xf32>
      %cst_10 = arith.constant 4.8828125E-4 : f32
      %16 = vector.broadcast %cst_10 : f32 to vector<16x1xf32>
      %17 = arith.mulf %15, %16 : vector<16x1xf32>
      %18 = arith.mulf %14, %14 : vector<16x1xf32>
      %19 = arith.subf %17, %18 : vector<16x1xf32>
      %cst_11 = arith.constant 9.99999974E-6 : f32
      %20 = vector.broadcast %cst_11 : f32 to vector<16x1xf32>
      %21 = arith.addf %19, %20 : vector<16x1xf32>
      %22 = math.rsqrt %21 : vector<16x1xf32>
      %c0_12 = arith.constant 0 : index
      %c0_13 = arith.constant 0 : index
      %23 = vector.load %arg3[%c0_12, %c0_13] : memref<16x1xf32, #tpu.memory_space<vmem>>, vector<16x1xf32>
      %24 = arith.mulf %22, %23 : vector<16x1xf32>
      %c0_14 = arith.constant 0 : index
      %c0_15 = arith.constant 0 : index
      %25 = vector.load %arg4[%c0_14, %c0_15] : memref<16x1xf32, #tpu.memory_space<vmem>>, vector<16x1xf32>
      %26 = arith.mulf %14, %24 : vector<16x1xf32>
      %27 = arith.subf %25, %26 : vector<16x1xf32>
      %28 = vector.broadcast %24 : vector<16x1xf32> to vector<16x512xf32>
      %29 = arith.mulf %5, %28 : vector<16x512xf32>
      %30 = vector.broadcast %27 : vector<16x1xf32> to vector<16x512xf32>
      %31 = arith.addf %29, %30 : vector<16x512xf32>
      %cst_16 = arith.constant 0.000000e+00 : f32
      %32 = vector.broadcast %cst_16 : f32 to vector<16x512xf32>
      %33 = arith.maximumf %31, %32 : vector<16x512xf32>
      %34 = arith.truncf %33 : vector<16x512xf32> to vector<16x512xbf16>
      %c0_17 = arith.constant 0 : index
      %c0_18 = arith.constant 0 : index
      %35 = vector.load %arg5[%c0_17, %c0_18] : memref<16x512xbf16, #tpu.memory_space<vmem>>, vector<16x512xbf16>
      tpu.vector_store %arg5[%c0_17, %c0_18], %34 {strides = array<i32>} : memref<16x512xbf16, #tpu.memory_space<vmem>>, vector<16x512xbf16>,
    } else {
    }
    return
  }
  func.func @transform_0(%arg0: i32, %arg1: i32) -> (i32, i32) {
    %c0_i32 = arith.constant 0 : i32
    %c0_i32_0 = arith.constant 0 : i32
    return %c0_i32, %arg1 : i32, i32
  }
  func.func @transform_1(%arg0: i32, %arg1: i32) -> (i32, i32) {
    %c0_i32 = arith.constant 0 : i32
    %c0_i32_0 = arith.constant 0 : i32
    %c0_i32_1 = arith.constant 0 : i32
    return %c0_i32, %c0_i32_0 : i32, i32
  }
  func.func @transform_2(%arg0: i32, %arg1: i32) -> (i32, i32) {
    %c0_i32 = arith.constant 0 : i32
    %c0_i32_0 = arith.constant 0 : i32
    %c0_i32_1 = arith.constant 0 : i32
    return %c0_i32, %c0_i32_0 : i32, i32
  }
  func.func @transform_3(%arg0: i32, %arg1: i32) -> (i32, i32) {
    %c0_i32 = arith.constant 0 : i32
    %c0_i32_0 = arith.constant 0 : i32
    return %c0_i32, %arg1 : i32, i32
  }
}

module attributes {stable_mosaic.version = 11 : i64} {
  func.func @_matmul_bias_kernel(%arg0: i32, %arg1: i32, %arg2: memref<12x144xbf16, #tpu.memory_space<vmem>>, %arg3: memref<144x256xbf16, #tpu.memory_space<vmem>>, %arg4: memref<12x1xf32, #tpu.memory_space<vmem>>, %arg5: memref<12x256xf32, #tpu.memory_space<vmem>>) attributes {dimension_semantics = [#tpu.dimension_semantics<parallel>, #tpu.dimension_semantics<parallel>], iteration_bounds = array<i64: 1, 8>, scalar_prefetch = 0 : i64, scratch_operands = 0 : i64, tpu.core_type = #tpu.core_type<tc>, window_params = [{transform_indices = @transform_0, window_bounds = array<i64: 12, 144>}, {transform_indices = @transform_1, window_bounds = array<i64: 144, 256>}, {transform_indices = @transform_2, window_bounds = array<i64: 12, 1>}, {transform_indices = @transform_3, window_bounds = array<i64: 12, 256>}]} {
    %c0 = arith.constant 0 : index
    %c0_0 = arith.constant 0 : index
    %0 = vector.load %arg2[%c0, %c0_0] : memref<12x144xbf16, #tpu.memory_space<vmem>>, vector<12x144xbf16>
    %c0_1 = arith.constant 0 : index
    %c0_2 = arith.constant 0 : index
    %1 = vector.load %arg3[%c0_1, %c0_2] : memref<144x256xbf16, #tpu.memory_space<vmem>>, vector<144x256xbf16>
    %cst = arith.constant dense<0.000000e+00> : vector<12x256xf32>
    %2 = tpu.matmul %0, %1, %cst {dimension_numbers = #tpu.dot_dimension_numbers<[1], [0], [0], [1], [0, 0, 1, 1], [], []>} : vector<12x144xbf16>, vector<144x256xbf16>, vector<12x256xf32> -> vector<12x256xf32>
    %c0_3 = arith.constant 0 : index
    %c0_4 = arith.constant 0 : index
    %3 = vector.load %arg4[%c0_3, %c0_4] : memref<12x1xf32, #tpu.memory_space<vmem>>, vector<12x1xf32>
    %4 = vector.broadcast %3 : vector<12x1xf32> to vector<12x256xf32>
    %5 = arith.addf %2, %4 : vector<12x256xf32>
    %c0_5 = arith.constant 0 : index
    %c0_6 = arith.constant 0 : index
    %6 = vector.load %arg5[%c0_5, %c0_6] : memref<12x256xf32, #tpu.memory_space<vmem>>, vector<12x256xf32>
    tpu.vector_store %arg5[%c0_5, %c0_6], %5 {strides = array<i32>} : memref<12x256xf32, #tpu.memory_space<vmem>>, vector<12x256xf32>,
    return
  }
  func.func @transform_0(%arg0: i32, %arg1: i32) -> (i32, i32) {
    %c0_i32 = arith.constant 0 : i32
    %c0_i32_0 = arith.constant 0 : i32
    return %arg0, %c0_i32 : i32, i32
  }
  func.func @transform_1(%arg0: i32, %arg1: i32) -> (i32, i32) {
    %c0_i32 = arith.constant 0 : i32
    %c0_i32_0 = arith.constant 0 : i32
    return %c0_i32, %arg1 : i32, i32
  }
  func.func @transform_2(%arg0: i32, %arg1: i32) -> (i32, i32) {
    %c0_i32 = arith.constant 0 : i32
    %c0_i32_0 = arith.constant 0 : i32
    return %arg0, %c0_i32 : i32, i32
  }
  func.func @transform_3(%arg0: i32, %arg1: i32) -> (i32, i32) {
    %c0_i32 = arith.constant 0 : i32
    return %arg0, %arg1 : i32, i32
  }
}

</mosaic_0001>

<bundles_post_ra>
// kernel: _lambda_.8
= control target key start
LH: loop header
LB: loop body
LE: loop exit
PB: predicated region body
PF: predicated region fallthrough
CT: control target
= control target key end

     0   :  { %8 = vsyncpa [#allocation3], 0  ;;  %s1653_s0 = inlined_call_operand.vmem [shape: bf16[2,576], index: 0, kind: input, shape index: {}]   ;;  %s1654_s1 = inlined_call_operand.hbm [shape: bf16[576,2048], index: 1, kind: input, shape index: {}]   ;;  %s1655_s2 = inlined_call_operand.hbm [shape: f32[1,2048], index: 2, kind: input, shape index: {}]   ;;  %s1656_s3 = inlined_call_operand.vmem [shape: f32[2,2048], index: 3, kind: output, shape index: {}]  }
   0x1   :  { %10 = vsyncpa [#allocation3 + $0x1], 0 }
   0x2   :  { %11 = vsyncpa [#allocation5], 0 }
   0x3   :  { %13 = vsyncpa [#allocation5 + $0x1], 0  ;;  %s1437_s12 = smov 0   ;;  %s1439_s13 = smov 0  }
   0x4   :  { %s1441_s14 = smov 0   ;;  %s1443_s15 = smov 0  }
   0x5   :  { %s1445_s16 = smov 0   ;;  %s1447_s17 = smov 0  }
   0x6 LB: > { %s1030_s18 = sadd.s32 4294967295, %s1408_s17   ;;  %s28_s19 = sadd.s32 1, %s1404_s16  ;;  %s1408_s17 = sphi %s1447_s17, %s19_s17   ;;  %s1404_s16 = sphi %s1445_s16, %s1664_s16   ;;  %s1400_s15 = sphi %s1443_s15, %s1663_s15   ;;  %s1396_s14 = sphi %s1441_s14, %s1662_s14   ;;  %s1392_s13 = sphi %s1439_s13, %s1661_s13   ;;  %s1388_s12 = sphi %s1437_s12, %s1660_s12  }
   0x7   : > { %p29_p0 = scmp.ge.s32.totalorder %s28_s19, 8  ;;  %s64_s20 = sadd.s32 1, %s1396_s14 }
   0x8   : > { %p71_p1 = scmp.ne.s32.totalorder %s1396_s14, %s1392_s13  ;;  %p72_p2 = scmp.eq.s32.totalorder %s1408_s17, 0 }
   0x9   : > { %s1666_s19 = smov (%p29_p0, %s28_s19), 0  ;;  %p77_p4 = scmp.ne.s32.totalorder %s1392_s13, %s1388_s12 }
   0xa   : > { %p73_p3 = por %p72_p2, %p71_p1  ;;  %s61_s21 = ssub.s32 %s1404_s16, %s1666_s19 }
   0xb   : > { %p78_p5 = scmp.eq.s32.totalorder %s1030_s18, 0  ;;  %p62_p6 = scmp.eq.s32.totalorder %s61_s21, 0 }
   0xc   : > { %p1135_p8 = scmp.lt.s32.totalorder %s1408_s17, 8  ;;  %s1485_s24 = sand.u32 1, %s1396_s14  }
   0xd   : > { %p1476_p7 = por %p78_p5, %p77_p4  ;;  %s1120_s25 = sshll.u32 %s1404_s16, 7 }
   0xe   : > { %s1482_s23 = scalar_select %p62_p6, %s1396_s14, %s64_s20  }
   0xf   : > { %s1122_s26 = smul.u32 576, %s1485_s24  ;;  %s172_s29 = scalar_lea.hbm %s1654_s1, %s1120_s25 }
  0x10   : > { %p1492_p9 = pnand %p1135_p8, %p73_p3  ;;  %p1040_p10 = scmp.ge.s32.totalorder %s1408_s17, 1 }
  0x11   : > { %s166_s4 = scalar_lea.vmem [#allocation2], %s1122_s26  ;;  %s163_s6 = scalar_lea.sflag [#allocation3], %s1485_s24 }
  0x12   : > { %s173_s5 = sshll.u32 %s166_s4, 4  ;;  %p1300_p11 = pneg %p1492_p9  ;;  %s174_s5 = int_to_ptr.vmem [resolvable:$true] %s173_s5 }
  0x13   : > { %s1311_s7 = scalar_lea.vmem %s174_s5, 9216  ;;  %s1410_s8 = smov [#allocation2]  }
  0x14   : > { %p1312_p12 = scmp.ne.s32.totalorder %s174_s5, %s1311_s7  ;;  %s1316_s9 = sshll.u32 %s1410_s8, 4  ;;  %s1317_s9 = int_to_ptr.vmem [resolvable:$false] %s1316_s9 }
  0x15   : > { %s1318_s10 = scalar_lea.vmem %s1317_s9, 18432  ;;  %p1319_p1 = scmp.lt.s32.totalorder %s174_s5, %s1317_s9 }
  0x16   : > { %p1314_p13 = pnand %p1312_p12, %p1300_p11  ;;  %p1320_p2 = scmp.lt.s32.totalorder %s1318_s10, %s1311_s7 }
  0x18   : > { %p1315_p0 = pneg %p1314_p13  ;;  %p1321_p3 = por %p1320_p2, %p1319_p1 }
  0x1a   : > { %p1322_p4 = pnand %p1321_p3, %p1315_p0 }
  0x1c   : > { %1325 = shalt.err (!%p1322_p4)
}
  0x1d   : > { %s1411_s11 = smov 1024   ;;  %s1412_s12 = smov 128  }
  0x1e   : > { %s1413_s18 = smov 8   ;;  %p200_p5 = scmp.lt.s32.totalorder %s1408_s17, 9 }
  0x1f   : > { %1131 = dma.hbm_to_vmem [thread:$0]  (!%p1492_p9), %s172_s29, 9216, %s174_s5, %s163_s6, %s1411_s11, %s1412_s12, %s1413_s18  }
  0x20   : > { %s1037_s20 = sshll.u32 %s1485_s24, 1  ;;  %s1121_s21 = sshll.u32 %s1404_s16, 5 }
  0x21   : > { %p1510_p6 = pnand %p1040_p10, %p200_p5  ;;  %s193_s28 = scalar_lea.hbm %s1655_s2, %s1121_s21 }
  0x22   : > { %s187_s4 = scalar_lea.vmem [#allocation4], %s1037_s20  ;;  %s184_s8 = scalar_lea.sflag [#allocation5], %s1485_s24 }
  0x23   : > { %s195_s7 = sshll.u32 %s187_s4, 4  ;;  %s1414_s29 = smov [#allocation4]   ;;  %s196_s7 = int_to_ptr.vmem [resolvable:$true] %s195_s7 }
  0x24   : > { %s1339_s9 = scalar_lea.vmem %s196_s7, 32  ;;  %s1344_s5 = sshll.u32 %s1414_s29, 4  ;;  %s1345_s5 = int_to_ptr.vmem [resolvable:$false] %s1344_s5 }
  0x25   : > { %p1340_p8 = scmp.ne.s32.totalorder %s196_s7, %s1339_s9  ;;  %s1346_s6 = scalar_lea.vmem %s1345_s5, 64 }
  0x26   : > { %p1347_p10 = scmp.lt.s32.totalorder %s196_s7, %s1345_s5  ;;  %p1348_p0 = scmp.lt.s32.totalorder %s1346_s6, %s1339_s9 }
  0x27   : > { %p1342_p12 = pnand %p1340_p8, %p1300_p11 }
  0x28   : > { %p1349_p1 = por %p1348_p0, %p1347_p10 }
  0x29   : > { %p1343_p13 = pneg %p1342_p12 }
  0x2b   : > { %p1350_p2 = pnand %p1349_p1, %p1343_p13 }
  0x2d   : > { %1353 = shalt.err (!%p1350_p2)
}
  0x2e   : > { %1134 = dma.hbm_to_vmem [thread:$0]  (!%p1492_p9), %s193_s28, 32, %s196_s7, %s184_s8  }
  0x2f   : > { %204 = sbr.rel (%p1510_p6) target bundleno = 337 (0x151), region = 32  ;;  %s206_s24 = sand.u32 (!%p1510_p6), 1, %s1392_s13  }
  0x30   : > { %s1123_s10 = smul.u32 (!%p1510_p6), 576, %s206_s24  ;;  %s207_s11 = scalar_lea.sflag (!%p1510_p6), [#allocation3], %s206_s24 }
  0x32   : > { %s1526_s12 = scalar_lea.vmem (!%p1510_p6), [#allocation2], %s1123_s10 }
  0x34   : > { %1379 = dma.done.wait (%p1476_p7), %s207_s11, 9216  }
  0x35   : > { %1381 = vsyncadd (%p1476_p7), %s207_s11, 4294958080  ;;  %s1041_s18 = sshll.u32 %s206_s24, 1  ;;  %s216_s20 = scalar_lea.sflag [#allocation5], %s206_s24 }
  0x36   : > { %s1532_s30 = scalar_lea.vmem [#allocation4], %s1041_s18 }
  0x37   : > { %1383 = dma.done.wait (%p1476_p7), %s216_s20, 32  }
  0x38   : > { %1385 = vsyncadd (%p1476_p7), %s216_s20, 4294967264  ;;  %v1189_v0 = vld [vmem:[%s1526_s12 + $0x74] ss:$8 sps:$4 sm:$0xff]   ;;  %v1191_v1 = vld [vmem:[%s1526_s12 + $0x70] ss:$8 sps:$4 sm:$0xff]   ;;  %v347_v35 = vlaneseq  ;;  %vm761_vm0 = vcmask 523264  }
  0x39   : > { %765 = vmatprep.subr.bf16.mxu0 %v1189_v0  ;;  %v1192_v2 = vld [vmem:[%s1526_s12 + $0x174] ss:$8 sps:$4 sm:$0xff]   ;;  %v1194_v3 = vld [vmem:[%s1526_s12 + $0x170] ss:$8 sps:$4 sm:$0xff]   ;;  %v1195_v4 = vld [vmem:[%s1526_s12 + $0x64] ss:$8 sps:$4 sm:$0xff]  }
  0x3a   : > { %766 = vmatpush1.bf16.msra.mxu0 %v1191_v1  ;;  %v1197_v5 = vld [vmem:[%s1526_s12 + $0x60] ss:$8 sps:$4 sm:$0xff]   ;;  %806 = vmatprep.subr.bf16.mxu1 %v1192_v2  ;;  %v1198_v6 = vld [vmem:[%s1526_s12 + $0x164] ss:$8 sps:$4 sm:$0xff]   ;;  %v1201_v8 = vld [vmem:[%s1526_s12 + $0x54] ss:$8 sps:$4 sm:$0xff]  }
  0x3b   : > { %807 = vmatpush1.bf16.msra.mxu1 %v1194_v3  ;;  %767 = vmatprep.subr.bf16.mxu0 %v1195_v4  ;;  %v1200_v7 = vld [vmem:[%s1526_s12 + $0x160] ss:$8 sps:$4 sm:$0xff]   ;;  %v1203_v9 = vld [vmem:[%s1526_s12 + $0x50] ss:$8 sps:$4 sm:$0xff]   ;;  %v1204_v10 = vld [vmem:[%s1526_s12 + $0x154] ss:$8 sps:$4 sm:$0xff]  }
  0x3c   : > { %808 = vmatprep.subr.bf16.mxu1 %v1198_v6  ;;  %v1207_v11 = vld [vmem:[%s1526_s12 + $0x44] ss:$8 sps:$4 sm:$0xff]   ;;  %v1206_v12 = vld [vmem:[%s1526_s12 + $0x150] ss:$8 sps:$4 sm:$0xff]   ;;  %v1209_v14 = vld [vmem:[%s1526_s12 + $0x40] ss:$8 sps:$4 sm:$0xff]  }
  0x3d   : > { %v1210_v13 = vld [vmem:[%s1526_s12 + $0x144] ss:$8 sps:$4 sm:$0xff]   ;;  %v1213_v15 = vld [vmem:[%s1526_s12 + $0x34] ss:$8 sps:$4 sm:$0xff]   ;;  %v1212_v16 = vld [vmem:[%s1526_s12 + $0x140] ss:$8 sps:$4 sm:$0xff]  }
  0x3e   : > { %768 = vmatpush1.bf16.msra.mxu0 %v1197_v5  ;;  %v1216_v17 = vld [vmem:[%s1526_s12 + $0x134] ss:$8 sps:$4 sm:$0xff]   ;;  %v1215_v18 = vld [vmem:[%s1526_s12 + $0x30] ss:$8 sps:$4 sm:$0xff]   ;;  %v1219_v19 = vld [vmem:[%s1526_s12 + $0x24] ss:$8 sps:$4 sm:$0xff]  }
  0x3f   : > { %769 = vmatprep.subr.bf16.mxu0 %v1201_v8  ;;  %809 = vmatpush1.bf16.msra.mxu1 %v1200_v7  ;;  %v1218_v20 = vld [vmem:[%s1526_s12 + $0x130] ss:$8 sps:$4 sm:$0xff]   ;;  %v1222_v21 = vld [vmem:[%s1526_s12 + $0x124] ss:$8 sps:$4 sm:$0xff]   ;;  %v1221_v22 = vld [vmem:[%s1526_s12 + $0x20] ss:$8 sps:$4 sm:$0xff]  }
  0x40   : > { %810 = vmatprep.subr.bf16.mxu1 %v1204_v10  ;;  %v1225_v23 = vld [vmem:[%s1526_s12 + $0x14] ss:$8 sps:$4 sm:$0xff]   ;;  %v1224_v24 = vld [vmem:[%s1526_s12 + $0x120] ss:$8 sps:$4 sm:$0xff]   ;;  %v1227_v26 = vld [vmem:[%s1526_s12 + $0x10] ss:$8 sps:$4 sm:$0xff]  }
  0x41   : > { %v1228_v25 = vld [vmem:[%s1526_s12 + $0x114] ss:$8 sps:$4 sm:$0xff]   ;;  %v1231_v27 = vld [vmem:[%s1526_s12 + $0x4] ss:$8 sps:$4 sm:$0xff]   ;;  %v1230_v28 = vld [vmem:[%s1526_s12 + $0x110] ss:$8 sps:$4 sm:$0xff]  }
  0x42   : > { %770 = vmatpush1.bf16.msra.mxu0 %v1203_v9  ;;  %v1234_v29 = vld [vmem:[%s1526_s12 + $0x104] ss:$8 sps:$4 sm:$0xff]   ;;  %v1233_v30 = vld [vmem:[%s1526_s12] ss:$8 sps:$4 sm:$0xff]   ;;  %v1237_v31 = vld [vmem:[%s1526_s12 + $0xf4] ss:$8 sps:$4 sm:$0xff]  }
  0x43   : > { %771 = vmatprep.subr.bf16.mxu0 %v1207_v11  ;;  %811 = vmatpush1.bf16.msra.mxu1 %v1206_v12  ;;  %v1236_v32 = vld [vmem:[%s1526_s12 + $0x100] ss:$8 sps:$4 sm:$0xff]   ;;  %v1240_v33 = vld [vmem:[%s1526_s12 + $0x1f4] ss:$8 sps:$4 sm:$0xff]   ;;  %v1239_v34 = vld [vmem:[%s1526_s12 + $0xf0] ss:$8 sps:$4 sm:$0xff]  }
  0x44   : > { %812 = vmatprep.subr.bf16.mxu1 %v1210_v13  ;;  %v1415_v36 = vmov 1966171168   ;;  %v1243_v38 = vld [vmem:[%s1526_s12 + $0xe4] ss:$8 sps:$4 sm:$0xff]   ;;  %v1242_v39 = vld [vmem:[%s1526_s12 + $0x1f0] ss:$8 sps:$4 sm:$0xff]  }
  0x45   : > { %v360_v37 = vunpack.c.l.s4 %v1415_v36  ;;  %v1246_v40 = vld [vmem:[%s1526_s12 + $0x1e4] ss:$8 sps:$4 sm:$0xff]   ;;  %v1245_v41 = vld [vmem:[%s1526_s12 + $0xe0] ss:$8 sps:$4 sm:$0xff]   ;;  %v1577_v42 = vshrl.u32 %v347_v35, 7  ;;  %s1042_s25 = sshll.u32 %s1400_s15, 1 }
  0x46   : > { %772 = vmatpush1.bf16.msra.mxu0 %v1209_v14  ;;  %v1249_v44 = vld [vmem:[%s1526_s12 + $0xd4] ss:$8 sps:$4 sm:$0xff]   ;;  %v1248_v45 = vld [vmem:[%s1526_s12 + $0x1e0] ss:$8 sps:$4 sm:$0xff]   ;;  %v1251_v47 = vld [vmem:[%s1526_s12 + $0xd0] ss:$8 sps:$4 sm:$0xff]  }
  0x47   : > { %773 = vmatprep.subr.bf16.mxu0 %v1213_v15  ;;  %813 = vmatpush1.bf16.msra.mxu1 %v1212_v16  ;;  %v361_v43 = vunpack.c.0.s8 %v360_v37  ;;  %v1252_v46 = vld [vmem:[%s1526_s12 + $0x1d4] ss:$8 sps:$4 sm:$0xff]   ;;  %v1255_v49 = vld [vmem:[%s1526_s12 + $0xc4] ss:$8 sps:$4 sm:$0xff]   ;;  %v1254_v50 = vld [vmem:[%s1526_s12 + $0x1d0] ss:$8 sps:$4 sm:$0xff]  }
  0x48   : > { %814 = vmatprep.subr.bf16.mxu1 %v1216_v17  ;;  %v1258_v51 = vld [vmem:[%s1526_s12 + $0x1c4] ss:$8 sps:$4 sm:$0xff]   ;;  %v1257_v53 = vld [vmem:[%s1526_s12 + $0xc0] ss:$8 sps:$4 sm:$0xff]   ;;  %v1261_v55 = vld [vmem:[%s1526_s12 + $0xb4] ss:$8 sps:$4 sm:$0xff]  }
  0x49   : > { %v1584_v48 = vsub.s32 %v361_v43, %v1577_v42  ;;  %v1592_v52 = vld [vmem:[%s1653_s0] sm:$0x1f]  ;;  %v1264_v58 = vld [vmem:[%s1526_s12 + $0x1b4] ss:$8 sps:$4 sm:$0xff]   ;;  %v1263_v59 = vld [vmem:[%s1526_s12 + $0xb0] ss:$8 sps:$4 sm:$0xff]  }
  0x4a   : > { %774 = vmatpush1.bf16.msra.mxu0 %v1215_v18  ;;  %v1260_v56 = vld [vmem:[%s1526_s12 + $0x1c0] ss:$8 sps:$4 sm:$0xff]   ;;  %v1267_v61 = vld [vmem:[%s1526_s12 + $0xa4] ss:$8 sps:$4 sm:$0xff]   ;;  %v1266_v62 = vld [vmem:[%s1526_s12 + $0x1b0] ss:$8 sps:$4 sm:$0xff]  }
  0x4b   : > { %775 = vmatprep.subr.bf16.mxu0 %v1219_v19  ;;  %815 = vmatpush1.bf16.msra.mxu1 %v1218_v20  ;;  %v365_v54 = vrot.slane %v1592_v52, %v1584_v48  ;;  %v1270_v0 = vld [vmem:[%s1526_s12 + $0x1a4] ss:$8 sps:$4 sm:$0xff]   ;;  %v1269_v1 = vld [vmem:[%s1526_s12 + $0xa0] ss:$8 sps:$4 sm:$0xff]   ;;  %v1273_v2 = vld [vmem:[%s1526_s12 + $0x94] ss:$8 sps:$4 sm:$0xff]   ;;  %v358_v19 = vcombine.high %v1592_v52, %v1592_v52 }
  0x4c   : > { %816 = vmatprep.subr.bf16.mxu1 %v1222_v21  ;;  %v1272_v3 = vld [vmem:[%s1526_s12 + $0x1a0] ss:$8 sps:$4 sm:$0xff]   ;;  %v1276_v4 = vld [vmem:[%s1526_s12 + $0x194] ss:$8 sps:$4 sm:$0xff]   ;;  %v1275_v5 = vld [vmem:[%s1526_s12 + $0x90] ss:$8 sps:$4 sm:$0xff]  }
  0x4d   : > { %v373_v57 = vcombine.high %v365_v54, %v365_v54  ;;  %v1279_v6 = vld [vmem:[%s1526_s12 + $0x84] ss:$8 sps:$4 sm:$0xff]   ;;  %v1278_v7 = vld [vmem:[%s1526_s12 + $0x190] ss:$8 sps:$4 sm:$0xff]   ;;  %v1281_v9 = vld [vmem:[%s1526_s12 + $0x80] ss:$8 sps:$4 sm:$0xff]   ;;  %v380_v10 = vrot.slane %v365_v54, %v1584_v48 }
  0x4e   : > { %776 = vmatpush1.bf16.msra.mxu0 %v1221_v22  ;;  %v1282_v8 = vld [vmem:[%s1526_s12 + $0x184] ss:$8 sps:$4 sm:$0xff]   ;;  %v1288_v11 = vld [vmem:[%s1526_s12 + $0x234] ss:$8 sps:$4 sm:$0xff]   ;;  %v1285_v12 = vld [vmem:[%s1526_s12 + $0x180] ss:$8 sps:$4 sm:$0xff]   ;;  %v372_v22 = vrot.slane %v358_v19, %v1584_v48 }
  0x4f   : > { %777 = vmatprep.subr.bf16.mxu0 %v1225_v23  ;;  %817 = vmatpush1.bf16.msra.mxu1 %v1224_v24  ;;  %v394_v60 = vrot.slane %v373_v57, %v1584_v48  ;;  %v1286_v13 = vld [vmem:[%s1526_s12 + $0x230] ss:$8 sps:$4 sm:$0xff]   ;;  %v395_v14 = vcombine.high %v380_v10, %v380_v10  ;;  %v1291_v15 = vld [vmem:[%s1526_s12 + $0x224] ss:$8 sps:$4 sm:$0xff]   ;;  %v1289_v16 = vld [vmem:[%s1526_s12 + $0x220] ss:$8 sps:$4 sm:$0xff]  }
  0x50   : > { %818 = vmatprep.subr.bf16.mxu1 %v1228_v25  ;;  %v1416_v17 = vmov 0   ;;  %v1294_v18 = vld [vmem:[%s1526_s12 + $0x214] ss:$8 sps:$4 sm:$0xff]   ;;  %v1292_v20 = vld [vmem:[%s1526_s12 + $0x210] ss:$8 sps:$4 sm:$0xff]   ;;  %v387_v24 = vrot.slane %v372_v22, %v1584_v48  ;;  %p264_p7 = scmp.lt.s32.totalorder %s1042_s25, 15 }
  0x51   : > { %797 = vmatprep.mubr.bf16.mxu0 %v394_v60  ;;  %v396_v63 = vcombine.high %v394_v60, %v394_v60  ;;  %v1297_v21 = vld [vmem:[%s1526_s12 + $0x204] ss:$8 sps:$4 sm:$0xff]   ;;  %v1295_v23 = vld [vmem:[%s1526_s12 + $0x200] ss:$8 sps:$4 sm:$0xff]  }
  0x52   : > { %778 = vmatpush1.bf16.msra.mxu0 %v1227_v26  ;;  %s1668_s25 = smov (!%p264_p7, %s1042_s25), 15 }
  0x53   : > { %779 = vmatprep.subr.bf16.mxu0 %v1231_v27  ;;  %819 = vmatpush1.bf16.msra.mxu1 %v1230_v28  ;;  %s1043_s26 = sshll.u32 %s1668_s25, 1 }
  0x54   : > { %820 = vmatprep.subr.bf16.mxu1 %v1234_v29  ;;  %838 = vmatprep.mubr.bf16.mxu1 %v396_v63  ;;  %s269_s4 = scalar_lea.vmem %s1656_s3, %s1043_s26 }
  0x56   : > { %780 = vmatpush1.bf16.msra.mxu0 %v1233_v30  ;;  %v349_v30 = vsub.s32 0, %v1577_v42 }
  0x57   : > { %781 = vmatprep.subr.bf16.mxu0 %v1237_v31  ;;  %821 = vmatpush1.bf16.msra.mxu1 %v1236_v32  ;;  %v353_v31 = vsub.s32 1, %v1577_v42  ;;  %v345_v32 = vld [vmem:[%s1532_s30] sm:$0x3] }
  0x58   : > { %822 = vmatprep.subr.bf16.mxu1 %v1240_v33  ;;  %v350_v36 = vrot.slane %v345_v32, %v349_v30 }
  0x59   : > { %v354_v37 = vrot.slane %v345_v32, %v353_v31 }
  0x5a   : > { %782 = vmatpush2.bf16.msra.mxu0 %v1239_v34 }
  0x5b   : > { %783 = vmatprep.subr.bf16.mxu0 %v1243_v38  ;;  %823 = vmatpush2.bf16.msra.mxu1 %v1242_v39 }
  0x5c   : > { %824 = vmatprep.subr.bf16.mxu1 %v1246_v40 }
  0x5e   : > { %784 = vmatpush2.bf16.msra.mxu0 %v1245_v41 }
  0x5f   : > { %785 = vmatprep.subr.bf16.mxu0 %v1249_v44  ;;  %825 = vmatpush2.bf16.msra.mxu1 %v1248_v45 }
  0x60   : > { %826 = vmatprep.subr.bf16.mxu1 %v1252_v46 }
  0x62   : > { %786 = vmatpush2.bf16.msra.mxu0 %v1251_v47 }
  0x63   : > { %787 = vmatprep.subr.bf16.mxu0 %v1255_v49  ;;  %827 = vmatpush2.bf16.msra.mxu1 %v1254_v50 }
  0x64   : > { %828 = vmatprep.subr.bf16.mxu1 %v1258_v51 }
  0x66   : > { %788 = vmatpush2.bf16.msra.mxu0 %v1257_v53 }
  0x67   : > { %789 = vmatprep.subr.bf16.mxu0 %v1261_v55  ;;  %829 = vmatpush2.bf16.msra.mxu1 %v1260_v56 }
  0x68   : > { %830 = vmatprep.subr.bf16.mxu1 %v1264_v58 }
  0x6a   : > { %790 = vmatpush2.bf16.msra.mxu0 %v1263_v59 }
  0x6b   : > { %791 = vmatprep.subr.bf16.mxu0 %v1267_v61  ;;  %831 = vmatpush2.bf16.msra.mxu1 %v1266_v62 }
  0x6c   : > { %832 = vmatprep.subr.bf16.mxu1 %v1270_v0 }
  0x6e   : > { %792 = vmatpush2.bf16.msra.mxu0 %v1269_v1 }
  0x6f   : > { %793 = vmatprep.subr.bf16.mxu0 %v1273_v2  ;;  %833 = vmatpush2.bf16.msra.mxu1 %v1272_v3 }
  0x70   : > { %834 = vmatprep.subr.bf16.mxu1 %v1276_v4 }
  0x72   : > { %794 = vmatpush2.bf16.msra.mxu0 %v1275_v5 }
  0x73   : > { %795 = vmatprep.subr.bf16.mxu0 %v1279_v6  ;;  %835 = vmatpush2.bf16.msra.mxu1 %v1278_v7 }
  0x74   : > { %836 = vmatprep.subr.bf16.mxu1 %v1282_v8 }
  0x76   : > { %796 = vmatpush2.bf16.msra.mxu0 %v1281_v9 }
  0x77   : > { %855 = vmatprep.subr.bf16.mxu0 %v1288_v11  ;;  %837 = vmatpush2.bf16.msra.mxu1 %v1285_v12 }
  0x79   : > { %798 = vmatmul.mubr.bf16.vlgmr.msra.gmra.mxu0 %v380_v10 }
  0x7a   : > { %856 = vmatpush1.bf16.msra.mxu0 %v1286_v13  ;;  %879 = vmatprep.mubr.bf16.mxu0 %v1416_v17 }
  0x7b   : > { %839 = vmatmul.mubr.bf16.vlgmr.msra.gmra.mxu1 %v395_v14  ;;  %857 = vmatprep.subr.bf16.mxu0 %v1291_v15 }
  0x7e   : > { %858 = vmatpush1.bf16.msra.mxu0 %v1289_v16 }
  0x7f   : > { %859 = vmatprep.subr.bf16.mxu0 %v1294_v18 }
  0x82   : > { %860 = vmatpush1.bf16.msra.mxu0 %v1292_v20 }
  0x83   : > { %861 = vmatprep.subr.bf16.mxu0 %v1297_v21 }
  0x86   : > { %862 = vmatpush1.bf16.msra.mxu0 %v1295_v23 }
  0x89   : > { %1116 = vmatmul.mubr.msk.bf16.vlgmr.msra.gmra.mxu0 %vm761_vm0, %v387_v24 }
 0x139   : > { %v799_v25 = vpop.f32.mrf.mxu0 }
 0x13a   : > { %v800_v38 = vadd.f32 %v799_v25, %v350_v36 }
 0x13b   : > { %v801_v26 = vpop.f32.mrf.mxu0  ;;  %v840_v27 = vpop.f32.mrf.mxu1 }
 0x13c   : > { %v802_v39 = vadd.f32 %v801_v26, %v354_v37  ;;  %v841_v41 = vadd.f32 %v840_v27, %v800_v38 }
 0x13d   : > { %v803_v28 = vpop.f32.mrf.mxu0  ;;  %v842_v29 = vpop.f32.mrf.mxu1 }
 0x13e   : > { %v843_v43 = vadd.f32 %v842_v29, %v802_v39 }
 0x13f   : > { %v804_v33 = vpop.f32.mrf.mxu0  ;;  %v844_v34 = vpop.f32.mrf.mxu1 }
 0x141   : > { %v845_v35 = vpop.f32.mrf.mxu1 }
 0x149   : > { %v881_v40 = vpop.f32.mrf.mxu0 }
 0x14a   : > { %v882_v45 = vadd.f32 %v881_v40, %v841_v41 }
 0x14b   : > { %v883_v44 = vpop.f32.mrf.mxu0 }
 0x14c   : > { %v884_v46 = vadd.f32 %v883_v44, %v843_v43 }
 0x14d   : > { %v885_v42 = vpop.f32.mrf.mxu0 }
 0x14e   : > { %v890_v47 = vcombine.low %v882_v45, %v884_v46 }
 0x14f   : > { %v886_v48 = vpop.f32.mrf.mxu0 }
 0x150   : > { %1117 = vst.sshfl [vmem:[%s269_s4] sm:$0x33 pattern:$0x76325410] %v890_v47 }
 0x151 PF: > { %s19_s17 = sadd.s32 1, %s1408_s17   ;;  %s1660_s12 = smov %s1392_s13 }
 0x152   : > { %p16_p9 = scmp.ge.s32.totalorder %s19_s17, 10   ;;  %s1661_s13 = smov %s1396_s14 }
 0x153   : > { %s1662_s14 = smov %s1482_s23  ;;  %s1663_s15 = smov %s1404_s16 }
 0x154   : > { %s1664_s16 = smov %s1666_s19  ;;  %18 = sbr.rel (!%p16_p9) target bundleno = 6 (0x6), region = 88 }
 0x159   :  { %930 = vsyncpa [#allocation3], 1 }
 0x15a   :  { %932 = vsyncpa [#allocation3 + $0x1], 1 }
 0x15b   :  { %933 = vsyncpa [#allocation5], 1 }
 0x15c   :  { %935 = vsyncpa [#allocation5 + $0x1], 1 }

// kernel: _lambda_.9
= control target key start
LH: loop header
LB: loop body
LE: loop exit
PB: predicated region body
PF: predicated region fallthrough
CT: control target
= control target key end

     0   :  { %s2688_s12 = smov 0   ;;  %s2690_s13 = smov 0   ;;  %s3215_s0 = inlined_call_operand.vmem [shape: bf16[256,1152], index: 0, kind: input, shape index: {}]   ;;  %s3216_s1 = inlined_call_operand.vmem [shape: bf16[1152,32], index: 1, kind: input, shape index: {}]   ;;  %s3217_s2 = inlined_call_operand.vmem [shape: f32[256,1], index: 2, kind: input, shape index: {}]   ;;  %s3218_s3 = inlined_call_operand.vmem [shape: f32[256,32], index: 3, kind: output, shape index: {}]  }
   0x1   :  { %s2692_s14 = smov 0  }
   0x2 LB: > { %s25_s15 = sadd.s32 1, %s2661_s13  ;;  %p1966_p0 = scmp.ge.s32.totalorder %s2665_s14, 1  ;;  %s2665_s14 = sphi %s2692_s14, %s13_s14   ;;  %s2661_s13 = sphi %s2690_s13, %s3260_s13   ;;  %s2657_s12 = sphi %s2688_s12, %s3259_s12  }
   0x3   : > { %p27_p1 = scmp.ge.s32.totalorder %s25_s15, 2  ;;  %p173_p2 = scmp.lt.s32.totalorder %s2665_s14, 3 }
   0x5   : > { %s3262_s15 = smov (%p27_p1, %s25_s15), 0  ;;  %p174_p3 = pnand %p1966_p0, %p173_p2 }
   0x7   : > { %177 = sbr.rel (%p174_p3) target bundleno = 385 (0x181), region = 32 }
   0xc   : > { %v2467_v0 = vld [vmem:[%s3216_s1 + $0x78] sm:$0xff]   ;;  %v2667_v4 = vmov 0   ;;  %v2471_v5 = vld [vmem:[%s3216_s1 + $0x70] sm:$0xff]   ;;  %v2475_v9 = vld [vmem:[%s3216_s1 + $0x68] sm:$0xff]   ;;  %s1967_s23 = sshll.u32 %s2657_s12, 4  ;;  %vm1842_vm0 = vcmask 261120  }
   0xd   : > { %v2468_v1 = vld [vmem:[%s3216_s1 + $0xf8] sm:$0xff]   ;;  %2119 = vmatprep.subr.bf16.mxu0 %v2467_v0  ;;  %2465 = vset.pattern.permute.xlu0 %v2667_v4  ;;  %v2472_v6 = vld [vmem:[%s3216_s1 + $0xf0] sm:$0xff]   ;;  %v2476_v10 = vld [vmem:[%s3216_s1 + $0xe8] sm:$0xff]   ;;  %p211_p4 = scmp.lt.s32.totalorder %s1967_s23, 31 }
   0xe   : > { %v2469_v2 = vld [vmem:[%s3216_s1 + $0x38] sm:$0xff]   ;;  %2183 = vmatprep.subr.bf16.mxu1 %v2468_v1  ;;  %2466 = vset.pattern.permute.xlu1 %v2667_v4  ;;  %v2473_v7 = vld [vmem:[%s3216_s1 + $0x30] sm:$0xff]   ;;  %v2477_v11 = vld [vmem:[%s3216_s1 + $0x28] sm:$0xff]  }
   0xf   : > { %v2470_v3 = vld [vmem:[%s3216_s1 + $0xb8] sm:$0xff]   ;;  %2120 = vmatpush3.bf16.msra.mxu0 %v2469_v2  ;;  %v2474_v8 = vld [vmem:[%s3216_s1 + $0xb0] sm:$0xff]   ;;  %v2478_v12 = vld [vmem:[%s3216_s1 + $0xa8] sm:$0xff]   ;;  %s3264_s23 = smov (!%p211_p4, %s1967_s23), 31 }
  0x10   : > { %2184 = vmatpush3.bf16.msra.mxu1 %v2470_v3  ;;  %2121 = vmatprep.subr.bf16.mxu0 %v2471_v5  ;;  %v2479_v13 = vld [vmem:[%s3216_s1 + $0x60] sm:$0xff]   ;;  %v2483_v17 = vld [vmem:[%s3216_s1 + $0x58] sm:$0xff]   ;;  %v2487_v21 = vld [vmem:[%s3216_s1 + $0x50] sm:$0xff]   ;;  %s2439_s22 = smul.u32 36, %s3264_s23  ;;  %s1970_s9 = sshll.u32 %s3264_s23, 3 }
  0x11   : > { %2185 = vmatprep.subr.bf16.mxu1 %v2472_v6  ;;  %v2480_v14 = vld [vmem:[%s3216_s1 + $0xe0] sm:$0xff]   ;;  %v2484_v18 = vld [vmem:[%s3216_s1 + $0xd8] sm:$0xff]   ;;  %v2488_v22 = vld [vmem:[%s3216_s1 + $0xd0] sm:$0xff]   ;;  %s2951_s18 = scalar_lea.vmem %s3217_s2, %s1970_s9  ;;  %s3140_s8 = scalar_lea.vmem %s3218_s3, %s1970_s9 }
  0x12   : > { %v2481_v15 = vld [vmem:[%s3216_s1 + $0x20] sm:$0xff]   ;;  %v2485_v19 = vld [vmem:[%s3216_s1 + $0x18] sm:$0xff]   ;;  %v2489_v23 = vld [vmem:[%s3216_s1 + $0x10] sm:$0xff]   ;;  %s2805_s6 = scalar_lea.vmem %s3215_s0, %s2439_s22 }
  0x13   : > { %2122 = vmatpush3.bf16.msra.mxu0 %v2473_v7  ;;  %v2482_v16 = vld [vmem:[%s3216_s1 + $0xa0] sm:$0xff]   ;;  %v2486_v20 = vld [vmem:[%s3216_s1 + $0x98] sm:$0xff]   ;;  %v2490_v24 = vld [vmem:[%s3216_s1 + $0x90] sm:$0xff]  }
  0x14   : > { %2186 = vmatpush3.bf16.msra.mxu1 %v2474_v8  ;;  %2123 = vmatprep.subr.bf16.mxu0 %v2475_v9  ;;  %v2491_v25 = vld [vmem:[%s3216_s1 + $0x48] sm:$0xff]   ;;  %v2495_v29 = vld [vmem:[%s3216_s1 + $0x40] sm:$0xff]   ;;  %v2505_v37 = vld [vmem:[%s3216_s1 + $0x178] sm:$0xff]  }
  0x15   : > { %2187 = vmatprep.subr.bf16.mxu1 %v2476_v10  ;;  %v2492_v26 = vld [vmem:[%s3216_s1 + $0xc8] sm:$0xff]   ;;  %v2496_v30 = vld [vmem:[%s3216_s1 + $0xc0] sm:$0xff]   ;;  %v2506_v38 = vld [vmem:[%s3216_s1 + $0x1f8] sm:$0xff]  }
  0x16   : > { %v2493_v27 = vld [vmem:[%s3216_s1 + $0x8] sm:$0xff]   ;;  %v2497_v31 = vld [vmem:[%s3216_s1] sm:$0xff]   ;;  %v2507_v39 = vld [vmem:[%s3216_s1 + $0x138] sm:$0xff]  }
  0x17   : > { %2124 = vmatpush3.bf16.msra.mxu0 %v2477_v11  ;;  %v2494_v28 = vld [vmem:[%s3216_s1 + $0x88] sm:$0xff]   ;;  %v2498_v32 = vld [vmem:[%s3216_s1 + $0x80] sm:$0xff]   ;;  %v2508_v40 = vld [vmem:[%s3216_s1 + $0x1b8] sm:$0xff]  }
  0x18   : > { %2188 = vmatpush3.bf16.msra.mxu1 %v2478_v12  ;;  %2125 = vmatprep.subr.bf16.mxu0 %v2479_v13  ;;  %v2499_v33 = vld [vmem:[%s2805_s6] ss:$36 sps:$4 sm:$0xff]   ;;  %v2502_v35 = vld [vmem:[%s2805_s6 + $0x8] ss:$36 sps:$4 sm:$0xff]   ;;  %v2511_v42 = vld [vmem:[%s2805_s6 + $0x54] ss:$36 sps:$4 sm:$0xff]  }
  0x19   : > { %2189 = vmatprep.subr.bf16.mxu1 %v2480_v14  ;;  %v2501_v34 = vld [vmem:[%s2805_s6 + $0x4] ss:$36 sps:$4 sm:$0xff]   ;;  %v2504_v36 = vld [vmem:[%s2805_s6 + $0xc] ss:$36 sps:$4 sm:$0xff]   ;;  %v2519_v49 = vld [vmem:[%s2805_s6 + $0x94] ss:$36 sps:$4 sm:$0xff]  }
  0x1a   : > { %1389 = vmatprep.mubr.bf16.mxu0 %v2501_v34  ;;  %1486 = vmatprep.mubr.bf16.mxu1 %v2504_v36  ;;  %v2509_v41 = vld [vmem:[%s2805_s6 + $0x4c] ss:$36 sps:$4 sm:$0xff]   ;;  %v2521_v50 = vld [vmem:[%s2805_s6 + $0x9c] ss:$36 sps:$4 sm:$0xff]   ;;  %v2531_v58 = vld [vmem:[%s2805_s6 + $0xe4] ss:$36 sps:$4 sm:$0xff]  }
  0x1b   : > { %2126 = vmatpush3.bf16.msra.mxu0 %v2481_v15  ;;  %v2513_v43 = vld [vmem:[%s2805_s6 + $0x48] ss:$36 sps:$4 sm:$0xff]   ;;  %v2514_v44 = vld [vmem:[%s2805_s6 + $0x50] ss:$36 sps:$4 sm:$0xff]   ;;  %v2524_v52 = vld [vmem:[%s2805_s6 + $0x98] ss:$36 sps:$4 sm:$0xff]  }
  0x1c   : > { %2190 = vmatpush3.bf16.msra.mxu1 %v2482_v16  ;;  %2127 = vmatprep.subr.bf16.mxu0 %v2483_v17  ;;  %v2515_v45 = vld [vmem:[%s3216_s1 + $0x170] sm:$0xff]   ;;  %v2525_v53 = vld [vmem:[%s3216_s1 + $0x168] sm:$0xff]   ;;  %v2529_v57 = vld [vmem:[%s2805_s6 + $0xdc] ss:$36 sps:$4 sm:$0xff]  }
  0x1d   : > { %2191 = vmatprep.subr.bf16.mxu1 %v2484_v18  ;;  %v2516_v46 = vld [vmem:[%s3216_s1 + $0x1f0] sm:$0xff]   ;;  %v2526_v54 = vld [vmem:[%s3216_s1 + $0x1e8] sm:$0xff]   ;;  %v2533_v59 = vld [vmem:[%s2805_s6 + $0xd8] ss:$36 sps:$4 sm:$0xff]  }
  0x1e   : > { %v2517_v47 = vld [vmem:[%s3216_s1 + $0x130] sm:$0xff]   ;;  %v2527_v55 = vld [vmem:[%s3216_s1 + $0x128] sm:$0xff]   ;;  %v2534_v60 = vld [vmem:[%s2805_s6 + $0xe0] ss:$36 sps:$4 sm:$0xff]  }
  0x1f   : > { %2128 = vmatpush3.bf16.msra.mxu0 %v2485_v19  ;;  %v2518_v48 = vld [vmem:[%s3216_s1 + $0x1b0] sm:$0xff]   ;;  %v2528_v56 = vld [vmem:[%s3216_s1 + $0x1a8] sm:$0xff]   ;;  %v2535_v61 = vld [vmem:[%s3216_s1 + $0x160] sm:$0xff]  }
  0x20   : > { %2192 = vmatpush3.bf16.msra.mxu1 %v2486_v20  ;;  %2129 = vmatprep.subr.bf16.mxu0 %v2487_v21  ;;  %v2523_v51 = vld [vmem:[%s2805_s6 + $0x90] ss:$36 sps:$4 sm:$0xff]   ;;  %v2536_v62 = vld [vmem:[%s3216_s1 + $0x1e0] sm:$0xff]   ;;  %v2545_v4 = vld [vmem:[%s3216_s1 + $0x158] sm:$0xff]  }
  0x21   : > { %2193 = vmatprep.subr.bf16.mxu1 %v2488_v22  ;;  %v2537_v63 = vld [vmem:[%s3216_s1 + $0x120] sm:$0xff]   ;;  %v2541_v2 = vld [vmem:[%s2805_s6 + $0x12c] ss:$36 sps:$4 sm:$0xff]   ;;  %v2546_v6 = vld [vmem:[%s3216_s1 + $0x1d8] sm:$0xff]  }
  0x22   : > { %v2538_v0 = vld [vmem:[%s3216_s1 + $0x1a0] sm:$0xff]   ;;  %v2544_v5 = vld [vmem:[%s2805_s6 + $0x128] ss:$36 sps:$4 sm:$0xff]   ;;  %v2547_v7 = vld [vmem:[%s3216_s1 + $0x118] sm:$0xff]  }
  0x23   : > { %2130 = vmatpush3.bf16.msra.mxu0 %v2489_v23  ;;  %v2539_v1 = vld [vmem:[%s2805_s6 + $0x124] ss:$36 sps:$4 sm:$0xff]   ;;  %v2548_v8 = vld [vmem:[%s3216_s1 + $0x198] sm:$0xff]   ;;  %v2549_v9 = vld [vmem:[%s2805_s6 + $0x16c] ss:$36 sps:$4 sm:$0xff]  }
  0x24   : > { %2194 = vmatpush3.bf16.msra.mxu1 %v2490_v24  ;;  %2131 = vmatprep.subr.bf16.mxu0 %v2491_v25  ;;  %v2543_v3 = vld [vmem:[%s2805_s6 + $0x120] ss:$36 sps:$4 sm:$0xff]   ;;  %v2551_v10 = vld [vmem:[%s2805_s6 + $0x174] ss:$36 sps:$4 sm:$0xff]   ;;  %v2553_v13 = vld [vmem:[%s2805_s6 + $0x168] ss:$36 sps:$4 sm:$0xff]  }
  0x25   : > { %2195 = vmatprep.subr.bf16.mxu1 %v2492_v26  ;;  %v2555_v11 = vld [vmem:[%s3216_s1 + $0x150] sm:$0xff]   ;;  %v2561_v18 = vld [vmem:[%s2805_s6 + $0x1bc] ss:$36 sps:$4 sm:$0xff]   ;;  %v2565_v19 = vld [vmem:[%s3216_s1 + $0x148] sm:$0xff]  }
  0x26   : > { %v2556_v12 = vld [vmem:[%s3216_s1 + $0x1d0] sm:$0xff]   ;;  %v2566_v20 = vld [vmem:[%s3216_s1 + $0x1c8] sm:$0xff]   ;;  %v2564_v24 = vld [vmem:[%s2805_s6 + $0x1b8] ss:$36 sps:$4 sm:$0xff]  }
  0x27   : > { %2132 = vmatpush3.bf16.msra.mxu0 %v2493_v27  ;;  %v2557_v14 = vld [vmem:[%s3216_s1 + $0x110] sm:$0xff]   ;;  %v2567_v21 = vld [vmem:[%s3216_s1 + $0x108] sm:$0xff]   ;;  %v2569_v25 = vld [vmem:[%s2805_s6 + $0x1fc] ss:$36 sps:$4 sm:$0xff]  }
  0x28   : > { %2196 = vmatpush3.bf16.msra.mxu1 %v2494_v28  ;;  %2133 = vmatprep.subr.bf16.mxu0 %v2495_v29  ;;  %v2558_v15 = vld [vmem:[%s3216_s1 + $0x190] sm:$0xff]   ;;  %v2568_v22 = vld [vmem:[%s3216_s1 + $0x188] sm:$0xff]   ;;  %v2575_v27 = vld [vmem:[%s3216_s1 + $0x140] sm:$0xff]  }
  0x29   : > { %2197 = vmatprep.subr.bf16.mxu1 %v2496_v30  ;;  %v2554_v16 = vld [vmem:[%s2805_s6 + $0x170] ss:$36 sps:$4 sm:$0xff]   ;;  %v2571_v26 = vld [vmem:[%s2805_s6 + $0x204] ss:$36 sps:$4 sm:$0xff]  }
  0x2a   : > { %v2559_v17 = vld [vmem:[%s2805_s6 + $0x1b4] ss:$36 sps:$4 sm:$0xff]   ;;  %v2576_v28 = vld [vmem:[%s3216_s1 + $0x1c0] sm:$0xff]  }
  0x2b   : > { %2134 = vmatpush3.bf16.msra.mxu0 %v2497_v31  ;;  %v2563_v23 = vld [vmem:[%s2805_s6 + $0x1b0] ss:$36 sps:$4 sm:$0xff]   ;;  %v2577_v29 = vld [vmem:[%s3216_s1 + $0x100] sm:$0xff]   ;;  %v2573_v31 = vld [vmem:[%s2805_s6 + $0x1f8] ss:$36 sps:$4 sm:$0xff]  }
  0x2c   : > { %2198 = vmatpush3.bf16.msra.mxu1 %v2498_v32  ;;  %2247 = vmatprep.subr.bf16.mxu0 %v2505_v37  ;;  %v2578_v30 = vld [vmem:[%s3216_s1 + $0x180] sm:$0xff]   ;;  %v2581_v34 = vld [vmem:[%s2805_s6 + $0x14] ss:$36 sps:$4 sm:$0xff]   ;;  %v462_v37 = vld [vmem:[%s2951_s18 + $0x8] sm:$0xff] }
  0x2d   : > { %2311 = vmatprep.subr.bf16.mxu1 %v2506_v38  ;;  %v2574_v32 = vld [vmem:[%s2805_s6 + $0x200] ss:$36 sps:$4 sm:$0xff]   ;;  %v2579_v38 = vld [vmem:[%s2805_s6 + $0x10] ss:$36 sps:$4 sm:$0xff]  }
  0x2e   : > { %1390 = vmatmul.mubr.bf16.vlgmr.msra.gmra.mxu0 %v2499_v33  ;;  %v2585_v33 = vld [vmem:[%s3216_s1 + $0x238] sm:$0xff]   ;;  %v461_v36 = vld [vmem:[%s2951_s18] sm:$0xff] }
  0x2f   : > { %1487 = vmatmul.mubr.bf16.vlgmr.msra.gmra.mxu1 %v2502_v35  ;;  %2248 = vmatpush3.bf16.msra.mxu0 %v2507_v39  ;;  %v2584_v35 = vld [vmem:[%s2805_s6 + $0x1c] ss:$36 sps:$4 sm:$0xff]  }
  0x30   : > { %2312 = vmatpush3.bf16.msra.mxu1 %v2508_v40  ;;  %1397 = vmatprep.mubr.bf16.mxu0 %v2509_v41  ;;  %v2582_v39 = vld [vmem:[%s2805_s6 + $0x18] ss:$36 sps:$4 sm:$0xff]   ;;  %v463_v40 = vld [vmem:[%s2951_s18 + $0x10] sm:$0xff] }
  0x31   : > { %1494 = vmatprep.mubr.bf16.mxu1 %v2511_v42  ;;  %2249 = vmatprep.subr.bf16.mxu0 %v2515_v45  ;;  %v2586_v41 = vld [vmem:[%s2805_s6 + $0x5c] ss:$36 sps:$4 sm:$0xff]   ;;  %v2588_v42 = vld [vmem:[%s2805_s6 + $0x64] ss:$36 sps:$4 sm:$0xff]  }
  0x32   : > { %2313 = vmatprep.subr.bf16.mxu1 %v2516_v46  ;;  %479 = vperm.xlu0 %2465, %v461_v36   ;;  %v464_v45 = vld [vmem:[%s2951_s18 + $0x18] sm:$0xff]  ;;  %v465_v46 = vld [vmem:[%s2951_s18 + $0x20] sm:$0xff] }
  0x33   : > { %2250 = vmatpush3.bf16.msra.mxu0 %v2517_v47  ;;  %489 = vperm.xlu1 %2466, %v463_v40   ;;  %v2590_v47 = vld [vmem:[%s2805_s6 + $0x58] ss:$36 sps:$4 sm:$0xff]  }
  0x34   : > { %2314 = vmatpush3.bf16.msra.mxu1 %v2518_v48  ;;  %2251 = vmatprep.subr.bf16.mxu0 %v2525_v53  ;;  %v2591_v48 = vld [vmem:[%s2805_s6 + $0x60] ss:$36 sps:$4 sm:$0xff]   ;;  %v467_v53 = vld [vmem:[%s2951_s18 + $0x30] sm:$0xff] }
  0x35   : > { %2315 = vmatprep.subr.bf16.mxu1 %v2526_v54  ;;  %v468_v54 = vld [vmem:[%s2951_s18 + $0x38] sm:$0xff] }
  0x36   : > { %1398 = vmatmul.mubr.bf16.gmra.mxu0 %v2513_v43  ;;  %484 = vperm.xlu0 %2465, %v462_v37   ;;  %v2592_v43 = vld [vmem:[%s3216_s1 + $0x230] sm:$0xff]  }
  0x37   : > { %1495 = vmatmul.mubr.bf16.gmra.mxu1 %v2514_v44  ;;  %1405 = vmatprep.mubr.bf16.mxu0 %v2519_v49  ;;  %v2599_v44 = vld [vmem:[%s3216_s1 + $0x228] sm:$0xff]  }
  0x38   : > { %1502 = vmatprep.mubr.bf16.mxu1 %v2521_v50  ;;  %2252 = vmatpush3.bf16.msra.mxu0 %v2527_v55  ;;  %v2593_v49 = vld [vmem:[%s2805_s6 + $0xa4] ss:$36 sps:$4 sm:$0xff]   ;;  %v2613_v55 = vld [vmem:[%s3216_s1 + $0x218] sm:$0xff]  }
  0x39   : > { %2316 = vmatpush3.bf16.msra.mxu1 %v2528_v56  ;;  %2253 = vmatprep.subr.bf16.mxu0 %v2535_v61  ;;  %v466_v50 = vld [vmem:[%s2951_s18 + $0x28] sm:$0xff]  ;;  %v2597_v56 = vld [vmem:[%s2805_s6 + $0xa0] ss:$36 sps:$4 sm:$0xff]  }
  0x3a   : > { %2317 = vmatprep.subr.bf16.mxu1 %v2536_v62  ;;  %494 = vperm.xlu1 %2466, %v464_v45   ;;  %v469_v61 = vld [vmem:[%s2951_s18 + $0x40] sm:$0xff]  ;;  %v2604_v62 = vld [vmem:[%s2805_s6 + $0xe8] ss:$36 sps:$4 sm:$0xff]  }
  0x3b   : > { %499 = vperm.xlu0 %2465, %v465_v46  }
  0x3c   : > { %2254 = vmatpush3.bf16.msra.mxu0 %v2537_v63  ;;  %v470_v63 = vld [vmem:[%s2951_s18 + $0x48] sm:$0xff] }
  0x3d   : > { %2318 = vmatpush3.bf16.msra.mxu1 %v2538_v0  ;;  %2255 = vmatprep.subr.bf16.mxu0 %v2545_v4  ;;  %v2627_v0 = vld [vmem:[%s3216_s1 + $0x208] sm:$0xff]   ;;  %v471_v4 = vld [vmem:[%s2951_s18 + $0x50] sm:$0xff] }
  0x3e   : > { %1406 = vmatmul.mubr.bf16.gmra.mxu0 %v2523_v51  ;;  %2319 = vmatprep.subr.bf16.mxu1 %v2546_v6  ;;  %v2595_v51 = vld [vmem:[%s2805_s6 + $0xac] ss:$36 sps:$4 sm:$0xff]   ;;  %v472_v6 = vld [vmem:[%s2951_s18 + $0x58] sm:$0xff] }
  0x3f   : > { %1503 = vmatmul.mubr.bf16.gmra.mxu1 %v2524_v52  ;;  %1413 = vmatprep.mubr.bf16.mxu0 %v2529_v57  ;;  %v2606_v52 = vld [vmem:[%s3216_s1 + $0x220] sm:$0xff]   ;;  %v2598_v57 = vld [vmem:[%s2805_s6 + $0xa8] ss:$36 sps:$4 sm:$0xff]  }
  0x40   : > { %1510 = vmatprep.mubr.bf16.mxu1 %v2531_v58  ;;  %2256 = vmatpush3.bf16.msra.mxu0 %v2547_v7  ;;  %v2600_v58 = vld [vmem:[%s2805_s6 + $0xec] ss:$36 sps:$4 sm:$0xff]   ;;  %v473_v7 = vld [vmem:[%s2951_s18 + $0x60] sm:$0xff] }
  0x41   : > { %2320 = vmatpush3.bf16.msra.mxu1 %v2548_v8  ;;  %2257 = vmatprep.subr.bf16.mxu0 %v2555_v11  ;;  %v2611_v8 = vld [vmem:[%s2805_s6 + $0x130] ss:$36 sps:$4 sm:$0xff]   ;;  %v474_v11 = vld [vmem:[%s2951_s18 + $0x68] sm:$0xff] }
  0x42   : > { %2321 = vmatprep.subr.bf16.mxu1 %v2556_v12  ;;  %504 = vperm.xlu1 %2466, %v466_v50   ;;  %v2616_v12 = vld [vmem:[%s2805_s6 + $0x184] ss:$36 sps:$4 sm:$0xff]  }
  0x43   : > { %509 = vperm.xlu0 %2465, %v467_v53  }
  0x44   : > { %2258 = vmatpush3.bf16.msra.mxu0 %v2557_v14  ;;  %v476_v14 = vld [vmem:[%s2951_s18 + $0x78] sm:$0xff] }
  0x45   : > { %2322 = vmatpush3.bf16.msra.mxu1 %v2558_v15  ;;  %2259 = vmatprep.subr.bf16.mxu0 %v2565_v19  ;;  %v2618_v15 = vld [vmem:[%s2805_s6 + $0x178] ss:$36 sps:$4 sm:$0xff]   ;;  %v2625_v19 = vld [vmem:[%s2805_s6 + $0x1c0] ss:$36 sps:$4 sm:$0xff]  }
  0x46   : > { %1414 = vmatmul.mubr.bf16.gmra.mxu0 %v2533_v59  ;;  %2323 = vmatprep.subr.bf16.mxu1 %v2566_v20  ;;  %v2602_v59 = vld [vmem:[%s2805_s6 + $0xf4] ss:$36 sps:$4 sm:$0xff]   ;;  %v2626_v20 = vld [vmem:[%s2805_s6 + $0x1c8] ss:$36 sps:$4 sm:$0xff]  }
  0x47   : > { %1511 = vmatmul.mubr.bf16.gmra.mxu1 %v2534_v60  ;;  %1421 = vmatprep.mubr.bf16.mxu0 %v2539_v1  ;;  %v2620_v60 = vld [vmem:[%s3216_s1 + $0x210] sm:$0xff]  }
  0x48   : > { %1518 = vmatprep.mubr.bf16.mxu1 %v2541_v2  ;;  %2260 = vmatpush3.bf16.msra.mxu0 %v2567_v21  ;;  %v2605_v1 = vld [vmem:[%s2805_s6 + $0xf0] ss:$36 sps:$4 sm:$0xff]  }
  0x49   : > { %2324 = vmatpush3.bf16.msra.mxu1 %v2568_v22  ;;  %2261 = vmatprep.subr.bf16.mxu0 %v2575_v27  ;;  %v2607_v2 = vld [vmem:[%s2805_s6 + $0x134] ss:$36 sps:$4 sm:$0xff]   ;;  %v2628_v21 = vld [vmem:[%s2805_s6 + $0x20c] ss:$36 sps:$4 sm:$0xff]  }
  0x4a   : > { %2325 = vmatprep.subr.bf16.mxu1 %v2576_v28  ;;  %514 = vperm.xlu1 %2466, %v468_v54   ;;  %v2630_v22 = vld [vmem:[%s2805_s6 + $0x214] ss:$36 sps:$4 sm:$0xff]   ;;  %v2637_v27 = vld [vmem:[%s2805_s6 + $0x68] ss:$36 sps:$4 sm:$0xff]  }
  0x4b   : > { %519 = vperm.xlu0 %2465, %v469_v61   ;;  %v2638_v28 = vld [vmem:[%s2805_s6 + $0x188] ss:$36 sps:$4 sm:$0xff]  }
  0x4c   : > { %2262 = vmatpush3.bf16.msra.mxu0 %v2577_v29  ;;  %v2639_v29 = vld [vmem:[%s2805_s6 + $0xb0] ss:$36 sps:$4 sm:$0xff]  }
  0x4d   : > { %2326 = vmatpush3.bf16.msra.mxu1 %v2578_v30  ;;  %2391 = vmatprep.subr.bf16.mxu0 %v2585_v33  ;;  %v2640_v30 = vld [vmem:[%s2805_s6 + $0x1d0] ss:$36 sps:$4 sm:$0xff]  }
  0x4e   : > { %1422 = vmatmul.mubr.bf16.gmra.mxu0 %v2543_v3  ;;  %2423 = vmatprep.subr.bf16.mxu1 %v2585_v33  ;;  %v2609_v3 = vld [vmem:[%s2805_s6 + $0x13c] ss:$36 sps:$4 sm:$0xff]  }
  0x4f   : > { %1519 = vmatmul.mubr.bf16.gmra.mxu1 %v2544_v5  ;;  %1429 = vmatprep.mubr.bf16.mxu0 %v2549_v9  ;;  %v2634_v5 = vld [vmem:[%s3216_s1 + $0x200] sm:$0xff]   ;;  %v2612_v9 = vld [vmem:[%s2805_s6 + $0x138] ss:$36 sps:$4 sm:$0xff]  }
  0x50   : > { %1526 = vmatprep.mubr.bf16.mxu1 %v2551_v10  ;;  %524 = vperm.xlu1 %2466, %v470_v63   ;;  %v2614_v10 = vld [vmem:[%s2805_s6 + $0x17c] ss:$36 sps:$4 sm:$0xff]  }
  0x51   : > { %529 = vperm.xlu0 %2465, %v471_v4  }
  0x54   : > { %534 = vperm.xlu1 %2466, %v472_v6  }
  0x55   : > { %539 = vperm.xlu0 %2465, %v473_v7  }
  0x56   : > { %1430 = vmatmul.mubr.bf16.gmra.mxu0 %v2553_v13  ;;  %v475_v13 = vld [vmem:[%s2951_s18 + $0x70] sm:$0xff] }
  0x57   : > { %1527 = vmatmul.mubr.bf16.gmra.mxu1 %v2554_v16  ;;  %1437 = vmatprep.mubr.bf16.mxu0 %v2559_v17  ;;  %v2619_v16 = vld [vmem:[%s2805_s6 + $0x180] ss:$36 sps:$4 sm:$0xff]  }
  0x58   : > { %1534 = vmatprep.mubr.bf16.mxu1 %v2561_v18  ;;  %544 = vperm.xlu1 %2466, %v474_v11   ;;  %v2621_v17 = vld [vmem:[%s2805_s6 + $0x1c4] ss:$36 sps:$4 sm:$0xff]   ;;  %v2623_v18 = vld [vmem:[%s2805_s6 + $0x1cc] ss:$36 sps:$4 sm:$0xff]  }
  0x59   : > { %549 = vperm.xlu0 %2465, %v475_v13  }
  0x5c   : > { %554 = vperm.xlu1 %2466, %v476_v14  }
  0x5e   : > { %1438 = vmatmul.mubr.bf16.gmra.mxu0 %v2563_v23  ;;  %v2632_v23 = vld [vmem:[%s2805_s6 + $0x208] ss:$36 sps:$4 sm:$0xff]  }
  0x5f   : > { %1535 = vmatmul.mubr.bf16.gmra.mxu1 %v2564_v24  ;;  %1445 = vmatprep.mubr.bf16.mxu0 %v2569_v25  ;;  %v2633_v24 = vld [vmem:[%s2805_s6 + $0x210] ss:$36 sps:$4 sm:$0xff]   ;;  %v2635_v25 = vld [vmem:[%s2805_s6 + $0x20] ss:$36 sps:$4 sm:$0xff]  }
  0x60   : > { %1542 = vmatprep.mubr.bf16.mxu1 %v2571_v26  ;;  %v2636_v26 = vld [vmem:[%s2805_s6 + $0x140] ss:$36 sps:$4 sm:$0xff]  }
  0x66   : > { %1446 = vmatmul.mubr.bf16.gmra.mxu0 %v2573_v31  ;;  %v2641_v31 = vld [vmem:[%s2805_s6 + $0xf8] ss:$36 sps:$4 sm:$0xff]  }
  0x67   : > { %1543 = vmatmul.mubr.bf16.gmra.mxu1 %v2574_v32  ;;  %1583 = vmatprep.mubr.bf16.mxu0 %v2581_v34  ;;  %v2642_v32 = vld [vmem:[%s2805_s6 + $0x218] ss:$36 sps:$4 sm:$0xff]  }
  0x68   : > { %1680 = vmatprep.mubr.bf16.mxu1 %v2584_v35 }
  0x6e   : > { %1584 = vmatmul.mubr.bf16.vlgmr.msra.gmra.mxu0 %v2579_v38 }
  0x6f   : > { %1681 = vmatmul.mubr.bf16.vlgmr.msra.gmra.mxu1 %v2582_v39  ;;  %2392 = vmatpush3.bf16.msra.mxu0 %v2585_v33 }
  0x70   : > { %2431 = vmatpush3.bf16.msra.mxu1 %v2585_v33  ;;  %1591 = vmatprep.mubr.bf16.mxu0 %v2586_v41 }
  0x71   : > { %1688 = vmatprep.mubr.bf16.mxu1 %v2588_v42  ;;  %2393 = vmatprep.subr.bf16.mxu0 %v2592_v43 }
  0x72   : > { %2424 = vmatprep.subr.bf16.mxu1 %v2592_v43 }
  0x73   : > { %2394 = vmatpush3.bf16.msra.mxu0 %v2592_v43 }
  0x74   : > { %2432 = vmatpush3.bf16.msra.mxu1 %v2592_v43  ;;  %2395 = vmatprep.subr.bf16.mxu0 %v2599_v44 }
  0x75   : > { %2425 = vmatprep.subr.bf16.mxu1 %v2599_v44 }
  0x76   : > { %1592 = vmatmul.mubr.bf16.gmra.mxu0 %v2590_v47 }
  0x77   : > { %1689 = vmatmul.mubr.bf16.gmra.mxu1 %v2591_v48  ;;  %1599 = vmatprep.mubr.bf16.mxu0 %v2593_v49 }
  0x78   : > { %1696 = vmatprep.mubr.bf16.mxu1 %v2595_v51  ;;  %2396 = vmatpush3.bf16.msra.mxu0 %v2599_v44 }
  0x79   : > { %2433 = vmatpush3.bf16.msra.mxu1 %v2599_v44  ;;  %2397 = vmatprep.subr.bf16.mxu0 %v2606_v52 }
  0x7a   : > { %2426 = vmatprep.subr.bf16.mxu1 %v2606_v52 }
  0x7c   : > { %2398 = vmatpush3.bf16.msra.mxu0 %v2606_v52 }
  0x7d   : > { %2434 = vmatpush3.bf16.msra.mxu1 %v2606_v52  ;;  %2399 = vmatprep.subr.bf16.mxu0 %v2613_v55 }
  0x7e   : > { %1600 = vmatmul.mubr.bf16.gmra.mxu0 %v2597_v56  ;;  %2427 = vmatprep.subr.bf16.mxu1 %v2613_v55 }
  0x7f   : > { %1697 = vmatmul.mubr.bf16.gmra.mxu1 %v2598_v57  ;;  %1607 = vmatprep.mubr.bf16.mxu0 %v2600_v58 }
  0x80   : > { %1704 = vmatprep.mubr.bf16.mxu1 %v2602_v59  ;;  %2400 = vmatpush3.bf16.msra.mxu0 %v2613_v55 }
  0x81   : > { %2435 = vmatpush3.bf16.msra.mxu1 %v2613_v55  ;;  %2401 = vmatprep.subr.bf16.mxu0 %v2620_v60 }
  0x82   : > { %2428 = vmatprep.subr.bf16.mxu1 %v2620_v60 }
  0x84   : > { %2402 = vmatpush3.bf16.msra.mxu0 %v2620_v60 }
  0x85   : > { %2436 = vmatpush3.bf16.msra.mxu1 %v2620_v60  ;;  %2403 = vmatprep.subr.bf16.mxu0 %v2627_v0 }
  0x86   : > { %1608 = vmatmul.mubr.bf16.gmra.mxu0 %v2604_v62  ;;  %2429 = vmatprep.subr.bf16.mxu1 %v2627_v0 }
  0x87   : > { %1705 = vmatmul.mubr.bf16.gmra.mxu1 %v2605_v1  ;;  %1615 = vmatprep.mubr.bf16.mxu0 %v2607_v2 }
  0x88   : > { %1712 = vmatprep.mubr.bf16.mxu1 %v2609_v3  ;;  %2404 = vmatpush3.bf16.msra.mxu0 %v2627_v0 }
  0x89   : > { %2437 = vmatpush3.bf16.msra.mxu1 %v2627_v0  ;;  %2405 = vmatprep.subr.bf16.mxu0 %v2634_v5 }
  0x8a   : > { %2430 = vmatprep.subr.bf16.mxu1 %v2634_v5 }
  0x8c   : > { %2406 = vmatpush3.bf16.msra.mxu0 %v2634_v5 }
  0x8d   : > { %2438 = vmatpush3.bf16.msra.mxu1 %v2634_v5 }
  0x8e   : > { %1616 = vmatmul.mubr.bf16.gmra.mxu0 %v2611_v8 }
  0x8f   : > { %1713 = vmatmul.mubr.bf16.gmra.mxu1 %v2612_v9  ;;  %1623 = vmatprep.mubr.bf16.mxu0 %v2614_v10 }
  0x90   : > { %1720 = vmatprep.mubr.bf16.mxu1 %v2616_v12 }
  0x96   : > { %1624 = vmatmul.mubr.bf16.gmra.mxu0 %v2618_v15 }
  0x97   : > { %1721 = vmatmul.mubr.bf16.gmra.mxu1 %v2619_v16  ;;  %1631 = vmatprep.mubr.bf16.mxu0 %v2621_v17 }
  0x98   : > { %1728 = vmatprep.mubr.bf16.mxu1 %v2623_v18 }
  0x9e   : > { %1632 = vmatmul.mubr.bf16.gmra.mxu0 %v2625_v19 }
  0x9f   : > { %1729 = vmatmul.mubr.bf16.gmra.mxu1 %v2626_v20  ;;  %1639 = vmatprep.mubr.bf16.mxu0 %v2628_v21 }
  0xa0   : > { %1736 = vmatprep.mubr.bf16.mxu1 %v2630_v22 }
  0xa6   : > { %1640 = vmatmul.mubr.bf16.gmra.mxu0 %v2632_v23 }
  0xa7   : > { %1737 = vmatmul.mubr.bf16.gmra.mxu1 %v2633_v24  ;;  %2407 = vmatprep.mubr.bf16.mxu0 %v2635_v25 }
  0xa8   : > { %2415 = vmatprep.mubr.bf16.mxu1 %v2636_v26 }
  0xad   : > { %v480_v34 = vpop.permute.xlu0 %479 }
  0xae   : > { %2408 = vmatmul.mubr.bf16.vlgmr.msra.gmra.mxu0 %v2637_v27  ;;  %v490_v50 = vpop.permute.xlu1 %489 }
  0xaf   : > { %2416 = vmatmul.mubr.bf16.vlgmr.msra.gmra.mxu1 %v2638_v28  ;;  %2411 = vmatprep.mubr.bf16.mxu0 %v2639_v29 }
  0xb0   : > { %2419 = vmatprep.mubr.bf16.mxu1 %v2640_v30 }
  0xb1   : > { %v485_v44 = vpop.permute.xlu0 %484 }
  0xb5   : > { %v495_v62 = vpop.permute.xlu1 %494 }
  0xb6   : > { %2412 = vmatmul.mubr.bf16.gmra.mxu0 %v2641_v31  ;;  %v500_v7 = vpop.permute.xlu0 %499 }
  0xb7   : > { %2420 = vmatmul.mubr.bf16.gmra.mxu1 %v2642_v32 }
  0xbd   : > { %v505_v16 = vpop.permute.xlu1 %504 }
  0xbe   : > { %v510_v25 = vpop.permute.xlu0 %509 }
  0xee   : > { %v2135_v33 = vpop.f32.mrf.mxu0 }
  0xef   : > { %v2199_v35 = vpop.f32.mrf.mxu1 }
  0xf0   : > { %v2136_v36 = vpop.f32.mrf.mxu0 }
  0xf1   : > { %v2137_v37 = vadd.f32 %v2136_v36, %v2135_v33  ;;  %v2200_v38 = vpop.f32.mrf.mxu1 }
  0xf2   : > { %v2201_v39 = vadd.f32 %v2200_v38, %v2199_v35  ;;  %v2138_v40 = vpop.f32.mrf.mxu0 }
  0xf3   : > { %v1392_v41 = vadd.f32 %v2137_v37, %v480_v34  ;;  %v2202_v42 = vpop.f32.mrf.mxu1  ;;  %v515_v34 = vpop.permute.xlu1 %514 }
  0xf4   : > { %v2139_v43 = vpop.f32.mrf.mxu0 }
  0xf5   : > { %v3029_v45 = vadd.f32 %v2201_v39, %v1392_v41  ;;  %v2140_v46 = vadd.f32 %v2139_v43, %v2138_v40  ;;  %v2203_v47 = vpop.f32.mrf.mxu1  ;;  %v520_v43 = vpop.permute.xlu0 %519 }
  0xf6   : > { %v2204_v48 = vadd.f32 %v2203_v47, %v2202_v42  ;;  %v2141_v49 = vpop.f32.mrf.mxu0 }
  0xf7   : > { %v1395_v51 = vadd.f32 %v2140_v46, %v485_v44  ;;  %v2205_v52 = vpop.f32.mrf.mxu1 }
  0xf8   : > { %v2142_v53 = vpop.f32.mrf.mxu0 }
  0xf9   : > { %v3031_v54 = vadd.f32 %v2204_v48, %v1395_v51  ;;  %v2143_v55 = vadd.f32 %v2142_v53, %v2141_v49  ;;  %v2206_v56 = vpop.f32.mrf.mxu1  ;;  %v525_v53 = vpop.permute.xlu1 %524 }
  0xfa   : > { %v2207_v57 = vadd.f32 %v2206_v56, %v2205_v52  ;;  %v2144_v58 = vpop.f32.mrf.mxu0 }
  0xfb   : > { %v1400_v59 = vadd.f32 %v2143_v55, %v490_v50  ;;  %v2208_v60 = vpop.f32.mrf.mxu1 }
  0xfc   : > { %v2145_v61 = vpop.f32.mrf.mxu0 }
  0xfd   : > { %v3033_v63 = vadd.f32 %v2207_v57, %v1400_v59  ;;  %v2146_v0 = vadd.f32 %v2145_v61, %v2144_v58  ;;  %v2209_v1 = vpop.f32.mrf.mxu1 }
  0xfe   : > { %v2210_v2 = vadd.f32 %v2209_v1, %v2208_v60  ;;  %v2147_v3 = vpop.f32.mrf.mxu0 }
  0xff   : > { %v1403_v4 = vadd.f32 %v2146_v0, %v495_v62  ;;  %v2211_v5 = vpop.f32.mrf.mxu1  ;;  %v530_v0 = vpop.permute.xlu0 %529 }
 0x100   : > { %v2148_v6 = vpop.f32.mrf.mxu0 }
 0x101   : > { %v3035_v8 = vadd.f32 %v2210_v2, %v1403_v4  ;;  %v2149_v9 = vadd.f32 %v2148_v6, %v2147_v3  ;;  %v2212_v10 = vpop.f32.mrf.mxu1 }
 0x102   : > { %v2213_v11 = vadd.f32 %v2212_v10, %v2211_v5  ;;  %v2150_v12 = vpop.f32.mrf.mxu0  ;;  %v535_v10 = vpop.permute.xlu1 %534 }
 0x103   : > { %v1408_v13 = vadd.f32 %v2149_v9, %v500_v7  ;;  %v2214_v14 = vpop.f32.mrf.mxu1 }
 0x104   : > { %v2151_v15 = vpop.f32.mrf.mxu0 }
 0x105   : > { %v3037_v17 = vadd.f32 %v2213_v11, %v1408_v13  ;;  %v2152_v18 = vadd.f32 %v2151_v15, %v2150_v12  ;;  %v2215_v19 = vpop.f32.mrf.mxu1 }
 0x106   : > { %v2216_v20 = vadd.f32 %v2215_v19, %v2214_v14  ;;  %v2153_v21 = vpop.f32.mrf.mxu0 }
 0x107   : > { %v1411_v22 = vadd.f32 %v2152_v18, %v505_v16  ;;  %v2217_v23 = vpop.f32.mrf.mxu1 }
 0x108   : > { %v2154_v24 = vpop.f32.mrf.mxu0 }
 0x109   : > { %v3039_v26 = vadd.f32 %v2216_v20, %v1411_v22  ;;  %v2155_v27 = vadd.f32 %v2154_v24, %v2153_v21  ;;  %v2218_v28 = vpop.f32.mrf.mxu1  ;;  %v540_v20 = vpop.permute.xlu0 %539 }
 0x10a   : > { %v2219_v29 = vadd.f32 %v2218_v28, %v2217_v23  ;;  %v2156_v30 = vpop.f32.mrf.mxu0 }
 0x10b   : > { %3219 = vst [vmem:[#allocation2_spill] sm:$0xff] %v3039_v26  ;;  %v1416_v31 = vadd.f32 %v2155_v27, %v510_v25  ;;  %v2220_v32 = vpop.f32.mrf.mxu1 }
 0x10c   : > { %v2157_v33 = vpop.f32.mrf.mxu0 }
 0x10d   : > { %v3041_v35 = vadd.f32 %v2219_v29, %v1416_v31  ;;  %v2158_v36 = vadd.f32 %v2157_v33, %v2156_v30  ;;  %v2221_v37 = vpop.f32.mrf.mxu1  ;;  %v545_v30 = vpop.permute.xlu1 %544 }
 0x10e   : > { %v2222_v38 = vadd.f32 %v2221_v37, %v2220_v32  ;;  %v2159_v39 = vpop.f32.mrf.mxu0 }
 0x10f   : > { %v1419_v40 = vadd.f32 %v2158_v36, %v515_v34  ;;  %v2223_v41 = vpop.f32.mrf.mxu1 }
 0x110   : > { %v2160_v42 = vpop.f32.mrf.mxu0 }
 0x111   : > { %v3043_v44 = vadd.f32 %v2222_v38, %v1419_v40  ;;  %v2161_v46 = vadd.f32 %v2160_v42, %v2159_v39  ;;  %v2224_v47 = vpop.f32.mrf.mxu1  ;;  %v550_v40 = vpop.permute.xlu0 %549 }
 0x112   : > { %v2225_v48 = vadd.f32 %v2224_v47, %v2223_v41  ;;  %v2162_v49 = vpop.f32.mrf.mxu0 }
 0x113   : > { %3220 = vst [vmem:[#allocation3_spill] sm:$0xff] %v3043_v44  ;;  %v1424_v50 = vadd.f32 %v2161_v46, %v520_v43  ;;  %v2226_v51 = vpop.f32.mrf.mxu1 }
 0x114   : > { %v2163_v52 = vpop.f32.mrf.mxu0 }
 0x115   : > { %v3045_v55 = vadd.f32 %v2225_v48, %v1424_v50  ;;  %v2164_v56 = vadd.f32 %v2163_v52, %v2162_v49  ;;  %v2227_v57 = vpop.f32.mrf.mxu1 }
 0x116   : > { %v2228_v58 = vadd.f32 %v2227_v57, %v2226_v51  ;;  %v2165_v59 = vpop.f32.mrf.mxu0  ;;  %v555_v51 = vpop.permute.xlu1 %554 }
 0x117   : > { %v1427_v60 = vadd.f32 %v2164_v56, %v525_v53  ;;  %v2229_v61 = vpop.f32.mrf.mxu1 }
 0x118   : > { %v2166_v62 = vpop.f32.mrf.mxu0 }
 0x119   : > { %v3047_v1 = vadd.f32 %v2228_v58, %v1427_v60  ;;  %v2167_v2 = vadd.f32 %v2166_v62, %v2165_v59  ;;  %v2230_v3 = vpop.f32.mrf.mxu1 }
 0x11a   : > { %v2231_v4 = vadd.f32 %v2230_v3, %v2229_v61  ;;  %v2168_v5 = vpop.f32.mrf.mxu0 }
 0x11b   : > { %v1432_v6 = vadd.f32 %v2167_v2, %v530_v0  ;;  %v2232_v7 = vpop.f32.mrf.mxu1 }
 0x11c   : > { %v2169_v9 = vpop.f32.mrf.mxu0 }
 0x11d   : > { %v3049_v11 = vadd.f32 %v2231_v4, %v1432_v6  ;;  %v2170_v12 = vadd.f32 %v2169_v9, %v2168_v5  ;;  %v2233_v13 = vpop.f32.mrf.mxu1 }
 0x11e   : > { %v2234_v14 = vadd.f32 %v2233_v13, %v2232_v7  ;;  %v2171_v15 = vpop.f32.mrf.mxu0 }
 0x11f   : > { %v1435_v16 = vadd.f32 %v2170_v12, %v535_v10  ;;  %v2235_v18 = vpop.f32.mrf.mxu1 }
 0x120   : > { %v2172_v19 = vpop.f32.mrf.mxu0 }
 0x121   : > { %v3051_v21 = vadd.f32 %v2234_v14, %v1435_v16  ;;  %v2173_v22 = vadd.f32 %v2172_v19, %v2171_v15  ;;  %v2236_v23 = vpop.f32.mrf.mxu1 }
 0x122   : > { %v2237_v24 = vadd.f32 %v2236_v23, %v2235_v18  ;;  %v2174_v25 = vpop.f32.mrf.mxu0 }
 0x123   : > { %v1440_v27 = vadd.f32 %v2173_v22, %v540_v20  ;;  %v2238_v28 = vpop.f32.mrf.mxu1 }
 0x124   : > { %v2175_v29 = vpop.f32.mrf.mxu0 }
 0x125   : > { %v3053_v31 = vadd.f32 %v2237_v24, %v1440_v27  ;;  %v2176_v32 = vadd.f32 %v2175_v29, %v2174_v25  ;;  %v2239_v33 = vpop.f32.mrf.mxu1 }
 0x126   : > { %v2240_v34 = vadd.f32 %v2239_v33, %v2238_v28  ;;  %v2177_v36 = vpop.f32.mrf.mxu0 }
 0x127   : > { %3221 = vst [vmem:[#allocation4_spill] sm:$0xff] %v3053_v31  ;;  %v1443_v37 = vadd.f32 %v2176_v32, %v545_v30  ;;  %v2241_v38 = vpop.f32.mrf.mxu1 }
 0x128   : > { %v2178_v39 = vpop.f32.mrf.mxu0 }
 0x129   : > { %v3055_v41 = vadd.f32 %v2240_v34, %v1443_v37  ;;  %v2179_v42 = vadd.f32 %v2178_v39, %v2177_v36  ;;  %v2242_v43 = vpop.f32.mrf.mxu1 }
 0x12a   : > { %v2243_v46 = vadd.f32 %v2242_v43, %v2241_v38  ;;  %v2180_v47 = vpop.f32.mrf.mxu0 }
 0x12b   : > { %3222 = vst [vmem:[#allocation5_spill] sm:$0xff] %v3055_v41  ;;  %v1448_v48 = vadd.f32 %v2179_v42, %v550_v40  ;;  %v2244_v49 = vpop.f32.mrf.mxu1 }
 0x12c   : > { %v2181_v50 = vpop.f32.mrf.mxu0 }
 0x12d   : > { %v3057_v52 = vadd.f32 %v2243_v46, %v1448_v48  ;;  %v2182_v53 = vadd.f32 %v2181_v50, %v2180_v47  ;;  %v2245_v56 = vpop.f32.mrf.mxu1 }
 0x12e   : > { %v2246_v57 = vadd.f32 %v2245_v56, %v2244_v49  ;;  %v2263_v58 = vpop.f32.mrf.mxu0 }
 0x12f   : > { %3223 = vst [vmem:[#allocation6_spill] sm:$0xff] %v3057_v52  ;;  %v1451_v59 = vadd.f32 %v2182_v53, %v555_v51  ;;  %v3059_v60 = vpop.f32.mrf.mxu1 }
 0x130   : > { %v2264_v61 = vpop.f32.mrf.mxu0 }
 0x131   : > { %v3061_v62 = vadd.f32 %v2246_v57, %v1451_v59  ;;  %v3063_v0 = vpop.f32.mrf.mxu1 }
 0x132   : > { %v2266_v2 = vpop.f32.mrf.mxu0 }
 0x133   : > { %3224 = vst [vmem:[#allocation7_spill] sm:$0xff] %v3061_v62  ;;  %v3065_v3 = vpop.f32.mrf.mxu1  ;;  %v2265_v62 = vadd.f32 %v2264_v61, %v2263_v58  ;;  %v2329_v61 = vadd.f32 %v3063_v0, %v3059_v60 }
 0x134   : > { %v2267_v4 = vpop.f32.mrf.mxu0 }
 0x135   : > { %v3067_v5 = vpop.f32.mrf.mxu1 }
 0x136   : > { %v2269_v6 = vpop.f32.mrf.mxu0 }
 0x137   : > { %v3069_v7 = vpop.f32.mrf.mxu1 }
 0x138   : > { %v2270_v9 = vpop.f32.mrf.mxu0 }
 0x139   : > { %v3071_v10 = vpop.f32.mrf.mxu1 }
 0x13a   : > { %v2272_v12 = vpop.f32.mrf.mxu0 }
 0x13b   : > { %v3073_v13 = vpop.f32.mrf.mxu1 }
 0x13c   : > { %v2273_v14 = vpop.f32.mrf.mxu0 }
 0x13d   : > { %v3075_v15 = vpop.f32.mrf.mxu1 }
 0x13e   : > { %v2275_v16 = vpop.f32.mrf.mxu0 }
 0x13f   : > { %v3077_v18 = vpop.f32.mrf.mxu1 }
 0x140   : > { %3225 = vst [vmem:[#allocation8_spill] sm:$0xff] %v3077_v18  ;;  %v2276_v19 = vpop.f32.mrf.mxu0  ;;  %v2271_v18 = vadd.f32 %v2270_v9, %v2269_v6 }
 0x141   : > { %v3079_v20 = vpop.f32.mrf.mxu1 }
 0x142   : > { %3226 = vst [vmem:[#allocation9_spill] sm:$0xff] %v3079_v20  ;;  %v3081_v22 = vpop.f32.mrf.mxu0  ;;  %v2268_v20 = vadd.f32 %v2267_v4, %v2266_v2  ;;  %v2332_v2 = vadd.f32 %v3067_v5, %v3065_v3 }
 0x143   : > { %3227 = vst [vmem:[#allocation10_spill] sm:$0xff] %v3081_v22  ;;  %v3083_v23 = vpop.f32.mrf.mxu1 }
 0x144   : > { %3228 = vst [vmem:[#allocation11_spill] sm:$0xff] %v3083_v23  ;;  %v3085_v24 = vpop.f32.mrf.mxu0 }
 0x145   : > { %3229 = vst [vmem:[#allocation12_spill] sm:$0xff] %v3085_v24  ;;  %v3087_v25 = vpop.f32.mrf.mxu1  ;;  %v2274_v24 = vadd.f32 %v2273_v14, %v2272_v12 }
 0x146   : > { %3230 = vst [vmem:[#allocation13_spill] sm:$0xff] %v3087_v25  ;;  %v2281_v27 = vpop.f32.mrf.mxu0 }
 0x147   : > { %v3089_v28 = vpop.f32.mrf.mxu1 }
 0x148   : > { %3231 = vst [vmem:[#allocation14_spill] sm:$0xff] %v3089_v28  ;;  %v2282_v29 = vpop.f32.mrf.mxu0 }
 0x149   : > { %v3091_v30 = vpop.f32.mrf.mxu1  ;;  %v2283_v5 = vadd.f32 %v2282_v29, %v2281_v27 }
 0x14a   : > { %3232 = vst [vmem:[#allocation15_spill] sm:$0xff] %v3091_v30  ;;  %v3093_v32 = vpop.f32.mrf.mxu0 }
 0x14b   : > { %v3095_v33 = vpop.f32.mrf.mxu1 }
 0x14c   : > { %3233 = vst [vmem:[#allocation16_spill] sm:$0xff] %v3095_v33  ;;  %v3097_v34 = vpop.f32.mrf.mxu0 }
 0x14d   : > { %v3099_v36 = vpop.f32.mrf.mxu1 }
 0x14e   : > { %3234 = vst [vmem:[#allocation17_spill] sm:$0xff] %v3099_v36  ;;  %v2287_v37 = vpop.f32.mrf.mxu0 }
 0x14f   : > { %v2351_v38 = vpop.f32.mrf.mxu1 }
 0x150   : > { %v2288_v39 = vpop.f32.mrf.mxu0 }
 0x151   : > { %v2352_v40 = vpop.f32.mrf.mxu1  ;;  %v2289_v52 = vadd.f32 %v2288_v39, %v2287_v37  ;;  %v3239_v37 = vld [vmem:[#allocation6_spill] sm:$0xff] }
 0x152   : > { %v2290_v42 = vpop.f32.mrf.mxu0 }
 0x153   : > { %v3101_v43 = vpop.f32.mrf.mxu1  ;;  %v1618_v14 = vadd.f32 %v2289_v52, %v3045_v55 }
 0x154   : > { %v2291_v46 = vpop.f32.mrf.mxu0 }
 0x155   : > { %v3103_v47 = vpop.f32.mrf.mxu1  ;;  %v2292_v12 = vadd.f32 %v2291_v46, %v2290_v42  ;;  %v3241_v42 = vld [vmem:[#allocation12_spill] sm:$0xff]  ;;  %v3243_v46 = vld [vmem:[#allocation15_spill] sm:$0xff] }
 0x156   : > { %v2293_v48 = vpop.f32.mrf.mxu0 }
 0x157   : > { %v2357_v49 = vpop.f32.mrf.mxu1 }
 0x158   : > { %v2294_v50 = vpop.f32.mrf.mxu0 }
 0x159   : > { %v2358_v51 = vpop.f32.mrf.mxu1  ;;  %v2295_v30 = vadd.f32 %v2294_v50, %v2293_v48  ;;  %v3244_v50 = vld [vmem:[#allocation4_spill] sm:$0xff] }
 0x15a   : > { %v2296_v53 = vpop.f32.mrf.mxu0  ;;  %v2359_v60 = vadd.f32 %v2358_v51, %v2357_v49 }
 0x15b   : > { %v2360_v56 = vpop.f32.mrf.mxu1  ;;  %v1626_v4 = vadd.f32 %v2295_v30, %v3049_v11  ;;  %v2338_v11 = vadd.f32 %v3075_v15, %v3073_v13  ;;  %v1621_v13 = vadd.f32 %v2292_v12, %v3047_v1 }
 0x15c   : > { %v2297_v57 = vpop.f32.mrf.mxu0 }
 0x15d   : > { %v2361_v59 = vpop.f32.mrf.mxu1  ;;  %v2298_v6 = vadd.f32 %v2297_v57, %v2296_v53 }
 0x15e   : > { %v2299_v25 = vpop.f32.mrf.mxu0 }
 0x15f   : > { %v3105_v23 = vpop.f32.mrf.mxu1  ;;  %v1629_v55 = vadd.f32 %v2298_v6, %v3051_v21  ;;  %v1610_v21 = vadd.f32 %v2283_v5, %v3041_v35  ;;  %v3252_v5 = vld [vmem:[#allocation2_spill] sm:$0xff] }
 0x160   : > { %3235 = vst [vmem:[#allocation18_spill] sm:$0xff] %v3105_v23  ;;  %v2300_v41 = vpop.f32.mrf.mxu0  ;;  %v1586_v23 = vadd.f32 %v2265_v62, %v3029_v45  ;;  %v2335_v45 = vadd.f32 %v3071_v10, %v3069_v7  ;;  %v1597_v62 = vadd.f32 %v2274_v24, %v3035_v8  ;;  %v2353_v8 = vadd.f32 %v2352_v40, %v2351_v38  ;;  %v3240_v40 = vld [vmem:[#allocation10_spill] sm:$0xff] }
 0x161   : > { %v3107_v36 = vpop.f32.mrf.mxu1  ;;  %v1723_v10 = vadd.f32 %v2359_v60, %v1626_v4  ;;  %v2301_v24 = vadd.f32 %v2300_v41, %v2299_v25  ;;  %v3247_v4 = vld [vmem:[#allocation9_spill] sm:$0xff] }
 0x162   : > { %3236 = vst [vmem:[#allocation19_spill] sm:$0xff] %v3107_v36  ;;  %v3109_v33 = vpop.f32.mrf.mxu0  ;;  %v1683_v3 = vadd.f32 %v2329_v61, %v1586_v23  ;;  %v2362_v23 = vadd.f32 %v2361_v59, %v2360_v56 }
 0x163   : > { %3237 = vst [vmem:[#allocation20_spill] sm:$0xff] %v3109_v33  ;;  %v3111_v26 = vpop.f32.mrf.mxu1  ;;  %v1589_v33 = vadd.f32 %v2268_v20, %v3031_v54  ;;  %v2277_v54 = vadd.f32 %v2276_v19, %v2275_v16  ;;  %v1694_v19 = vadd.f32 %v2338_v11, %v1597_v62  ;;  %v1634_v51 = vadd.f32 %v2301_v24, %v3244_v50 }
 0x164   : > { %3238 = vst [vmem:[#allocation21_spill] sm:$0xff] %v3111_v26  ;;  %v3113_v44 = vpop.f32.mrf.mxu0  ;;  %v1594_v26 = vadd.f32 %v2271_v18, %v3033_v63  ;;  %v1726_v35 = vadd.f32 %v2362_v23, %v1629_v55  ;;  %v3254_v55 = vld [vmem:[#allocation17_spill] sm:$0xff] }
 0x165   : > { %v3115_v31 = vpop.f32.mrf.mxu1  ;;  %v1686_v30 = vadd.f32 %v2332_v2, %v1589_v33  ;;  %v1602_v16 = vadd.f32 %v2277_v54, %v3037_v17  ;;  %v1715_v33 = vadd.f32 %v2353_v8, %v1618_v14  ;;  %v2356_v17 = vadd.f32 %v3103_v47, %v3101_v43  ;;  %v3246_v2 = vld [vmem:[#allocation8_spill] sm:$0xff] }
 0x166   : > { %v2305_v28 = vpop.f32.mrf.mxu0  ;;  %v1691_v20 = vadd.f32 %v2335_v45, %v1594_v26  ;;  %v2341_v6 = vadd.f32 %v3247_v4, %v3246_v2  ;;  %v3253_v8 = vld [vmem:[#allocation16_spill] sm:$0xff] }
 0x167   : > { %v3117_v22 = vpop.f32.mrf.mxu1  ;;  %v1718_v49 = vadd.f32 %v2356_v17, %v1621_v13  ;;  %v3249_v14 = vld [vmem:[#allocation18_spill] sm:$0xff]  ;;  %v3255_v13 = vld [vmem:[#allocation5_spill] sm:$0xff] }
 0x168   : > { %v2306_v36 = vpop.f32.mrf.mxu0 }
 0x169   : > { %v2370_v58 = vpop.f32.mrf.mxu1  ;;  %v2307_v52 = vadd.f32 %v2306_v36, %v2305_v28  ;;  %v2286_v28 = vadd.f32 %v3097_v34, %v3093_v32  ;;  %v2280_v32 = vadd.f32 %v3241_v42, %v3240_v40  ;;  %v3242_v34 = vld [vmem:[#allocation14_spill] sm:$0xff] }
 0x16a   : > { %v2308_v9 = vpop.f32.mrf.mxu0  ;;  %v2347_v43 = vadd.f32 %v3243_v46, %v3242_v34  ;;  %v3245_v53 = vld [vmem:[#allocation20_spill] sm:$0xff]  ;;  %v2371_v57 = vadd.f32 %v2370_v58, %v3117_v22  ;;  %v3251_v22 = vld [vmem:[#allocation7_spill] sm:$0xff] }
 0x16b   : > { %v3130_v63 = vpop.f32.mrf.mxu1  ;;  %v1642_v38 = vadd.f32 %v2307_v52, %v3239_v37  ;;  %v2304_v56 = vadd.f32 %v3113_v44, %v3245_v53  ;;  %v3250_v44 = vld [vmem:[#allocation19_spill] sm:$0xff]  ;;  %v2350_v52 = vadd.f32 %v3254_v55, %v3253_v8  ;;  %v3258_v17 = vld [vmem:[#allocation21_spill] sm:$0xff] }
 0x16c   : > { %v2309_v0 = vpop.f32.mrf.mxu0  ;;  %v1707_v12 = vadd.f32 %v2347_v43, %v1610_v21  ;;  %v2365_v60 = vadd.f32 %v3250_v44, %v3249_v14 }
 0x16d   : > { %v2373_v18 = vpop.f32.mrf.mxu1  ;;  %v2310_v41 = vadd.f32 %v2309_v0, %v2308_v9  ;;  %v3248_v9 = vld [vmem:[#allocation3_spill] sm:$0xff]  ;;  %v1739_v11 = vadd.f32 %v2371_v57, %v1642_v38 }
 0x16e   : > { %v2409_v7 = vpop.f32.mrf.mxu0  ;;  %v1613_v45 = vadd.f32 %v2286_v28, %v3248_v9  ;;  %v1731_v24 = vadd.f32 %v2365_v60, %v1634_v51 }
 0x16f   : > { %v1788_v15 = vadd.f32 %v2409_v7, %v1691_v20  ;;  %v2417_v26 = vpop.f32.mrf.mxu1  ;;  %v1645_v58 = vadd.f32 %v2310_v41, %v3251_v22  ;;  %v1605_v20 = vadd.f32 %v2280_v32, %v3252_v5 }
 0x170   : > { %v1820_v27 = vadd.f32 %v2417_v26, %v1723_v10  ;;  %v1779_v29 = vpop.f32.mrf.mxu0  ;;  %v1699_v10 = vadd.f32 %v2341_v6, %v1602_v16  ;;  %v2374_v26 = vadd.f32 %v2373_v18, %v3130_v63  ;;  %v1710_v16 = vadd.f32 %v2350_v52, %v1613_v45 }
 0x171   : > { %1845 = vst.msk [vmem:[%s3140_s8 + $0x10] sm:$0xff] %vm1842_vm0, %v1788_v15  ;;  %v1780_v1 = vadd.f32 %v1779_v29, %v1683_v3  ;;  %v1811_v36 = vpop.f32.mrf.mxu1  ;;  %v1637_v15 = vadd.f32 %v2304_v56, %v3255_v13  ;;  %v3257_v29 = vld [vmem:[#allocation13_spill] sm:$0xff] }
 0x172   : > { %1853 = vst.msk [vmem:[%s3140_s8 + $0x50] sm:$0xff] %vm1842_vm0, %v1820_v27  ;;  %v1812_v25 = vadd.f32 %v1811_v36, %v1715_v33  ;;  %v2410_v39 = vpop.f32.mrf.mxu0  ;;  %v3256_v27 = vld [vmem:[#allocation11_spill] sm:$0xff]  ;;  %v1742_v36 = vadd.f32 %v2374_v26, %v1645_v58 }
 0x173   : > { %1843 = vst.msk [vmem:[%s3140_s8] sm:$0xff] %vm1842_vm0, %v1780_v1  ;;  %v1791_v47 = vadd.f32 %v2410_v39, %v1694_v19  ;;  %v2418_v48 = vpop.f32.mrf.mxu1  ;;  %v2344_v33 = vadd.f32 %v3257_v29, %v3256_v27  ;;  %v2368_v1 = vadd.f32 %v3115_v31, %v3258_v17 }
 0x174   : > { %1851 = vst.msk [vmem:[%s3140_s8 + $0x40] sm:$0xff] %vm1842_vm0, %v1812_v25  ;;  %v1823_v59 = vadd.f32 %v2418_v48, %v1726_v35  ;;  %v1782_v61 = vpop.f32.mrf.mxu0 }
 0x175   : > { %1846 = vst.msk [vmem:[%s3140_s8 + $0x18] sm:$0xff] %vm1842_vm0, %v1791_v47  ;;  %v1783_v62 = vadd.f32 %v1782_v61, %v1686_v30  ;;  %v1814_v54 = vpop.f32.mrf.mxu1  ;;  %v1702_v41 = vadd.f32 %v2344_v33, %v1605_v20  ;;  %v1734_v35 = vadd.f32 %v2368_v1, %v1637_v15 }
 0x176   : > { %1854 = vst.msk [vmem:[%s3140_s8 + $0x58] sm:$0xff] %vm1842_vm0, %v1823_v59  ;;  %v1815_v0 = vadd.f32 %v1814_v54, %v1718_v49  ;;  %v2413_v3 = vpop.f32.mrf.mxu0 }
 0x177   : > { %1844 = vst.msk [vmem:[%s3140_s8 + $0x8] sm:$0xff] %vm1842_vm0, %v1783_v62  ;;  %v1804_v30 = vadd.f32 %v2413_v3, %v1707_v12  ;;  %v2421_v7 = vpop.f32.mrf.mxu1 }
 0x178   : > { %1852 = vst.msk [vmem:[%s3140_s8 + $0x48] sm:$0xff] %vm1842_vm0, %v1815_v0  ;;  %v1836_v19 = vadd.f32 %v2421_v7, %v1739_v11  ;;  %v1795_v23 = vpop.f32.mrf.mxu0 }
 0x179   : > { %1849 = vst.msk [vmem:[%s3140_s8 + $0x30] sm:$0xff] %vm1842_vm0, %v1804_v30  ;;  %v1796_v21 = vadd.f32 %v1795_v23, %v1699_v10  ;;  %v1827_v28 = vpop.f32.mrf.mxu1 }
 0x17a   : > { %1857 = vst.msk [vmem:[%s3140_s8 + $0x70] sm:$0xff] %vm1842_vm0, %v1836_v19  ;;  %v1828_v63 = vadd.f32 %v1827_v28, %v1731_v24  ;;  %v2414_v18 = vpop.f32.mrf.mxu0 }
 0x17b   : > { %1847 = vst.msk [vmem:[%s3140_s8 + $0x20] sm:$0xff] %vm1842_vm0, %v1796_v21  ;;  %v1807_v37 = vadd.f32 %v2414_v18, %v1710_v16  ;;  %v2422_v38 = vpop.f32.mrf.mxu1 }
 0x17c   : > { %1855 = vst.msk [vmem:[%s3140_s8 + $0x60] sm:$0xff] %vm1842_vm0, %v1828_v63  ;;  %v1839_v25 = vadd.f32 %v2422_v38, %v1742_v36  ;;  %v1798_v39 = vpop.f32.mrf.mxu0 }
 0x17d   : > { %1850 = vst.msk [vmem:[%s3140_s8 + $0x38] sm:$0xff] %vm1842_vm0, %v1807_v37  ;;  %v1799_v31 = vadd.f32 %v1798_v39, %v1702_v41  ;;  %v1830_v40 = vpop.f32.mrf.mxu1 }
 0x17e   : > { %1858 = vst.msk [vmem:[%s3140_s8 + $0x78] sm:$0xff] %vm1842_vm0, %v1839_v25  ;;  %v1831_v42 = vadd.f32 %v1830_v40, %v1734_v35 }
 0x17f   : > { %1848 = vst.msk [vmem:[%s3140_s8 + $0x28] sm:$0xff] %vm1842_vm0, %v1799_v31 }
 0x180   : > { %1856 = vst.msk [vmem:[%s3140_s8 + $0x68] sm:$0xff] %vm1842_vm0, %v1831_v42 }
 0x181 PF: > { %s13_s14 = sadd.s32 1, %s2665_s14   ;;  %s3259_s12 = smov %s2661_s13 }
 0x182   : > { %p10_p5 = scmp.ge.s32.totalorder %s13_s14, 4   ;;  %s3260_s13 = smov %s3262_s15 }
 0x184   :  { %12 = sbr.rel (!%p10_p5) target bundleno = 2 (0x2), region = 68 }

// kernel: _lambda_.10
= control target key start
LH: loop header
LB: loop body
LE: loop exit
PB: predicated region body
PF: predicated region fallthrough
CT: control target
= control target key end

     0   :  { %s755_s12 = smov 0   ;;  %s757_s13 = smov 0   ;;  %s991_s0 = inlined_call_operand.vmem [shape: f32[64,128], index: 0, kind: input, shape index: {}]   ;;  %s992_s1 = inlined_call_operand.vmem [shape: f32[64,1], index: 1, kind: input, shape index: {}]   ;;  %s993_s2 = inlined_call_operand.vmem [shape: f32[64,1], index: 2, kind: input, shape index: {}]   ;;  %s994_s3 = inlined_call_operand.vmem [shape: bf16[64,128], index: 3, kind: output, shape index: {}]  }
   0x1   :  { %s759_s14 = smov 0  }
   0x2 LB: > { %s25_s15 = sadd.s32 1, %s727_s13  ;;  %p618_p0 = scmp.ge.s32.totalorder %s731_s14, 1  ;;  %s731_s14 = sphi %s759_s14, %s13_s14   ;;  %s727_s13 = sphi %s757_s13, %s996_s13   ;;  %s723_s12 = sphi %s755_s12, %s995_s12  }
   0x3   : > { %p27_p1 = scmp.ge.s32.totalorder %s25_s15, 2  ;;  %p148_p2 = scmp.lt.s32.totalorder %s731_s14, 3 }
   0x5   : > { %s998_s15 = smov (%p27_p1, %s25_s15), 0  ;;  %p149_p3 = pnand %p618_p0, %p148_p2 }
   0x6   : > { %p178_p4 = scmp.eq.s32.totalorder (!%p149_p3), %s723_s12, 0 }
   0x7   : > { %152 = sbr.rel (%p149_p3) target bundleno = 389 (0x185), region = 32 }
   0xc   : > { %183 = sbr.rel (!%p178_p4) target bundleno = 21 (0x15), region = 36  ;;  %vm184_vm0 = vcmask (%p178_p4), 7168   ;;  %v733_v0 = vmov (%p178_p4), 0.0  }
   0xd   : > { %185 = vst.msk [vmem:[#allocation2] sm:$0xff] (%p178_p4), %vm184_vm0, %v733_v0  ;;  %186 = vst.msk [vmem:[#allocation2 + $0x8] sm:$0xff] (%p178_p4), %vm184_vm0, %v733_v0 }
   0xe   : > { %187 = vst.msk [vmem:[#allocation2 + $0x10] sm:$0xff] (%p178_p4), %vm184_vm0, %v733_v0  ;;  %188 = vst.msk [vmem:[#allocation2 + $0x18] sm:$0xff] (%p178_p4), %vm184_vm0, %v733_v0 }
   0xf   : > { %189 = vst.msk [vmem:[#allocation2 + $0x20] sm:$0xff] (%p178_p4), %vm184_vm0, %v733_v0  ;;  %190 = vst.msk [vmem:[#allocation2 + $0x28] sm:$0xff] (%p178_p4), %vm184_vm0, %v733_v0 }
  0x10   : > { %191 = vst.msk [vmem:[#allocation2 + $0x30] sm:$0xff] (%p178_p4), %vm184_vm0, %v733_v0  ;;  %192 = vst.msk [vmem:[#allocation2 + $0x38] sm:$0xff] (%p178_p4), %vm184_vm0, %v733_v0 }
  0x11   : > { %193 = vst.msk [vmem:[#allocation3] sm:$0xff] %vm184_vm0, %v733_v0  ;;  %194 = vst.msk [vmem:[#allocation3 + $0x8] sm:$0xff] %vm184_vm0, %v733_v0 }
  0x12   : > { %195 = vst.msk [vmem:[#allocation3 + $0x10] sm:$0xff] %vm184_vm0, %v733_v0  ;;  %196 = vst.msk [vmem:[#allocation3 + $0x18] sm:$0xff] %vm184_vm0, %v733_v0 }
  0x13   : > { %197 = vst.msk [vmem:[#allocation3 + $0x20] sm:$0xff] %vm184_vm0, %v733_v0  ;;  %198 = vst.msk [vmem:[#allocation3 + $0x28] sm:$0xff] %vm184_vm0, %v733_v0 }
  0x14   : > { %199 = vst.msk [vmem:[#allocation3 + $0x30] sm:$0xff] %vm184_vm0, %v733_v0  ;;  %200 = vst.msk [vmem:[#allocation3 + $0x38] sm:$0xff] %vm184_vm0, %v733_v0 }
  0x15 PF: > { %v795_v1 = vld [vmem:[%s991_s0] sm:$0xff]  ;;  %v800_v2 = vld [vmem:[%s991_s0 + $0x8] sm:$0xff]  ;;  %v805_v3 = vld [vmem:[%s991_s0 + $0x10] sm:$0xff]  ;;  %p620_p5 = scmp.ne.s32.totalorder %s723_s12, 0 }
  0x16   : > { %v810_v4 = vld [vmem:[%s991_s0 + $0x18] sm:$0xff]  ;;  %v815_v5 = vld [vmem:[%s991_s0 + $0x20] sm:$0xff]  ;;  %v820_v6 = vld [vmem:[%s991_s0 + $0x28] sm:$0xff] }
  0x17   : > { %v825_v7 = vld [vmem:[%s991_s0 + $0x30] sm:$0xff]  ;;  %v830_v8 = vld [vmem:[%s991_s0 + $0x38] sm:$0xff]  ;;  %211 = sbr.rel (%p620_p5) target bundleno = 197 (0xc5), region = 40 }
  0x1c   : > { %224 = vadd.xlane.f32.xlu1 %v805_v3  ;;  %220 = vadd.xlane.f32.xlu0 %v795_v1  ;;  %v262_v9 = vmul.f32 %v800_v2, %v800_v2  ;;  %v261_v10 = vmul.f32 %v795_v1, %v795_v1  ;;  %v264_v11 = vmul.f32 %v810_v4, %v810_v4  ;;  %v214_v17 = vld [vmem:[#allocation2 + $0x10] sm:$0xff]  ;;  %v212_v18 = vld [vmem:[#allocation2] sm:$0xff]  ;;  %vm244_vm1 = vcmask 7168   ;;  %v215_v23 = vld [vmem:[#allocation2 + $0x18] sm:$0xff] }
  0x1d   : > { %v263_v12 = vmul.f32 %v805_v3, %v805_v3  ;;  %v266_v13 = vmul.f32 %v820_v6, %v820_v6  ;;  %v265_v14 = vmul.f32 %v815_v5, %v815_v5  ;;  %v268_v15 = vmul.f32 %v830_v8, %v830_v8  ;;  %v213_v24 = vld [vmem:[#allocation2 + $0x8] sm:$0xff]  ;;  %v216_v30 = vld [vmem:[#allocation2 + $0x20] sm:$0xff]  ;;  %v219_v35 = vld [vmem:[#allocation2 + $0x38] sm:$0xff] }
  0x1e   : > { %v267_v16 = vmul.f32 %v825_v7, %v825_v7  ;;  %v217_v29 = vld [vmem:[#allocation2 + $0x28] sm:$0xff]  ;;  %v218_v36 = vld [vmem:[#allocation2 + $0x30] sm:$0xff]  ;;  %v253_v42 = vld [vmem:[#allocation3] sm:$0xff] }
  0x1f   : > { %v254_v41 = vld [vmem:[#allocation3 + $0x8] sm:$0xff]  ;;  %v256_v47 = vld [vmem:[#allocation3 + $0x18] sm:$0xff]  ;;  %v255_v48 = vld [vmem:[#allocation3 + $0x10] sm:$0xff] }
  0x20   : > { %226 = vadd.xlane.f32.xlu1 %v810_v4  ;;  %222 = vadd.xlane.f32.xlu0 %v800_v2  ;;  %v258_v53 = vld [vmem:[#allocation3 + $0x28] sm:$0xff]  ;;  %v257_v54 = vld [vmem:[#allocation3 + $0x20] sm:$0xff]  ;;  %v260_v59 = vld [vmem:[#allocation3 + $0x38] sm:$0xff] }
  0x21   : > { %v259_v60 = vld [vmem:[#allocation3 + $0x30] sm:$0xff] }
  0x24   : > { %230 = vadd.xlane.f32.xlu1 %v820_v6  ;;  %228 = vadd.xlane.f32.xlu0 %v815_v5 }
  0x28   : > { %234 = vadd.xlane.f32.xlu1 %v830_v8  ;;  %232 = vadd.xlane.f32.xlu0 %v825_v7 }
  0x2c   : > { %271 = vadd.xlane.f32.xlu1 %v262_v9  ;;  %269 = vadd.xlane.f32.xlu0 %v261_v10 }
  0x30   : > { %275 = vadd.xlane.f32.xlu1 %v264_v11  ;;  %273 = vadd.xlane.f32.xlu0 %v263_v12 }
  0x34   : > { %279 = vadd.xlane.f32.xlu1 %v266_v13  ;;  %277 = vadd.xlane.f32.xlu0 %v265_v14 }
  0x38   : > { %283 = vadd.xlane.f32.xlu1 %v268_v15  ;;  %281 = vadd.xlane.f32.xlu0 %v267_v16 }
  0xa5   : > { %v225_v19 = vpop.xlane.xlu1 %224  ;;  %v221_v20 = vpop.xlane.xlu0 %220 }
  0xa6   : > { %v238_v21 = vadd.f32 %v225_v19, %v214_v17  ;;  %v236_v22 = vadd.f32 %v221_v20, %v212_v18 }
  0xa8   : > { %247 = vst.msk [vmem:[#allocation2 + $0x10] sm:$0xff] %vm244_vm1, %v238_v21  ;;  %245 = vst.msk [vmem:[#allocation2] sm:$0xff] %vm244_vm1, %v236_v22 }
  0xa9   : > { %v227_v25 = vpop.xlane.xlu1 %226  ;;  %v223_v26 = vpop.xlane.xlu0 %222 }
  0xaa   : > { %v239_v27 = vadd.f32 %v227_v25, %v215_v23  ;;  %v237_v28 = vadd.f32 %v223_v26, %v213_v24 }
  0xac   : > { %248 = vst.msk [vmem:[#allocation2 + $0x18] sm:$0xff] %vm244_vm1, %v239_v27  ;;  %246 = vst.msk [vmem:[#allocation2 + $0x8] sm:$0xff] %vm244_vm1, %v237_v28 }
  0xad   : > { %v231_v31 = vpop.xlane.xlu1 %230  ;;  %v229_v32 = vpop.xlane.xlu0 %228 }
  0xae   : > { %v241_v33 = vadd.f32 %v231_v31, %v217_v29  ;;  %v240_v34 = vadd.f32 %v229_v32, %v216_v30 }
  0xb0   : > { %250 = vst.msk [vmem:[#allocation2 + $0x28] sm:$0xff] %vm244_vm1, %v241_v33  ;;  %249 = vst.msk [vmem:[#allocation2 + $0x20] sm:$0xff] %vm244_vm1, %v240_v34 }
  0xb1   : > { %v235_v37 = vpop.xlane.xlu1 %234  ;;  %v233_v38 = vpop.xlane.xlu0 %232 }
  0xb2   : > { %v243_v39 = vadd.f32 %v235_v37, %v219_v35  ;;  %v242_v40 = vadd.f32 %v233_v38, %v218_v36 }
  0xb4   : > { %252 = vst.msk [vmem:[#allocation2 + $0x38] sm:$0xff] %vm244_vm1, %v243_v39  ;;  %251 = vst.msk [vmem:[#allocation2 + $0x30] sm:$0xff] %vm244_vm1, %v242_v40 }
  0xb5   : > { %v272_v43 = vpop.xlane.xlu1 %271  ;;  %v270_v44 = vpop.xlane.xlu0 %269 }
  0xb6   : > { %v286_v45 = vadd.f32 %v272_v43, %v254_v41  ;;  %v285_v46 = vadd.f32 %v270_v44, %v253_v42 }
  0xb8   : > { %294 = vst.msk [vmem:[#allocation3 + $0x8] sm:$0xff] %vm244_vm1, %v286_v45  ;;  %293 = vst.msk [vmem:[#allocation3] sm:$0xff] %vm244_vm1, %v285_v46 }
  0xb9   : > { %v276_v49 = vpop.xlane.xlu1 %275  ;;  %v274_v50 = vpop.xlane.xlu0 %273 }
  0xba   : > { %v288_v51 = vadd.f32 %v276_v49, %v256_v47  ;;  %v287_v52 = vadd.f32 %v274_v50, %v255_v48 }
  0xbc   : > { %296 = vst.msk [vmem:[#allocation3 + $0x18] sm:$0xff] %vm244_vm1, %v288_v51  ;;  %295 = vst.msk [vmem:[#allocation3 + $0x10] sm:$0xff] %vm244_vm1, %v287_v52 }
  0xbd   : > { %v280_v55 = vpop.xlane.xlu1 %279  ;;  %v278_v56 = vpop.xlane.xlu0 %277 }
  0xbe   : > { %v290_v57 = vadd.f32 %v280_v55, %v258_v53  ;;  %v289_v58 = vadd.f32 %v278_v56, %v257_v54 }
  0xc0   : > { %298 = vst.msk [vmem:[#allocation3 + $0x28] sm:$0xff] %vm244_vm1, %v290_v57  ;;  %297 = vst.msk [vmem:[#allocation3 + $0x20] sm:$0xff] %vm244_vm1, %v289_v58 }
  0xc1   : > { %v284_v61 = vpop.xlane.xlu1 %283  ;;  %v282_v62 = vpop.xlane.xlu0 %281 }
  0xc2   : > { %v292_v63 = vadd.f32 %v284_v61, %v260_v59  ;;  %v291_v0 = vadd.f32 %v282_v62, %v259_v60 }
  0xc4   : > { %300 = vst.msk [vmem:[#allocation3 + $0x38] sm:$0xff] %vm244_vm1, %v292_v63  ;;  %299 = vst.msk [vmem:[#allocation3 + $0x30] sm:$0xff] %vm244_vm1, %v291_v0 }
  0xc5 PF: > { %p621_p6 = scmp.ne.s32.totalorder %s723_s12, 1 }
  0xc7   : > { %304 = sbr.rel (%p621_p6) target bundleno = 389 (0x185), region = 44 }
  0xcc   : > { %v307_v9 = vld [vmem:[#allocation2 + $0x10] sm:$0xff]  ;;  %v734_v11 = vmov 0   ;;  %v305_v14 = vld [vmem:[#allocation2] sm:$0xff]  ;;  %v308_v18 = vld [vmem:[#allocation2 + $0x18] sm:$0xff] }
  0xcd   : > { %v323_v10 = vld [vmem:[#allocation3 + $0x10] sm:$0xff]  ;;  %692 = vset.pattern.permute.xlu1 %v734_v11  ;;  %691 = vset.pattern.permute.xlu0 %v734_v11  ;;  %v874_v12 = vmul.f32 0.0078125, %v307_v9  ;;  %v321_v15 = vld [vmem:[#allocation3] sm:$0xff]  ;;  %v876_v16 = vmul.f32 0.0078125, %v305_v14  ;;  %v324_v19 = vld [vmem:[#allocation3 + $0x18] sm:$0xff]  ;;  %v880_v21 = vmul.f32 0.0078125, %v308_v18 }
  0xce   : > { %v331_v13 = vmul.f32 0.0078125, %v323_v10  ;;  %v329_v17 = vmul.f32 0.0078125, %v321_v15  ;;  %v332_v22 = vmul.f32 0.0078125, %v324_v19  ;;  %v306_v23 = vld [vmem:[#allocation2 + $0x8] sm:$0xff]  ;;  %v309_v34 = vld [vmem:[#allocation2 + $0x20] sm:$0xff]  ;;  %v312_v40 = vld [vmem:[#allocation2 + $0x38] sm:$0xff] }
  0xcf   : > { %v339_v20 = vmul.f32 %v874_v12, %v874_v12  ;;  %v322_v24 = vld [vmem:[#allocation3 + $0x8] sm:$0xff]  ;;  %v337_v25 = vmul.f32 %v876_v16, %v876_v16  ;;  %v884_v26 = vmul.f32 0.0078125, %v306_v23  ;;  %v340_v31 = vmul.f32 %v880_v21, %v880_v21  ;;  %v325_v35 = vld [vmem:[#allocation3 + $0x20] sm:$0xff]  ;;  %v328_v41 = vld [vmem:[#allocation3 + $0x38] sm:$0xff] }
  0xd0   : > { %v330_v27 = vmul.f32 0.0078125, %v322_v24  ;;  %v310_v28 = vld [vmem:[#allocation2 + $0x28] sm:$0xff]  ;;  %v892_v38 = vmul.f32 0.0078125, %v309_v34  ;;  %v333_v39 = vmul.f32 0.0078125, %v325_v35  ;;  %v896_v45 = vmul.f32 0.0078125, %v312_v40  ;;  %v311_v46 = vld [vmem:[#allocation2 + $0x30] sm:$0xff] }
  0xd1   : > { %v326_v29 = vld [vmem:[#allocation3 + $0x28] sm:$0xff]  ;;  %v347_v30 = vsub.f32 %v331_v13, %v339_v20  ;;  %v888_v32 = vmul.f32 0.0078125, %v310_v28  ;;  %v345_v36 = vsub.f32 %v329_v17, %v337_v25  ;;  %v338_v37 = vmul.f32 %v884_v26, %v884_v26  ;;  %v327_v51 = vld [vmem:[#allocation3 + $0x30] sm:$0xff]  ;;  %v369_v11 = vld [vmem:[%s992_s1] sm:$0xff] }
  0xd2   : > { %v334_v33 = vmul.f32 0.0078125, %v326_v29  ;;  %v348_v43 = vsub.f32 %v332_v22, %v340_v31  ;;  %v341_v49 = vmul.f32 %v892_v38, %v892_v38  ;;  %v336_v50 = vmul.f32 0.0078125, %v328_v41  ;;  %v371_v10 = vld [vmem:[%s992_s1 + $0x10] sm:$0xff]  ;;  %v372_v14 = vld [vmem:[%s992_s1 + $0x18] sm:$0xff]  ;;  %v370_v18 = vld [vmem:[%s992_s1 + $0x8] sm:$0xff] }
  0xd3   : > { %v355_v42 = vadd.f32 1e-05, %v347_v30  ;;  %v342_v44 = vmul.f32 %v888_v32, %v888_v32  ;;  %v353_v47 = vadd.f32 1e-05, %v345_v36  ;;  %v346_v48 = vsub.f32 %v330_v27, %v338_v37  ;;  %v374_v27 = vld [vmem:[%s992_s1 + $0x28] sm:$0xff]  ;;  %v373_v29 = vld [vmem:[%s992_s1 + $0x20] sm:$0xff] }
  0xd4   : > { %v356_v52 = vadd.f32 1e-05, %v348_v43  ;;  %v344_v54 = vmul.f32 %v896_v45, %v896_v45  ;;  %v349_v56 = vsub.f32 %v333_v39, %v341_v49  ;;  %v902_v57 = vmul.f32 0.0078125, %v311_v46  ;;  %v376_v34 = vld [vmem:[%s992_s1 + $0x38] sm:$0xff]  ;;  %v375_v36 = vld [vmem:[%s992_s1 + $0x30] sm:$0xff]  ;;  %v385_v43 = vld [vmem:[%s993_s2] sm:$0xff] }
  0xd5   : > { %693 = vrsqrt.f32 %v355_v42  ;;  %v350_v53 = vsub.f32 %v334_v33, %v342_v44  ;;  %v354_v55 = vadd.f32 1e-05, %v346_v48  ;;  %v335_v60 = vmul.f32 0.0078125, %v327_v51  ;;  %v386_v42 = vld [vmem:[%s993_s2 + $0x8] sm:$0xff]  ;;  %v387_v48 = vld [vmem:[%s993_s2 + $0x10] sm:$0xff] }
  0xd6   : > { %695 = vrsqrt.f32 %v353_v47  ;;  %v352_v59 = vsub.f32 %v336_v50, %v344_v54  ;;  %v357_v61 = vadd.f32 1e-05, %v349_v56  ;;  %v343_v62 = vmul.f32 %v902_v57, %v902_v57 }
  0xd7   : > { %697 = vrsqrt.f32 %v356_v52  ;;  %v358_v58 = vadd.f32 1e-05, %v350_v53  ;;  %v389_v52 = vld [vmem:[%s993_s2 + $0x20] sm:$0xff] }
  0xd8   : > { %699 = vrsqrt.f32 %v354_v55  ;;  %v360_v63 = vadd.f32 1e-05, %v352_v59  ;;  %v351_v0 = vsub.f32 %v335_v60, %v343_v62 }
  0xd9   : > { %701 = vrsqrt.f32 %v358_v58 }
  0xda   : > { %703 = vrsqrt.f32 %v357_v61  ;;  %v359_v9 = vadd.f32 1e-05, %v351_v0 }
  0xdb   : > { %705 = vrsqrt.f32 %v360_v63 }
  0xdc   : > { %707 = vrsqrt.f32 %v359_v9 }
  0xe2   : > { %v694_v13 = vpop.eup %693 }
  0xe3   : > { %v696_v15 = vpop.eup %695  ;;  %v379_v17 = vmul.f32 %v694_v13, %v371_v10 }
  0xe4   : > { %v698_v19 = vpop.eup %697  ;;  %v377_v20 = vmul.f32 %v696_v15, %v369_v11 }
  0xe5   : > { %v700_v22 = vpop.eup %699  ;;  %421 = vperm.xlu1 %692, %v379_v17   ;;  %v380_v23 = vmul.f32 %v698_v19, %v372_v14  ;;  %v395_v47 = vmul.f32 %v379_v17, %v874_v12  ;;  %v390_v12 = vld [vmem:[%s993_s2 + $0x28] sm:$0xff] }
  0xe6   : > { %v702_v24 = vpop.eup %701  ;;  %411 = vperm.xlu0 %691, %v377_v20   ;;  %v378_v25 = vmul.f32 %v700_v22, %v370_v18  ;;  %v393_v40 = vmul.f32 %v377_v20, %v876_v16  ;;  %v388_v16 = vld [vmem:[%s993_s2 + $0x18] sm:$0xff] }
  0xe7   : > { %v704_v28 = vpop.eup %703  ;;  %v382_v30 = vmul.f32 %v702_v24, %v374_v27  ;;  %v396_v46 = vmul.f32 %v380_v23, %v880_v21  ;;  %v403_v51 = vsub.f32 %v387_v48, %v395_v47 }
  0xe8   : > { %v706_v31 = vpop.eup %705  ;;  %v381_v33 = vmul.f32 %v704_v28, %v373_v29  ;;  %v394_v39 = vmul.f32 %v378_v25, %v884_v26  ;;  %v401_v26 = vsub.f32 %v385_v43, %v393_v40 }
  0xe9   : > { %426 = vperm.xlu1 %692, %v380_v23   ;;  %v708_v35 = vpop.eup %707  ;;  %v384_v37 = vmul.f32 %v706_v31, %v376_v34  ;;  %v404_v49 = vsub.f32 %v388_v16, %v396_v46  ;;  %v398_v50 = vmul.f32 %v382_v30, %v888_v32  ;;  %v392_v32 = vld [vmem:[%s993_s2 + $0x38] sm:$0xff] }
  0xea   : > { %416 = vperm.xlu0 %691, %v378_v25   ;;  %v383_v41 = vmul.f32 %v708_v35, %v375_v36  ;;  %v402_v44 = vsub.f32 %v386_v42, %v394_v39  ;;  %v397_v21 = vmul.f32 %v381_v33, %v892_v38  ;;  %v391_v38 = vld [vmem:[%s993_s2 + $0x30] sm:$0xff] }
  0xeb   : > { %v406_v53 = vsub.f32 %v390_v12, %v398_v50  ;;  %v400_v54 = vmul.f32 %v384_v37, %v896_v45 }
  0xec   : > { %v405_v55 = vsub.f32 %v389_v52, %v397_v21  ;;  %v399_v56 = vmul.f32 %v383_v41, %v902_v57 }
  0xed   : > { %436 = vperm.xlu1 %692, %v382_v30   ;;  %v408_v58 = vsub.f32 %v392_v32, %v400_v54 }
  0xee   : > { %431 = vperm.xlu0 %691, %v381_v33   ;;  %v407_v59 = vsub.f32 %v391_v38, %v399_v56 }
  0xf1   : > { %446 = vperm.xlu1 %692, %v384_v37  }
  0xf2   : > { %441 = vperm.xlu0 %691, %v383_v41  }
  0xf5   : > { %464 = vperm.xlu1 %692, %v402_v44  }
  0xf6   : > { %459 = vperm.xlu0 %691, %v401_v26  }
  0xf9   : > { %474 = vperm.xlu1 %692, %v404_v49  }
  0xfa   : > { %469 = vperm.xlu0 %691, %v403_v51  }
  0xfd   : > { %484 = vperm.xlu1 %692, %v406_v53  }
  0xfe   : > { %479 = vperm.xlu0 %691, %v405_v55  }
 0x101   : > { %494 = vperm.xlu1 %692, %v408_v58  }
 0x102   : > { %489 = vperm.xlu0 %691, %v407_v59  }
 0x160   : > { %v422_v60 = vpop.permute.xlu1 %421 }
 0x161   : > { %v412_v45 = vpop.permute.xlu0 %411  ;;  %v451_v20 = vmul.f32 %v422_v60, %v805_v3 }
 0x162   : > { %v449_v11 = vmul.f32 %v412_v45, %v795_v1 }
 0x164   : > { %v427_v61 = vpop.permute.xlu1 %426 }
 0x165   : > { %v417_v62 = vpop.permute.xlu0 %416  ;;  %v452_v18 = vmul.f32 %v427_v61, %v810_v4 }
 0x166   : > { %v450_v57 = vmul.f32 %v417_v62, %v800_v2 }
 0x168   : > { %v437_v63 = vpop.permute.xlu1 %436 }
 0x169   : > { %v432_v0 = vpop.permute.xlu0 %431  ;;  %v454_v29 = vmul.f32 %v437_v63, %v820_v6 }
 0x16a   : > { %v453_v1 = vmul.f32 %v432_v0, %v815_v5 }
 0x16c   : > { %v447_v9 = vpop.permute.xlu1 %446 }
 0x16d   : > { %v442_v10 = vpop.permute.xlu0 %441  ;;  %v456_v35 = vmul.f32 %v447_v9, %v830_v8 }
 0x16e   : > { %v455_v37 = vmul.f32 %v442_v10, %v825_v7 }
 0x170   : > { %v465_v13 = vpop.permute.xlu1 %464 }
 0x171   : > { %v498_v14 = vadd.f32 %v465_v13, %v450_v57  ;;  %v460_v15 = vpop.permute.xlu0 %459 }
 0x172   : > { %v497_v17 = vadd.f32 %v460_v15, %v449_v11 }
 0x173   : > { %v506_v19 = vmax.f32 %v498_v14, 0.0 }
 0x174   : > { %v505_v22 = vmax.f32 %v497_v17, 0.0  ;;  %v475_v23 = vpop.permute.xlu1 %474 }
 0x175   : > { %v500_v24 = vadd.f32 %v475_v23, %v452_v18  ;;  %v470_v25 = vpop.permute.xlu0 %469 }
 0x176   : > { %v645_v27 = vpack.c.bf16 %v506_v19, %v505_v22  ;;  %v499_v28 = vadd.f32 %v470_v25, %v451_v20 }
 0x177   : > { %v508_v2 = vmax.f32 %v500_v24, 0.0 }
 0x178   : > { %646 = vst [vmem:[%s994_s3] sm:$0xff] %v645_v27   ;;  %v507_v30 = vmax.f32 %v499_v28, 0.0  ;;  %v485_v4 = vpop.permute.xlu1 %484 }
 0x179   : > { %v502_v31 = vadd.f32 %v485_v4, %v454_v29  ;;  %v480_v33 = vpop.permute.xlu0 %479 }
 0x17a   : > { %v650_v3 = vpack.c.bf16 %v508_v2, %v507_v30  ;;  %v501_v34 = vadd.f32 %v480_v33, %v453_v1 }
 0x17b   : > { %v510_v36 = vmax.f32 %v502_v31, 0.0 }
 0x17c   : > { %662 = vst [vmem:[%s994_s3 + $0x8] sm:$0xff] %v650_v3   ;;  %v509_v5 = vmax.f32 %v501_v34, 0.0  ;;  %v495_v6 = vpop.permute.xlu1 %494 }
 0x17d   : > { %v504_v39 = vadd.f32 %v495_v6, %v456_v35  ;;  %v490_v40 = vpop.permute.xlu0 %489 }
 0x17e   : > { %v655_v41 = vpack.c.bf16 %v510_v36, %v509_v5  ;;  %v503_v42 = vadd.f32 %v490_v40, %v455_v37 }
 0x17f   : > { %v512_v43 = vmax.f32 %v504_v39, 0.0 }
 0x180   : > { %663 = vst [vmem:[%s994_s3 + $0x10] sm:$0xff] %v655_v41   ;;  %v511_v44 = vmax.f32 %v503_v42, 0.0 }
 0x182   : > { %v660_v8 = vpack.c.bf16 %v512_v43, %v511_v44 }
 0x184   : > { %664 = vst [vmem:[%s994_s3 + $0x18] sm:$0xff] %v660_v8  }
 0x185 PF: > { %s13_s14 = sadd.s32 1, %s731_s14   ;;  %s995_s12 = smov %s727_s13 }
 0x186   : > { %p10_p7 = scmp.ge.s32.totalorder %s13_s14, 4   ;;  %s996_s13 = smov %s998_s15 }
 0x188   :  { %12 = sbr.rel (!%p10_p7) target bundleno = 2 (0x2), region = 74 }

// kernel: _lambda_.12
= control target key start
LH: loop header
LB: loop body
LE: loop exit
PB: predicated region body
PF: predicated region fallthrough
CT: control target
= control target key end

     0   :  { %s676_s12 = smov 0   ;;  %s678_s13 = smov 0   ;;  %s908_s0 = inlined_call_operand.vmem [shape: f32[32,512], index: 0, kind: input, shape index: {}]   ;;  %s909_s1 = inlined_call_operand.vmem [shape: f32[32,1], index: 1, kind: input, shape index: {}]   ;;  %s910_s2 = inlined_call_operand.vmem [shape: f32[32,1], index: 2, kind: input, shape index: {}]   ;;  %s911_s3 = inlined_call_operand.vmem [shape: bf16[32,512], index: 3, kind: output, shape index: {}]  }
   0x1   :  { %s680_s14 = smov 0  }
   0x2 LB: > { %s25_s15 = sadd.s32 1, %s648_s13  ;;  %p569_p0 = scmp.ge.s32.totalorder %s652_s14, 1  ;;  %s652_s14 = sphi %s680_s14, %s13_s14   ;;  %s648_s13 = sphi %s678_s13, %s913_s13   ;;  %s644_s12 = sphi %s676_s12, %s912_s12  }
   0x3   : > { %p27_p1 = scmp.ge.s32.totalorder %s25_s15, 2  ;;  %p150_p2 = scmp.lt.s32.totalorder %s652_s14, 3 }
   0x5   : > { %s915_s15 = smov (%p27_p1, %s25_s15), 0  ;;  %p151_p3 = pnand %p569_p0, %p150_p2 }
   0x6   : > { %p186_p4 = scmp.eq.s32.totalorder (!%p151_p3), %s644_s12, 0 }
   0x7   : > { %154 = sbr.rel (%p151_p3) target bundleno = 361 (0x169), region = 32 }
   0xc   : > { %191 = sbr.rel (!%p186_p4) target bundleno = 17 (0x11), region = 36  ;;  %vm192_vm0 = vcmask (%p186_p4), 7168   ;;  %v654_v0 = vmov (%p186_p4), 0.0  }
   0xd   : > { %193 = vst.msk [vmem:[#allocation2] sm:$0xff] (%p186_p4), %vm192_vm0, %v654_v0  ;;  %194 = vst.msk [vmem:[#allocation2 + $0x8] sm:$0xff] (%p186_p4), %vm192_vm0, %v654_v0 }
   0xe   : > { %195 = vst.msk [vmem:[#allocation2 + $0x10] sm:$0xff] (%p186_p4), %vm192_vm0, %v654_v0  ;;  %196 = vst.msk [vmem:[#allocation2 + $0x18] sm:$0xff] (%p186_p4), %vm192_vm0, %v654_v0 }
   0xf   : > { %197 = vst.msk [vmem:[#allocation3] sm:$0xff] (%p186_p4), %vm192_vm0, %v654_v0  ;;  %198 = vst.msk [vmem:[#allocation3 + $0x8] sm:$0xff] (%p186_p4), %vm192_vm0, %v654_v0 }
  0x10   : > { %199 = vst.msk [vmem:[#allocation3 + $0x10] sm:$0xff] (%p186_p4), %vm192_vm0, %v654_v0  ;;  %200 = vst.msk [vmem:[#allocation3 + $0x18] sm:$0xff] (%p186_p4), %vm192_vm0, %v654_v0 }
  0x11 PF: > { %v700_v1 = vld [vmem:[%s908_s0] sm:$0xff]  ;;  %v705_v2 = vld [vmem:[%s908_s0 + $0x8] sm:$0xff]  ;;  %v710_v3 = vld [vmem:[%s908_s0 + $0x10] sm:$0xff]  ;;  %p571_p5 = scmp.ne.s32.totalorder %s644_s12, 0 }
  0x12   : > { %v715_v4 = vld [vmem:[%s908_s0 + $0x18] sm:$0xff]  ;;  %v720_v5 = vld [vmem:[%s908_s0 + $0x20] sm:$0xff]  ;;  %v725_v6 = vld [vmem:[%s908_s0 + $0x28] sm:$0xff] }
  0x13   : > { %v730_v7 = vld [vmem:[%s908_s0 + $0x30] sm:$0xff]  ;;  %v735_v8 = vld [vmem:[%s908_s0 + $0x38] sm:$0xff]  ;;  %v740_v9 = vld [vmem:[%s908_s0 + $0x40] sm:$0xff]  ;;  %219 = sbr.rel (%p571_p5) target bundleno = 183 (0xb7), region = 40 }
  0x14   : > { %v745_v10 = vld [vmem:[%s908_s0 + $0x48] sm:$0xff]  ;;  %v750_v11 = vld [vmem:[%s908_s0 + $0x50] sm:$0xff]  ;;  %v755_v12 = vld [vmem:[%s908_s0 + $0x58] sm:$0xff] }
  0x15   : > { %v760_v13 = vld [vmem:[%s908_s0 + $0x60] sm:$0xff]  ;;  %v765_v14 = vld [vmem:[%s908_s0 + $0x68] sm:$0xff]  ;;  %v770_v15 = vld [vmem:[%s908_s0 + $0x70] sm:$0xff] }
  0x16   : > { %v775_v16 = vld [vmem:[%s908_s0 + $0x78] sm:$0xff] }
  0x18   : > { %v234_v17 = vadd.f32 %v745_v10, %v740_v9  ;;  %v224_v18 = vadd.f32 %v705_v2, %v700_v1  ;;  %v239_v19 = vadd.f32 %v765_v14, %v760_v13  ;;  %v229_v20 = vadd.f32 %v725_v6, %v720_v5  ;;  %v222_v57 = vld [vmem:[#allocation2 + $0x10] sm:$0xff]  ;;  %v220_v58 = vld [vmem:[#allocation2] sm:$0xff]  ;;  %v223_v63 = vld [vmem:[#allocation2 + $0x18] sm:$0xff] }
  0x19   : > { %v261_v21 = vmul.f32 %v720_v5, %v720_v5  ;;  %v262_v22 = vmul.f32 %v725_v6, %v725_v6  ;;  %v263_v23 = vmul.f32 %v730_v7, %v730_v7  ;;  %v257_v29 = vmul.f32 %v700_v1, %v700_v1  ;;  %v221_v0 = vld [vmem:[#allocation2 + $0x8] sm:$0xff] }
  0x1a   : > { %v235_v24 = vadd.f32 %v234_v17, %v750_v11  ;;  %v225_v25 = vadd.f32 %v224_v18, %v710_v3  ;;  %v240_v26 = vadd.f32 %v239_v19, %v770_v15  ;;  %v230_v27 = vadd.f32 %v229_v20, %v730_v7 }
  0x1b   : > { %v278_v28 = vadd.f32 %v262_v22, %v261_v21  ;;  %v258_v30 = vmul.f32 %v705_v2, %v705_v2  ;;  %v259_v31 = vmul.f32 %v710_v3, %v710_v3  ;;  %v264_v35 = vmul.f32 %v735_v8, %v735_v8  ;;  %v254_v21 = vld [vmem:[#allocation3 + $0x8] sm:$0xff]  ;;  %v253_v22 = vld [vmem:[#allocation3] sm:$0xff] }
  0x1c   : > { %v236_v32 = vadd.f32 %v235_v24, %v755_v12  ;;  %v226_v33 = vadd.f32 %v225_v25, %v715_v4  ;;  %v241_v34 = vadd.f32 %v240_v26, %v775_v16  ;;  %v231_v36 = vadd.f32 %v230_v27, %v735_v8  ;;  %v256_v27 = vld [vmem:[#allocation3 + $0x18] sm:$0xff] }
  0x1d   : > { %v279_v37 = vadd.f32 %v278_v28, %v263_v23  ;;  %v273_v38 = vadd.f32 %v258_v30, %v257_v29  ;;  %v269_v39 = vmul.f32 %v760_v13, %v760_v13  ;;  %v260_v40 = vmul.f32 %v715_v4, %v715_v4  ;;  %v255_v28 = vld [vmem:[#allocation3 + $0x10] sm:$0xff] }
  0x1e   : > { %237 = vadd.xlane.f32.xlu1 %v236_v32  ;;  %227 = vadd.xlane.f32.xlu0 %v226_v33  ;;  %v270_v41 = vmul.f32 %v765_v14, %v765_v14  ;;  %v271_v42 = vmul.f32 %v770_v15, %v770_v15  ;;  %v265_v44 = vmul.f32 %v740_v9, %v740_v9  ;;  %vm248_vm1 = vcmask 7168  }
  0x1f   : > { %v274_v43 = vadd.f32 %v273_v38, %v259_v31  ;;  %v266_v45 = vmul.f32 %v745_v10, %v745_v10  ;;  %v267_v47 = vmul.f32 %v750_v11, %v750_v11  ;;  %v280_v48 = vadd.f32 %v279_v37, %v264_v35 }
  0x20   : > { %v288_v46 = vadd.f32 %v270_v41, %v269_v39  ;;  %v272_v49 = vmul.f32 %v775_v16, %v775_v16  ;;  %v268_v53 = vmul.f32 %v755_v12, %v755_v12 }
  0x21   : > { %v283_v50 = vadd.f32 %v266_v45, %v265_v44  ;;  %v275_v51 = vadd.f32 %v274_v43, %v260_v40 }
  0x22   : > { %242 = vadd.xlane.f32.xlu1 %v241_v34  ;;  %232 = vadd.xlane.f32.xlu0 %v231_v36  ;;  %v289_v52 = vadd.f32 %v288_v46, %v271_v42 }
  0x23   : > { %v284_v54 = vadd.f32 %v283_v50, %v267_v47 }
  0x24   : > { %v290_v55 = vadd.f32 %v289_v52, %v272_v49 }
  0x25   : > { %v285_v56 = vadd.f32 %v284_v54, %v268_v53 }
  0x26   : > { %281 = vadd.xlane.f32.xlu1 %v280_v48  ;;  %276 = vadd.xlane.f32.xlu0 %v275_v51 }
  0x2a   : > { %291 = vadd.xlane.f32.xlu1 %v290_v55  ;;  %286 = vadd.xlane.f32.xlu0 %v285_v56 }
  0xa7   : > { %v238_v59 = vpop.xlane.xlu1 %237  ;;  %v228_v60 = vpop.xlane.xlu0 %227 }
  0xa8   : > { %v246_v61 = vadd.f32 %v238_v59, %v222_v57  ;;  %v244_v62 = vadd.f32 %v228_v60, %v220_v58 }
  0xaa   : > { %251 = vst.msk [vmem:[#allocation2 + $0x10] sm:$0xff] %vm248_vm1, %v246_v61  ;;  %249 = vst.msk [vmem:[#allocation2] sm:$0xff] %vm248_vm1, %v244_v62 }
  0xab   : > { %v243_v17 = vpop.xlane.xlu1 %242  ;;  %v233_v18 = vpop.xlane.xlu0 %232 }
  0xac   : > { %v247_v19 = vadd.f32 %v243_v17, %v223_v63  ;;  %v245_v20 = vadd.f32 %v233_v18, %v221_v0 }
  0xae   : > { %252 = vst.msk [vmem:[#allocation2 + $0x18] sm:$0xff] %vm248_vm1, %v247_v19  ;;  %250 = vst.msk [vmem:[#allocation2 + $0x8] sm:$0xff] %vm248_vm1, %v245_v20 }
  0xaf   : > { %v282_v23 = vpop.xlane.xlu1 %281  ;;  %v277_v24 = vpop.xlane.xlu0 %276 }
  0xb0   : > { %v294_v25 = vadd.f32 %v282_v23, %v254_v21  ;;  %v293_v26 = vadd.f32 %v277_v24, %v253_v22 }
  0xb2   : > { %298 = vst.msk [vmem:[#allocation3 + $0x8] sm:$0xff] %vm248_vm1, %v294_v25  ;;  %297 = vst.msk [vmem:[#allocation3] sm:$0xff] %vm248_vm1, %v293_v26 }
  0xb3   : > { %v292_v29 = vpop.xlane.xlu1 %291  ;;  %v287_v30 = vpop.xlane.xlu0 %286 }
  0xb4   : > { %v296_v31 = vadd.f32 %v292_v29, %v256_v27  ;;  %v295_v32 = vadd.f32 %v287_v30, %v255_v28 }
  0xb6   : > { %300 = vst.msk [vmem:[#allocation3 + $0x18] sm:$0xff] %vm248_vm1, %v296_v31  ;;  %299 = vst.msk [vmem:[#allocation3 + $0x10] sm:$0xff] %vm248_vm1, %v295_v32 }
  0xb7 PF: > { %p572_p6 = scmp.ne.s32.totalorder %s644_s12, 1 }
  0xb9   : > { %304 = sbr.rel (%p572_p6) target bundleno = 361 (0x169), region = 44 }
  0xbe   : > { %v307_v33 = vld [vmem:[#allocation2 + $0x10] sm:$0xff]  ;;  %v655_v35 = vmov 0   ;;  %v305_v38 = vld [vmem:[#allocation2] sm:$0xff]  ;;  %v308_v42 = vld [vmem:[#allocation2 + $0x18] sm:$0xff] }
  0xbf   : > { %v315_v34 = vld [vmem:[#allocation3 + $0x10] sm:$0xff]  ;;  %621 = vset.pattern.permute.xlu1 %v655_v35  ;;  %620 = vset.pattern.permute.xlu0 %v655_v35  ;;  %v311_v36 = vmul.f32 0.001953125, %v307_v33  ;;  %v313_v39 = vld [vmem:[#allocation3] sm:$0xff]  ;;  %v309_v40 = vmul.f32 0.001953125, %v305_v38  ;;  %v316_v43 = vld [vmem:[#allocation3 + $0x18] sm:$0xff]  ;;  %v312_v45 = vmul.f32 0.001953125, %v308_v42 }
  0xc0   : > { %v319_v37 = vmul.f32 0.001953125, %v315_v34  ;;  %v317_v41 = vmul.f32 0.001953125, %v313_v39  ;;  %v320_v46 = vmul.f32 0.001953125, %v316_v43  ;;  %v306_v47 = vld [vmem:[#allocation2 + $0x8] sm:$0xff]  ;;  %v339_v62 = vld [vmem:[%s909_s1 + $0x10] sm:$0xff]  ;;  %v337_v63 = vld [vmem:[%s909_s1] sm:$0xff] }
  0xc1   : > { %v323_v44 = vmul.f32 %v311_v36, %v311_v36  ;;  %v314_v48 = vld [vmem:[#allocation3 + $0x8] sm:$0xff]  ;;  %v321_v49 = vmul.f32 %v309_v40, %v309_v40  ;;  %v310_v50 = vmul.f32 0.001953125, %v306_v47  ;;  %v324_v53 = vmul.f32 %v312_v45, %v312_v45  ;;  %v340_v17 = vld [vmem:[%s909_s1 + $0x18] sm:$0xff]  ;;  %v345_v28 = vld [vmem:[%s910_s2] sm:$0xff] }
  0xc2   : > { %v318_v51 = vmul.f32 0.001953125, %v314_v48  ;;  %v338_v20 = vld [vmem:[%s909_s1 + $0x8] sm:$0xff]  ;;  %v348_v34 = vld [vmem:[%s910_s2 + $0x18] sm:$0xff]  ;;  %v347_v35 = vld [vmem:[%s910_s2 + $0x10] sm:$0xff] }
  0xc3   : > { %v327_v52 = vsub.f32 %v319_v37, %v323_v44  ;;  %v325_v54 = vsub.f32 %v317_v41, %v321_v49  ;;  %v322_v55 = vmul.f32 %v310_v50, %v310_v50  ;;  %v328_v57 = vsub.f32 %v320_v46, %v324_v53  ;;  %v346_v27 = vld [vmem:[%s910_s2 + $0x8] sm:$0xff] }
  0xc5   : > { %v331_v56 = vadd.f32 1e-05, %v327_v52  ;;  %v329_v58 = vadd.f32 1e-05, %v325_v54  ;;  %v326_v59 = vsub.f32 %v318_v51, %v322_v55  ;;  %v332_v60 = vadd.f32 1e-05, %v328_v57 }
  0xc7   : > { %622 = vrsqrt.f32 %v331_v56  ;;  %v330_v61 = vadd.f32 1e-05, %v326_v59 }
  0xc8   : > { %624 = vrsqrt.f32 %v329_v58 }
  0xc9   : > { %626 = vrsqrt.f32 %v332_v60 }
  0xca   : > { %628 = vrsqrt.f32 %v330_v61 }
  0xd4   : > { %v623_v0 = vpop.eup %622 }
  0xd5   : > { %v625_v18 = vpop.eup %624  ;;  %v343_v19 = vmul.f32 %v623_v0, %v339_v62 }
  0xd6   : > { %v627_v21 = vpop.eup %626  ;;  %v341_v22 = vmul.f32 %v625_v18, %v337_v63 }
  0xd7   : > { %v629_v23 = vpop.eup %628  ;;  %369 = vperm.xlu1 %621, %v343_v19   ;;  %v344_v24 = vmul.f32 %v627_v21, %v340_v17  ;;  %v351_v31 = vmul.f32 %v343_v19, %v311_v36 }
  0xd8   : > { %359 = vperm.xlu0 %620, %v341_v22   ;;  %v349_v25 = vmul.f32 %v341_v22, %v309_v40  ;;  %v342_v26 = vmul.f32 %v629_v23, %v338_v20 }
  0xd9   : > { %v352_v30 = vmul.f32 %v344_v24, %v312_v45  ;;  %v355_v38 = vsub.f32 %v347_v35, %v351_v31 }
  0xda   : > { %v350_v29 = vmul.f32 %v342_v26, %v310_v50  ;;  %v353_v33 = vsub.f32 %v345_v28, %v349_v25 }
  0xdb   : > { %374 = vperm.xlu1 %621, %v344_v24   ;;  %v356_v37 = vsub.f32 %v348_v34, %v352_v30 }
  0xdc   : > { %364 = vperm.xlu0 %620, %v342_v26   ;;  %v354_v32 = vsub.f32 %v346_v27, %v350_v29 }
  0xdf   : > { %400 = vperm.xlu1 %621, %v354_v32  }
  0xe0   : > { %395 = vperm.xlu0 %620, %v353_v33  }
  0xe3   : > { %410 = vperm.xlu1 %621, %v356_v37  }
  0xe4   : > { %405 = vperm.xlu0 %620, %v355_v38  }
 0x152   : > { %v370_v39 = vpop.permute.xlu1 %369 }
 0x153   : > { %v360_v40 = vpop.permute.xlu0 %359  ;;  %v385_v42 = vmul.f32 %v370_v39, %v740_v9  ;;  %v386_v43 = vmul.f32 %v370_v39, %v745_v10  ;;  %v387_v44 = vmul.f32 %v370_v39, %v750_v11  ;;  %v388_v45 = vmul.f32 %v370_v39, %v755_v12 }
 0x154   : > { %v377_v46 = vmul.f32 %v360_v40, %v700_v1  ;;  %v378_v47 = vmul.f32 %v360_v40, %v705_v2  ;;  %v379_v48 = vmul.f32 %v360_v40, %v710_v3  ;;  %v380_v49 = vmul.f32 %v360_v40, %v715_v4 }
 0x156   : > { %v375_v36 = vpop.permute.xlu1 %374 }
 0x157   : > { %v365_v41 = vpop.permute.xlu0 %364  ;;  %v389_v11 = vmul.f32 %v375_v36, %v760_v13  ;;  %v390_v12 = vmul.f32 %v375_v36, %v765_v14  ;;  %v391_v1 = vmul.f32 %v375_v36, %v770_v15  ;;  %v392_v2 = vmul.f32 %v375_v36, %v775_v16 }
 0x158   : > { %v381_v50 = vmul.f32 %v365_v41, %v720_v5  ;;  %v382_v51 = vmul.f32 %v365_v41, %v725_v6  ;;  %v383_v9 = vmul.f32 %v365_v41, %v730_v7  ;;  %v384_v10 = vmul.f32 %v365_v41, %v735_v8 }
 0x15a   : > { %v401_v52 = vpop.permute.xlu1 %400 }
 0x15b   : > { %v417_v3 = vadd.f32 %v401_v52, %v381_v50  ;;  %v418_v53 = vadd.f32 %v401_v52, %v382_v51  ;;  %v419_v4 = vadd.f32 %v401_v52, %v383_v9  ;;  %v420_v54 = vadd.f32 %v401_v52, %v384_v10  ;;  %v396_v5 = vpop.permute.xlu0 %395 }
 0x15c   : > { %v413_v55 = vadd.f32 %v396_v5, %v377_v46  ;;  %v414_v6 = vadd.f32 %v396_v5, %v378_v47  ;;  %v415_v56 = vadd.f32 %v396_v5, %v379_v48  ;;  %v416_v7 = vadd.f32 %v396_v5, %v380_v49 }
 0x15d   : > { %v433_v57 = vmax.f32 %v417_v3, 0.0  ;;  %v434_v8 = vmax.f32 %v418_v53, 0.0  ;;  %v435_v58 = vmax.f32 %v419_v4, 0.0  ;;  %v436_v59 = vmax.f32 %v420_v54, 0.0 }
 0x15e   : > { %v429_v13 = vmax.f32 %v413_v55, 0.0  ;;  %v430_v60 = vmax.f32 %v414_v6, 0.0  ;;  %v431_v14 = vmax.f32 %v415_v56, 0.0  ;;  %v432_v61 = vmax.f32 %v416_v7, 0.0  ;;  %v411_v15 = vpop.permute.xlu1 %410 }
 0x15f   : > { %v588_v62 = vpack.c.bf16 %v434_v8, %v433_v57  ;;  %v589_v16 = vpack.c.bf16 %v436_v59, %v435_v58  ;;  %v425_v63 = vadd.f32 %v411_v15, %v389_v11  ;;  %v426_v0 = vadd.f32 %v411_v15, %v390_v12  ;;  %v406_v17 = vpop.permute.xlu0 %405 }
 0x160   : > { %v586_v18 = vpack.c.bf16 %v430_v60, %v429_v13  ;;  %v587_v19 = vpack.c.bf16 %v432_v61, %v431_v14  ;;  %v427_v20 = vadd.f32 %v411_v15, %v391_v1  ;;  %v428_v21 = vadd.f32 %v411_v15, %v392_v2 }
 0x161   : > { %495 = vst [vmem:[%s911_s3 + $0x10] sm:$0xff] %v588_v62  ;;  %496 = vst [vmem:[%s911_s3 + $0x18] sm:$0xff] %v589_v16  ;;  %v441_v22 = vmax.f32 %v425_v63, 0.0  ;;  %v442_v23 = vmax.f32 %v426_v0, 0.0  ;;  %v421_v24 = vadd.f32 %v406_v17, %v385_v42  ;;  %v422_v25 = vadd.f32 %v406_v17, %v386_v43 }
 0x162   : > { %493 = vst [vmem:[%s911_s3] sm:$0xff] %v586_v18  ;;  %494 = vst [vmem:[%s911_s3 + $0x8] sm:$0xff] %v587_v19  ;;  %v443_v26 = vmax.f32 %v427_v20, 0.0  ;;  %v444_v27 = vmax.f32 %v428_v21, 0.0  ;;  %v423_v28 = vadd.f32 %v406_v17, %v387_v44  ;;  %v424_v29 = vadd.f32 %v406_v17, %v388_v45 }
 0x163   : > { %v592_v30 = vpack.c.bf16 %v442_v23, %v441_v22  ;;  %v437_v31 = vmax.f32 %v421_v24, 0.0  ;;  %v438_v32 = vmax.f32 %v422_v25, 0.0 }
 0x164   : > { %v593_v33 = vpack.c.bf16 %v444_v27, %v443_v26  ;;  %v439_v34 = vmax.f32 %v423_v28, 0.0  ;;  %v440_v35 = vmax.f32 %v424_v29, 0.0 }
 0x165   : > { %499 = vst [vmem:[%s911_s3 + $0x30] sm:$0xff] %v592_v30  ;;  %v590_v37 = vpack.c.bf16 %v438_v32, %v437_v31 }
 0x166   : > { %500 = vst [vmem:[%s911_s3 + $0x38] sm:$0xff] %v593_v33  ;;  %v591_v38 = vpack.c.bf16 %v440_v35, %v439_v34 }
 0x167   : > { %497 = vst [vmem:[%s911_s3 + $0x20] sm:$0xff] %v590_v37 }
 0x168   : > { %498 = vst [vmem:[%s911_s3 + $0x28] sm:$0xff] %v591_v38 }
 0x169 PF: > { %s13_s14 = sadd.s32 1, %s652_s14   ;;  %s912_s12 = smov %s648_s13 }
 0x16a   : > { %p10_p7 = scmp.ge.s32.totalorder %s13_s14, 4   ;;  %s913_s13 = smov %s915_s15 }
 0x16c   :  { %12 = sbr.rel (!%p10_p7) target bundleno = 2 (0x2), region = 74 }

// kernel: _lambda_.11
= control target key start
LH: loop header
LB: loop body
LE: loop exit
PB: predicated region body
PF: predicated region fallthrough
CT: control target
= control target key end

     0   :  { %v1334_v1 = vmov 0   ;;  %vm647_vm0 = vcmask 523264   ;;  %s1810_s1 = inlined_call_operand.vmem [shape: bf16[576,128], index: 1, kind: input, shape index: {}]   ;;  %s1811_s0 = inlined_call_operand.vmem [shape: bf16[128,576], index: 0, kind: input, shape index: {}]   ;;  %s1812_s2 = inlined_call_operand.vmem [shape: f32[128,1], index: 2, kind: input, shape index: {}]   ;;  %s1813_s3 = inlined_call_operand.vmem [shape: f32[128,128], index: 3, kind: output, shape index: {}]  }
   0x1   :  { %v1242_v0 = vld [vmem:[%s1810_s1 + $0x78] sm:$0xff]   ;;  %1240 = vset.pattern.permute.xlu0 %v1334_v1  ;;  %1241 = vset.pattern.permute.xlu1 %v1334_v1  ;;  %v1246_v5 = vld [vmem:[%s1810_s1 + $0x70] sm:$0xff]   ;;  %v1250_v9 = vld [vmem:[%s1810_s1 + $0x68] sm:$0xff]  }
   0x2   :  { %v1243_v2 = vld [vmem:[%s1810_s1 + $0xf8] sm:$0xff]   ;;  %1067 = vmatprep.subr.bf16.mxu0 %v1242_v0  ;;  %v1247_v6 = vld [vmem:[%s1810_s1 + $0xf0] sm:$0xff]   ;;  %v1251_v10 = vld [vmem:[%s1810_s1 + $0xe8] sm:$0xff]  }
   0x3   :  { %v1244_v3 = vld [vmem:[%s1810_s1 + $0x38] sm:$0xff]   ;;  %1131 = vmatprep.subr.bf16.mxu1 %v1243_v2  ;;  %v1248_v7 = vld [vmem:[%s1810_s1 + $0x30] sm:$0xff]   ;;  %v1252_v11 = vld [vmem:[%s1810_s1 + $0x28] sm:$0xff]  }
   0x4   :  { %v1245_v4 = vld [vmem:[%s1810_s1 + $0xb8] sm:$0xff]   ;;  %1068 = vmatpush3.bf16.msra.mxu0 %v1244_v3  ;;  %v1249_v8 = vld [vmem:[%s1810_s1 + $0xb0] sm:$0xff]   ;;  %v1253_v12 = vld [vmem:[%s1810_s1 + $0xa8] sm:$0xff]  }
   0x5   :  { %1132 = vmatpush3.bf16.msra.mxu1 %v1245_v4  ;;  %1069 = vmatprep.subr.bf16.mxu0 %v1246_v5  ;;  %v1254_v13 = vld [vmem:[%s1810_s1 + $0x60] sm:$0xff]   ;;  %v1258_v17 = vld [vmem:[%s1810_s1 + $0x58] sm:$0xff]   ;;  %v1262_v21 = vld [vmem:[%s1810_s1 + $0x50] sm:$0xff]  }
   0x6   :  { %1133 = vmatprep.subr.bf16.mxu1 %v1247_v6  ;;  %v1255_v14 = vld [vmem:[%s1810_s1 + $0xe0] sm:$0xff]   ;;  %v1259_v18 = vld [vmem:[%s1810_s1 + $0xd8] sm:$0xff]   ;;  %v1263_v22 = vld [vmem:[%s1810_s1 + $0xd0] sm:$0xff]  }
   0x7   :  { %v1256_v15 = vld [vmem:[%s1810_s1 + $0x20] sm:$0xff]   ;;  %v1260_v19 = vld [vmem:[%s1810_s1 + $0x18] sm:$0xff]   ;;  %v1264_v23 = vld [vmem:[%s1810_s1 + $0x10] sm:$0xff]  }
   0x8   :  { %1070 = vmatpush3.bf16.msra.mxu0 %v1248_v7  ;;  %v1257_v16 = vld [vmem:[%s1810_s1 + $0xa0] sm:$0xff]   ;;  %v1261_v20 = vld [vmem:[%s1810_s1 + $0x98] sm:$0xff]   ;;  %v1265_v24 = vld [vmem:[%s1810_s1 + $0x90] sm:$0xff]  }
   0x9   :  { %1134 = vmatpush3.bf16.msra.mxu1 %v1249_v8  ;;  %1071 = vmatprep.subr.bf16.mxu0 %v1250_v9  ;;  %v1266_v25 = vld [vmem:[%s1810_s1 + $0x48] sm:$0xff]   ;;  %v1270_v29 = vld [vmem:[%s1810_s1 + $0x40] sm:$0xff]   ;;  %v1280_v37 = vld [vmem:[%s1810_s1 + $0x118] sm:$0xff]  }
   0xa   :  { %1135 = vmatprep.subr.bf16.mxu1 %v1251_v10  ;;  %v1267_v26 = vld [vmem:[%s1810_s1 + $0xc8] sm:$0xff]   ;;  %v1271_v30 = vld [vmem:[%s1810_s1 + $0xc0] sm:$0xff]   ;;  %v1293_v43 = vld [vmem:[%s1810_s1 + $0x110] sm:$0xff]  }
   0xb   :  { %v1268_v27 = vld [vmem:[%s1810_s1 + $0x8] sm:$0xff]   ;;  %v1272_v31 = vld [vmem:[%s1810_s1] sm:$0xff]   ;;  %v1289_v44 = vld [vmem:[%s1811_s0 + $0x5c] ss:$20 sps:$4 sm:$0xff]  }
   0xc   :  { %1072 = vmatpush3.bf16.msra.mxu0 %v1252_v11  ;;  %v1269_v28 = vld [vmem:[%s1810_s1 + $0x88] sm:$0xff]   ;;  %v1273_v32 = vld [vmem:[%s1810_s1 + $0x80] sm:$0xff]   ;;  %v1294_v48 = vld [vmem:[%s1811_s0 + $0x7c] ss:$20 sps:$4 sm:$0xff]  }
   0xd   :  { %1136 = vmatpush3.bf16.msra.mxu1 %v1253_v12  ;;  %1073 = vmatprep.subr.bf16.mxu0 %v1254_v13  ;;  %v1274_v33 = vld [vmem:[%s1811_s0] ss:$20 sps:$4 sm:$0xff]   ;;  %v1276_v34 = vld [vmem:[%s1811_s0 + $0x4] ss:$20 sps:$4 sm:$0xff]   ;;  %v1277_v35 = vld [vmem:[%s1811_s0 + $0x8] ss:$20 sps:$4 sm:$0xff]  }
   0xe   :  { %1137 = vmatprep.subr.bf16.mxu1 %v1255_v14  ;;  %v1279_v36 = vld [vmem:[%s1811_s0 + $0xc] ss:$20 sps:$4 sm:$0xff]   ;;  %704 = vmatprep.mubr.bf16.mxu0 %v1276_v34  ;;  %v1283_v39 = vld [vmem:[%s1811_s0 + $0x34] ss:$20 sps:$4 sm:$0xff]   ;;  %v1286_v41 = vld [vmem:[%s1811_s0 + $0x30] ss:$20 sps:$4 sm:$0xff]  }
   0xf   :  { %801 = vmatprep.mubr.bf16.mxu1 %v1279_v36  ;;  %v1281_v38 = vld [vmem:[%s1811_s0 + $0x2c] ss:$20 sps:$4 sm:$0xff]   ;;  %v1285_v40 = vld [vmem:[%s1811_s0 + $0x28] ss:$20 sps:$4 sm:$0xff]   ;;  %v1291_v45 = vld [vmem:[%s1811_s0 + $0x50] ss:$20 sps:$4 sm:$0xff]  }
  0x10   :  { %1074 = vmatpush3.bf16.msra.mxu0 %v1256_v15  ;;  %v1287_v42 = vld [vmem:[%s1811_s0 + $0x54] ss:$20 sps:$4 sm:$0xff]   ;;  %v1292_v46 = vld [vmem:[%s1811_s0 + $0x58] ss:$20 sps:$4 sm:$0xff]   ;;  %v1319_v50 = vld [vmem:[%s1810_s1 + $0x100] sm:$0xff]  }
  0x11   :  { %1138 = vmatpush3.bf16.msra.mxu1 %v1257_v16  ;;  %1075 = vmatprep.subr.bf16.mxu0 %v1258_v17  ;;  %v1306_v47 = vld [vmem:[%s1810_s1 + $0x108] sm:$0xff]   ;;  %v1296_v49 = vld [vmem:[%s1811_s0 + $0x84] ss:$20 sps:$4 sm:$0xff]   ;;  %v1299_v52 = vld [vmem:[%s1811_s0 + $0x80] ss:$20 sps:$4 sm:$0xff]  }
  0x12   :  { %1139 = vmatprep.subr.bf16.mxu1 %v1259_v18  ;;  %v1298_v51 = vld [vmem:[%s1811_s0 + $0x78] ss:$20 sps:$4 sm:$0xff]   ;;  %v1304_v55 = vld [vmem:[%s1811_s0 + $0xa0] ss:$20 sps:$4 sm:$0xff]   ;;  %v1305_v56 = vld [vmem:[%s1811_s0 + $0xa8] ss:$20 sps:$4 sm:$0xff]  }
  0x13   :  { %v1300_v53 = vld [vmem:[%s1811_s0 + $0xa4] ss:$20 sps:$4 sm:$0xff]   ;;  %v1302_v54 = vld [vmem:[%s1811_s0 + $0xac] ss:$20 sps:$4 sm:$0xff]   ;;  %v1309_v59 = vld [vmem:[%s1811_s0 + $0xd4] ss:$20 sps:$4 sm:$0xff]  }
  0x14   :  { %1076 = vmatpush3.bf16.msra.mxu0 %v1260_v19  ;;  %v1307_v57 = vld [vmem:[%s1811_s0 + $0xcc] ss:$20 sps:$4 sm:$0xff]   ;;  %v137_v60 = vld [vmem:[%s1812_s2 + $0x10] sm:$0xff]  ;;  %v138_v62 = vld [vmem:[%s1812_s2 + $0x18] sm:$0xff] }
  0x15   :  { %1140 = vmatpush3.bf16.msra.mxu1 %v1261_v20  ;;  %1077 = vmatprep.subr.bf16.mxu0 %v1262_v21  ;;  %v135_v58 = vld [vmem:[%s1812_s2] sm:$0xff]  ;;  %v136_v61 = vld [vmem:[%s1812_s2 + $0x8] sm:$0xff]  ;;  %v1315_v4 = vld [vmem:[%s1811_s0 + $0xfc] ss:$20 sps:$4 sm:$0xff]  }
  0x16   :  { %1141 = vmatprep.subr.bf16.mxu1 %v1263_v22  ;;  %153 = vperm.xlu0 %1240, %v135_v58   ;;  %v139_v63 = vld [vmem:[%s1812_s2 + $0x20] sm:$0xff]  ;;  %v1311_v0 = vld [vmem:[%s1811_s0 + $0xc8] ss:$20 sps:$4 sm:$0xff]   ;;  %v141_v5 = vld [vmem:[%s1812_s2 + $0x30] sm:$0xff] }
  0x17   :  { %163 = vperm.xlu1 %1241, %v137_v60   ;;  %v140_v1 = vld [vmem:[%s1812_s2 + $0x28] sm:$0xff]  ;;  %v1312_v2 = vld [vmem:[%s1811_s0 + $0xd0] ss:$20 sps:$4 sm:$0xff]   ;;  %v142_v6 = vld [vmem:[%s1812_s2 + $0x38] sm:$0xff] }
  0x18   :  { %1078 = vmatpush3.bf16.msra.mxu0 %v1264_v23  ;;  %v1313_v3 = vld [vmem:[%s1811_s0 + $0xf4] ss:$20 sps:$4 sm:$0xff]   ;;  %v143_v7 = vld [vmem:[%s1812_s2 + $0x40] sm:$0xff]  ;;  %v1318_v10 = vld [vmem:[%s1811_s0 + $0xf8] ss:$20 sps:$4 sm:$0xff]  }
  0x19   :  { %1142 = vmatpush3.bf16.msra.mxu1 %v1265_v24  ;;  %1079 = vmatprep.subr.bf16.mxu0 %v1266_v25  ;;  %v1317_v8 = vld [vmem:[%s1811_s0 + $0xf0] ss:$20 sps:$4 sm:$0xff]   ;;  %v144_v9 = vld [vmem:[%s1812_s2 + $0x48] sm:$0xff]  ;;  %v146_v14 = vld [vmem:[%s1812_s2 + $0x58] sm:$0xff] }
  0x1a   :  { %1143 = vmatprep.subr.bf16.mxu1 %v1267_v26  ;;  %158 = vperm.xlu0 %1240, %v136_v61   ;;  %v1320_v11 = vld [vmem:[%s1811_s0 + $0x11c] ss:$20 sps:$4 sm:$0xff]   ;;  %v1322_v12 = vld [vmem:[%s1811_s0 + $0x124] ss:$20 sps:$4 sm:$0xff]   ;;  %v148_v17 = vld [vmem:[%s1812_s2 + $0x68] sm:$0xff] }
  0x1b   :  { %168 = vperm.xlu1 %1241, %v138_v62   ;;  %v145_v13 = vld [vmem:[%s1812_s2 + $0x50] sm:$0xff]  ;;  %v147_v15 = vld [vmem:[%s1812_s2 + $0x60] sm:$0xff]  ;;  %v1324_v16 = vld [vmem:[%s1811_s0 + $0x118] ss:$20 sps:$4 sm:$0xff]  }
  0x1c   :  { %1080 = vmatpush3.bf16.msra.mxu0 %v1268_v27  ;;  %v1325_v18 = vld [vmem:[%s1811_s0 + $0x120] ss:$20 sps:$4 sm:$0xff]   ;;  %v1326_v19 = vld [vmem:[%s1811_s0 + $0x10] ss:$20 sps:$4 sm:$0xff]   ;;  %v150_v22 = vld [vmem:[%s1812_s2 + $0x78] sm:$0xff] }
  0x1d   :  { %1144 = vmatpush3.bf16.msra.mxu1 %v1269_v28  ;;  %1081 = vmatprep.subr.bf16.mxu0 %v1270_v29  ;;  %v1327_v20 = vld [vmem:[%s1811_s0 + $0xb0] ss:$20 sps:$4 sm:$0xff]   ;;  %v1328_v23 = vld [vmem:[%s1811_s0 + $0x38] ss:$20 sps:$4 sm:$0xff]   ;;  %v1330_v25 = vld [vmem:[%s1811_s0 + $0x60] ss:$20 sps:$4 sm:$0xff]  }
  0x1e   :  { %1145 = vmatprep.subr.bf16.mxu1 %v1271_v30  ;;  %173 = vperm.xlu0 %1240, %v139_v63   ;;  %v149_v21 = vld [vmem:[%s1812_s2 + $0x70] sm:$0xff]  ;;  %v1329_v24 = vld [vmem:[%s1811_s0 + $0xd8] ss:$20 sps:$4 sm:$0xff]   ;;  %v1332_v27 = vld [vmem:[%s1811_s0 + $0x88] ss:$20 sps:$4 sm:$0xff]  }
  0x1f   :  { %178 = vperm.xlu1 %1241, %v140_v1   ;;  %v1331_v26 = vld [vmem:[%s1811_s0 + $0x100] ss:$20 sps:$4 sm:$0xff]   ;;  %v1333_v28 = vld [vmem:[%s1811_s0 + $0x128] ss:$20 sps:$4 sm:$0xff]  }
  0x20   :  { %1082 = vmatpush3.bf16.msra.mxu0 %v1272_v31 }
  0x21   :  { %1146 = vmatpush3.bf16.msra.mxu1 %v1273_v32  ;;  %1207 = vmatprep.subr.bf16.mxu0 %v1280_v37 }
  0x22   :  { %1231 = vmatprep.subr.bf16.mxu1 %v1280_v37  ;;  %183 = vperm.xlu0 %1240, %v141_v5  }
  0x23   :  { %705 = vmatmul.mubr.bf16.vlgmr.msra.gmra.mxu0 %v1274_v33  ;;  %188 = vperm.xlu1 %1241, %v142_v6  }
  0x24   :  { %802 = vmatmul.mubr.bf16.vlgmr.msra.gmra.mxu1 %v1277_v35  ;;  %1208 = vmatpush3.bf16.msra.mxu0 %v1280_v37 }
  0x25   :  { %1235 = vmatpush3.bf16.msra.mxu1 %v1280_v37  ;;  %712 = vmatprep.mubr.bf16.mxu0 %v1281_v38 }
  0x26   :  { %809 = vmatprep.mubr.bf16.mxu1 %v1283_v39  ;;  %1209 = vmatprep.subr.bf16.mxu0 %v1293_v43 }
  0x27   :  { %1232 = vmatprep.subr.bf16.mxu1 %v1293_v43  ;;  %193 = vperm.xlu0 %1240, %v143_v7  }
  0x28   :  { %1210 = vmatpush3.bf16.msra.mxu0 %v1293_v43  ;;  %198 = vperm.xlu1 %1241, %v144_v9  }
  0x29   :  { %1236 = vmatpush3.bf16.msra.mxu1 %v1293_v43  ;;  %1211 = vmatprep.subr.bf16.mxu0 %v1306_v47 }
  0x2a   :  { %1233 = vmatprep.subr.bf16.mxu1 %v1306_v47 }
  0x2b   :  { %713 = vmatmul.mubr.bf16.gmra.mxu0 %v1285_v40  ;;  %203 = vperm.xlu0 %1240, %v145_v13  }
  0x2c   :  { %810 = vmatmul.mubr.bf16.gmra.mxu1 %v1286_v41  ;;  %720 = vmatprep.mubr.bf16.mxu0 %v1287_v42 }
  0x2d   :  { %817 = vmatprep.mubr.bf16.mxu1 %v1289_v44  ;;  %1212 = vmatpush3.bf16.msra.mxu0 %v1306_v47 }
  0x2e   :  { %1237 = vmatpush3.bf16.msra.mxu1 %v1306_v47  ;;  %1213 = vmatprep.subr.bf16.mxu0 %v1319_v50 }
  0x2f   :  { %1234 = vmatprep.subr.bf16.mxu1 %v1319_v50  ;;  %208 = vperm.xlu1 %1241, %v146_v14  }
  0x30   :  { %213 = vperm.xlu0 %1240, %v147_v15  }
  0x31   :  { %1214 = vmatpush3.bf16.msra.mxu0 %v1319_v50 }
  0x32   :  { %1238 = vmatpush3.bf16.msra.mxu1 %v1319_v50 }
  0x33   :  { %721 = vmatmul.mubr.bf16.gmra.mxu0 %v1291_v45  ;;  %218 = vperm.xlu1 %1241, %v148_v17  }
  0x34   :  { %818 = vmatmul.mubr.bf16.gmra.mxu1 %v1292_v46  ;;  %728 = vmatprep.mubr.bf16.mxu0 %v1294_v48 }
  0x35   :  { %825 = vmatprep.mubr.bf16.mxu1 %v1296_v49  ;;  %223 = vperm.xlu0 %1240, %v149_v21  }
  0x37   :  { %228 = vperm.xlu1 %1241, %v150_v22  }
  0x3b   :  { %729 = vmatmul.mubr.bf16.gmra.mxu0 %v1298_v51 }
  0x3c   :  { %826 = vmatmul.mubr.bf16.gmra.mxu1 %v1299_v52  ;;  %736 = vmatprep.mubr.bf16.mxu0 %v1300_v53 }
  0x3d   :  { %833 = vmatprep.mubr.bf16.mxu1 %v1302_v54 }
  0x43   :  { %737 = vmatmul.mubr.bf16.gmra.mxu0 %v1304_v55 }
  0x44   :  { %834 = vmatmul.mubr.bf16.gmra.mxu1 %v1305_v56  ;;  %744 = vmatprep.mubr.bf16.mxu0 %v1307_v57 }
  0x45   :  { %841 = vmatprep.mubr.bf16.mxu1 %v1309_v59 }
  0x4b   :  { %745 = vmatmul.mubr.bf16.gmra.mxu0 %v1311_v0 }
  0x4c   :  { %842 = vmatmul.mubr.bf16.gmra.mxu1 %v1312_v2  ;;  %752 = vmatprep.mubr.bf16.mxu0 %v1313_v3 }
  0x4d   :  { %849 = vmatprep.mubr.bf16.mxu1 %v1315_v4 }
  0x53   :  { %753 = vmatmul.mubr.bf16.gmra.mxu0 %v1317_v8 }
  0x54   :  { %850 = vmatmul.mubr.bf16.gmra.mxu1 %v1318_v10  ;;  %760 = vmatprep.mubr.bf16.mxu0 %v1320_v11 }
  0x55   :  { %857 = vmatprep.mubr.bf16.mxu1 %v1322_v12 }
  0x5b   :  { %761 = vmatmul.mubr.bf16.gmra.mxu0 %v1324_v16 }
  0x5c   :  { %858 = vmatmul.mubr.bf16.gmra.mxu1 %v1325_v18  ;;  %1215 = vmatprep.mubr.msk.bf16.mxu0 %vm647_vm0, %v1326_v19 }
  0x5d   :  { %1223 = vmatprep.mubr.msk.bf16.mxu1 %vm647_vm0, %v1327_v20 }
  0x63   :  { %1216 = vmatmul.mubr.msk.bf16.vlgmr.msra.gmra.mxu0 %vm647_vm0, %v1328_v23 }
  0x64   :  { %1224 = vmatmul.mubr.msk.bf16.vlgmr.msra.gmra.mxu1 %vm647_vm0, %v1329_v24  ;;  %1219 = vmatprep.mubr.msk.bf16.mxu0 %vm647_vm0, %v1330_v25 }
  0x65   :  { %1227 = vmatprep.mubr.msk.bf16.mxu1 %vm647_vm0, %v1331_v26 }
  0x6b   :  { %1220 = vmatmul.mubr.msk.bf16.gmra.mxu0 %vm647_vm0, %v1332_v27 }
  0x6c   :  { %1228 = vmatmul.mubr.msk.bf16.gmra.mxu1 %vm647_vm0, %v1333_v28 }
  0x91   :  { %v154_v60 = vpop.permute.xlu0 %153 }
  0x92   :  { %v164_v63 = vpop.permute.xlu1 %163 }
  0x95   :  { %v159_v4 = vpop.permute.xlu0 %158 }
  0x96   :  { %v169_v7 = vpop.permute.xlu1 %168 }
  0x99   :  { %v174_v10 = vpop.permute.xlu0 %173 }
  0x9a   :  { %v1697_v13 = vpop.permute.xlu1 %178 }
  0x9b   :  { %1825 = vst [vmem:[#allocation13_spill] sm:$0xff] %v1697_v13 }
  0x9d   :  { %v1699_v16 = vpop.permute.xlu0 %183 }
  0x9e   :  { %v1701_v19 = vpop.permute.xlu1 %188 }
  0x9f   :  { %1826 = vst [vmem:[#allocation14_spill] sm:$0xff] %v1701_v19 }
  0xa2   :  { %v194_v22 = vpop.permute.xlu0 %193 }
  0xa3   :  { %v199_v27 = vpop.permute.xlu1 %198 }
  0xa6   :  { %v204_v13 = vpop.permute.xlu0 %203 }
  0xe3   :  { %v1639_v29 = vpop.f32.mrf.mxu0 }
  0xe4   :  { %v1641_v30 = vpop.f32.mrf.mxu1 }
  0xe5   :  { %v1084_v31 = vpop.f32.mrf.mxu0 }
  0xe6   :  { %v1643_v32 = vpop.f32.mrf.mxu1 }
  0xe7   :  { %v1086_v33 = vpop.f32.mrf.mxu0 }
  0xe8   :  { %v1645_v34 = vpop.f32.mrf.mxu1 }
  0xe9   :  { %v1087_v35 = vpop.f32.mrf.mxu0 }
  0xea   :  { %v1647_v36 = vpop.f32.mrf.mxu1 }
  0xeb   :  { %v1089_v37 = vpop.f32.mrf.mxu0 }
  0xec   :  { %v1649_v38 = vpop.f32.mrf.mxu1 }
  0xed   :  { %v1090_v39 = vpop.f32.mrf.mxu0 }
  0xee   :  { %v1651_v40 = vpop.f32.mrf.mxu1 }
  0xef   :  { %v1092_v41 = vpop.f32.mrf.mxu0 }
  0xf0   :  { %v1653_v42 = vpop.f32.mrf.mxu1 }
  0xf1   :  { %v1093_v43 = vpop.f32.mrf.mxu0 }
  0xf2   :  { %v1655_v44 = vpop.f32.mrf.mxu1 }
  0xf3   :  { %v1657_v45 = vpop.f32.mrf.mxu0 }
  0xf4   :  { %v1659_v46 = vpop.f32.mrf.mxu1 }
  0xf5   :  { %1814 = vst [vmem:[#allocation2_spill] sm:$0xff] %v1659_v46  ;;  %v1661_v47 = vpop.f32.mrf.mxu0 }
  0xf6   :  { %v1663_v48 = vpop.f32.mrf.mxu1 }
  0xf7   :  { %1815 = vst [vmem:[#allocation3_spill] sm:$0xff] %v1663_v48  ;;  %v1665_v49 = vpop.f32.mrf.mxu0 }
  0xf8   :  { %1816 = vst [vmem:[#allocation4_spill] sm:$0xff] %v1665_v49  ;;  %v1667_v50 = vpop.f32.mrf.mxu1 }
  0xf9   :  { %1817 = vst [vmem:[#allocation5_spill] sm:$0xff] %v1667_v50  ;;  %v1669_v51 = vpop.f32.mrf.mxu0 }
  0xfa   :  { %1818 = vst [vmem:[#allocation6_spill] sm:$0xff] %v1669_v51  ;;  %v1671_v52 = vpop.f32.mrf.mxu1 }
  0xfb   :  { %1819 = vst [vmem:[#allocation7_spill] sm:$0xff] %v1671_v52  ;;  %v1673_v53 = vpop.f32.mrf.mxu0  ;;  %v1085_v52 = vadd.f32 %v1084_v31, %v1639_v29  ;;  %v1149_v29 = vadd.f32 %v1643_v32, %v1641_v30  ;;  %v1152_v31 = vadd.f32 %v1647_v36, %v1645_v34  ;;  %v1158_v34 = vadd.f32 %v1655_v44, %v1653_v42 }
  0xfc   :  { %v1675_v54 = vpop.f32.mrf.mxu1 }
  0xfd   :  { %1820 = vst [vmem:[#allocation8_spill] sm:$0xff] %v1675_v54  ;;  %v1677_v55 = vpop.f32.mrf.mxu0 }
  0xfe   :  { %v1679_v56 = vpop.f32.mrf.mxu1  ;;  %v1103_v36 = vadd.f32 %v1677_v55, %v1673_v53 }
  0xff   :  { %1821 = vst [vmem:[#allocation9_spill] sm:$0xff] %v1679_v56  ;;  %v1681_v57 = vpop.f32.mrf.mxu0 }
 0x100   :  { %v1683_v58 = vpop.f32.mrf.mxu1 }
 0x101   :  { %1822 = vst [vmem:[#allocation10_spill] sm:$0xff] %v1683_v58  ;;  %v1685_v59 = vpop.f32.mrf.mxu0  ;;  %v1091_v58 = vadd.f32 %v1090_v39, %v1089_v37  ;;  %v1155_v39 = vadd.f32 %v1651_v40, %v1649_v38 }
 0x102   :  { %v1687_v61 = vpop.f32.mrf.mxu1 }
 0x103   :  { %1823 = vst [vmem:[#allocation11_spill] sm:$0xff] %v1687_v61  ;;  %v1107_v62 = vpop.f32.mrf.mxu0  ;;  %v1088_v61 = vadd.f32 %v1087_v35, %v1086_v33  ;;  %v715_v49 = vadd.f32 %v1091_v58, %v164_v63  ;;  %v214_v58 = vpop.permute.xlu0 %213 }
 0x104   :  { %v1689_v0 = vpop.f32.mrf.mxu1 }
 0x105   :  { %v1108_v1 = vpop.f32.mrf.mxu0  ;;  %v710_v51 = vadd.f32 %v1088_v61, %v159_v4  ;;  %v812_v38 = vadd.f32 %v1155_v39, %v715_v49  ;;  %v731_v49 = vadd.f32 %v1103_v36, %v1699_v16 }
 0x106   :  { %v1691_v2 = vpop.f32.mrf.mxu1  ;;  %v1109_v54 = vadd.f32 %v1108_v1, %v1107_v62 }
 0x107   :  { %v1110_v3 = vpop.f32.mrf.mxu0  ;;  %v807_v40 = vadd.f32 %v1152_v31, %v710_v51  ;;  %v1106_v51 = vadd.f32 %v1685_v59, %v1681_v57  ;;  %v1832_v57 = vld [vmem:[#allocation4_spill] sm:$0xff]  ;;  %v1833_v59 = vld [vmem:[#allocation6_spill] sm:$0xff] }
 0x108   :  { %v1693_v5 = vpop.f32.mrf.mxu1  ;;  %v739_v61 = vadd.f32 %v1109_v54, %v194_v22 }
 0x109   :  { %v1111_v6 = vpop.f32.mrf.mxu0 }
 0x10a   :  { %v1695_v8 = vpop.f32.mrf.mxu1 }
 0x10b   :  { %1824 = vst [vmem:[#allocation12_spill] sm:$0xff] %v1695_v8  ;;  %v1113_v9 = vpop.f32.mrf.mxu0 }
 0x10c   :  { %v1177_v11 = vpop.f32.mrf.mxu1 }
 0x10d   :  { %v1114_v12 = vpop.f32.mrf.mxu0 }
 0x10e   :  { %v1178_v14 = vpop.f32.mrf.mxu1  ;;  %v1115_v48 = vadd.f32 %v1114_v12, %v1113_v9 }
 0x10f   :  { %v1116_v15 = vpop.f32.mrf.mxu0  ;;  %v1179_v62 = vadd.f32 %v1178_v14, %v1177_v11 }
 0x110   :  { %v1180_v17 = vpop.f32.mrf.mxu1  ;;  %v747_v33 = vadd.f32 %v1115_v48, %v204_v13 }
 0x111   :  { %v1117_v18 = vpop.f32.mrf.mxu0 }
 0x112   :  { %v1181_v20 = vpop.f32.mrf.mxu1  ;;  %v1118_v35 = vadd.f32 %v1117_v18, %v1116_v15  ;;  %v844_v54 = vadd.f32 %v1179_v62, %v747_v33 }
 0x113   :  { %v1119_v21 = vpop.f32.mrf.mxu0  ;;  %v1182_v44 = vadd.f32 %v1181_v20, %v1180_v17  ;;  %v1100_v20 = vadd.f32 %v1833_v59, %v1832_v57 }
 0x114   :  { %v1703_v23 = vpop.f32.mrf.mxu1 }
 0x115   :  { %1827 = vst [vmem:[#allocation15_spill] sm:$0xff] %v1703_v23  ;;  %v1120_v24 = vpop.f32.mrf.mxu0  ;;  %v1094_v23 = vadd.f32 %v1093_v43, %v1092_v41  ;;  %v1097_v43 = vadd.f32 %v1661_v47, %v1657_v45  ;;  %v1173_v45 = vadd.f32 %v1691_v2, %v1689_v0  ;;  %v224_v2 = vpop.permute.xlu0 %223 }
 0x116   :  { %v1705_v25 = vpop.f32.mrf.mxu1  ;;  %v1121_v11 = vadd.f32 %v1120_v24, %v1119_v21  ;;  %v1835_v21 = vld [vmem:[#allocation9_spill] sm:$0xff] }
 0x117   :  { %1828 = vst [vmem:[#allocation16_spill] sm:$0xff] %v1705_v25  ;;  %v1707_v26 = vpop.f32.mrf.mxu0  ;;  %v707_v25 = vadd.f32 %v1085_v52, %v154_v60  ;;  %v718_v41 = vadd.f32 %v1094_v23, %v169_v7  ;;  %v1112_v52 = vadd.f32 %v1111_v6, %v1110_v3  ;;  %v723_v3 = vadd.f32 %v1097_v43, %v174_v10 }
 0x118   :  { %1829 = vst [vmem:[#allocation17_spill] sm:$0xff] %v1707_v26  ;;  %v1709_v28 = vpop.f32.mrf.mxu1  ;;  %v836_v12 = vadd.f32 %v1173_v45, %v739_v61 }
 0x119   :  { %1830 = vst [vmem:[#allocation18_spill] sm:$0xff] %v1709_v28  ;;  %v1712_v50 = vpop.f32.mrf.mxu0  ;;  %v209_v28 = vpop.permute.xlu1 %208  ;;  %v804_v32 = vadd.f32 %v1149_v29, %v707_v25  ;;  %v742_v4 = vadd.f32 %v1112_v52, %v199_v27  ;;  %v815_v42 = vadd.f32 %v1158_v34, %v718_v41  ;;  %v1839_v41 = vld [vmem:[#allocation14_spill] sm:$0xff] }
 0x11a   :  { %v1714_v19 = vpop.f32.mrf.mxu1  ;;  %v750_v47 = vadd.f32 %v1118_v35, %v209_v28  ;;  %v1837_v35 = vld [vmem:[#allocation2_spill] sm:$0xff]  ;;  %v734_v43 = vadd.f32 %v1106_v51, %v1839_v41 }
 0x11b   :  { %v1125_v46 = vpop.f32.mrf.mxu0 }
 0x11c   :  { %v1716_v56 = vpop.f32.mrf.mxu1  ;;  %v847_v18 = vadd.f32 %v1182_v44, %v750_v47  ;;  %v1843_v47 = vld [vmem:[#allocation10_spill] sm:$0xff] }
 0x11d   :  { %v1126_v26 = vpop.f32.mrf.mxu0  ;;  %v219_v6 = vpop.permute.xlu1 %218 }
 0x11e   :  { %v1190_v8 = vpop.f32.mrf.mxu1  ;;  %v1127_v63 = vadd.f32 %v1126_v26, %v1125_v46  ;;  %v1831_v46 = vld [vmem:[#allocation12_spill] sm:$0xff]  ;;  %v755_v26 = vadd.f32 %v1121_v11, %v214_v58 }
 0x11f   :  { %v1128_v37 = vpop.f32.mrf.mxu0  ;;  %v1176_v0 = vadd.f32 %v1831_v46, %v1693_v5  ;;  %v1834_v5 = vld [vmem:[#allocation8_spill] sm:$0xff]  ;;  %v1836_v27 = vld [vmem:[#allocation17_spill] sm:$0xff]  ;;  %v1191_v29 = vadd.f32 %v1190_v8, %v1716_v56  ;;  %v1840_v56 = vld [vmem:[#allocation15_spill] sm:$0xff] }
 0x120   :  { %v1726_v60 = vpop.f32.mrf.mxu1  ;;  %v763_v14 = vadd.f32 %v1127_v63, %v224_v2  ;;  %v1167_v22 = vadd.f32 %v1835_v21, %v1834_v5  ;;  %v1124_v28 = vadd.f32 %v1712_v50, %v1836_v27  ;;  %v1841_v8 = vld [vmem:[#allocation16_spill] sm:$0xff]  ;;  %v1844_v63 = vld [vmem:[#allocation11_spill] sm:$0xff]  ;;  %v1847_v51 = vld [vmem:[#allocation18_spill] sm:$0xff] }
 0x121   :  { %v1129_v30 = vpop.f32.mrf.mxu0  ;;  %v839_v25 = vadd.f32 %v1176_v0, %v742_v4  ;;  %v229_v52 = vpop.permute.xlu1 %228  ;;  %v1185_v62 = vadd.f32 %v1841_v8, %v1840_v56 }
 0x122   :  { %v1732_v48 = vpop.f32.mrf.mxu1  ;;  %v1130_v15 = vadd.f32 %v1129_v30, %v1128_v37  ;;  %v1838_v37 = vld [vmem:[#allocation3_spill] sm:$0xff]  ;;  %v828_v61 = vadd.f32 %v1167_v22, %v731_v49  ;;  %v860_v36 = vadd.f32 %v1191_v29, %v763_v14 }
 0x123   :  { %v1217_v1 = vpop.f32.mrf.mxu0  ;;  %v1161_v39 = vadd.f32 %v1838_v37, %v1837_v35  ;;  %v852_v11 = vadd.f32 %v1185_v62, %v755_v26 }
 0x124   :  { %v909_v7 = vadd.f32 %v1217_v1, %v812_v38  ;;  %v1225_v9 = vpop.f32.mrf.mxu1  ;;  %v766_v30 = vadd.f32 %v1130_v15, %v229_v52  ;;  %v1842_v38 = vld [vmem:[#allocation13_spill] sm:$0xff]  ;;  %v1170_v1 = vadd.f32 %v1844_v63, %v1843_v47 }
 0x125   :  { %v941_v53 = vadd.f32 %v1225_v9, %v844_v54  ;;  %v900_v55 = vpop.f32.mrf.mxu0  ;;  %v726_v45 = vadd.f32 %v1100_v20, %v1842_v38  ;;  %v820_v4 = vadd.f32 %v1161_v39, %v723_v3  ;;  %v1194_v9 = vadd.f32 %v1732_v48, %v1726_v60 }
 0x126   :  { %965 = vst [vmem:[%s1813_s3 + $0x10] sm:$0xff] %v909_v7  ;;  %v901_v10 = vadd.f32 %v900_v55, %v804_v32  ;;  %v932_v13 = vpop.f32.mrf.mxu1  ;;  %v758_v7 = vadd.f32 %v1124_v28, %v219_v6  ;;  %v1846_v55 = vld [vmem:[#allocation7_spill] sm:$0xff]  ;;  %v831_v6 = vadd.f32 %v1170_v1, %v734_v43  ;;  %v1188_v60 = vadd.f32 %v1714_v19, %v1847_v51 }
 0x127   :  { %973 = vst [vmem:[%s1813_s3 + $0x50] sm:$0xff] %v941_v53  ;;  %v933_v16 = vadd.f32 %v932_v13, %v836_v12  ;;  %v1218_v17 = vpop.f32.mrf.mxu0  ;;  %v1845_v53 = vld [vmem:[#allocation5_spill] sm:$0xff]  ;;  %v863_v0 = vadd.f32 %v1194_v9, %v766_v30 }
 0x128   :  { %963 = vst [vmem:[%s1813_s3] sm:$0xff] %v901_v10  ;;  %v912_v23 = vadd.f32 %v1218_v17, %v815_v42  ;;  %v1226_v24 = vpop.f32.mrf.mxu1  ;;  %v1164_v12 = vadd.f32 %v1846_v55, %v1845_v53  ;;  %v855_v15 = vadd.f32 %v1188_v60, %v758_v7 }
 0x129   :  { %971 = vst [vmem:[%s1813_s3 + $0x40] sm:$0xff] %v933_v16  ;;  %v944_v31 = vadd.f32 %v1226_v24, %v847_v18  ;;  %v903_v33 = vpop.f32.mrf.mxu0 }
 0x12a   :  { %966 = vst [vmem:[%s1813_s3 + $0x18] sm:$0xff] %v912_v23  ;;  %v904_v58 = vadd.f32 %v903_v33, %v807_v40  ;;  %v935_v50 = vpop.f32.mrf.mxu1  ;;  %v823_v13 = vadd.f32 %v1164_v12, %v726_v45 }
 0x12b   :  { %974 = vst [vmem:[%s1813_s3 + $0x58] sm:$0xff] %v944_v31  ;;  %v936_v32 = vadd.f32 %v935_v50, %v839_v25  ;;  %v1221_v34 = vpop.f32.mrf.mxu0 }
 0x12c   :  { %964 = vst [vmem:[%s1813_s3 + $0x8] sm:$0xff] %v904_v58  ;;  %v925_v40 = vadd.f32 %v1221_v34, %v828_v61  ;;  %v1229_v54 = vpop.f32.mrf.mxu1 }
 0x12d   :  { %972 = vst [vmem:[%s1813_s3 + $0x48] sm:$0xff] %v936_v32  ;;  %v957_v42 = vadd.f32 %v1229_v54, %v860_v36  ;;  %v916_v44 = vpop.f32.mrf.mxu0 }
 0x12e   :  { %969 = vst [vmem:[%s1813_s3 + $0x30] sm:$0xff] %v925_v40  ;;  %v917_v49 = vadd.f32 %v916_v44, %v820_v4  ;;  %v948_v3 = vpop.f32.mrf.mxu1 }
 0x12f   :  { %977 = vst [vmem:[%s1813_s3 + $0x70] sm:$0xff] %v957_v42  ;;  %v949_v48 = vadd.f32 %v948_v3, %v852_v11  ;;  %v1222_v46 = vpop.f32.mrf.mxu0 }
 0x130   :  { %967 = vst [vmem:[%s1813_s3 + $0x20] sm:$0xff] %v917_v49  ;;  %v928_v2 = vadd.f32 %v1222_v46, %v831_v6  ;;  %v1230_v10 = vpop.f32.mrf.mxu1 }
 0x131   :  { %975 = vst [vmem:[%s1813_s3 + $0x60] sm:$0xff] %v949_v48  ;;  %v960_v14 = vadd.f32 %v1230_v10, %v863_v0  ;;  %v919_v19 = vpop.f32.mrf.mxu0 }
 0x132   :  { %970 = vst [vmem:[%s1813_s3 + $0x38] sm:$0xff] %v928_v2  ;;  %v920_v16 = vadd.f32 %v919_v19, %v823_v13  ;;  %v951_v17 = vpop.f32.mrf.mxu1 }
 0x133   :  { %978 = vst [vmem:[%s1813_s3 + $0x78] sm:$0xff] %v960_v14  ;;  %v952_v18 = vadd.f32 %v951_v17, %v855_v15 }
 0x134   :  { %968 = vst [vmem:[%s1813_s3 + $0x28] sm:$0xff] %v920_v16 }
 0x135   :  { %976 = vst [vmem:[%s1813_s3 + $0x68] sm:$0xff] %v952_v18 }

// kernel: _lambda_.13
= control target key start
LH: loop header
LB: loop body
LE: loop exit
PB: predicated region body
PF: predicated region fallthrough
CT: control target
= control target key end

     0   :  { %s1324_s12 = smov 0   ;;  %s1326_s13 = smov 0   ;;  %s1618_s0 = inlined_call_operand.vmem [shape: bf16[64,288], index: 0, kind: input, shape index: {}]   ;;  %s1619_s1 = inlined_call_operand.vmem [shape: bf16[288,512], index: 1, kind: input, shape index: {}]   ;;  %s1620_s2 = inlined_call_operand.vmem [shape: f32[64,1], index: 2, kind: input, shape index: {}]   ;;  %s1621_s3 = inlined_call_operand.vmem [shape: f32[64,512], index: 3, kind: output, shape index: {}]  }
   0x1   :  { %s1328_s14 = smov 0   ;;  %s1330_s15 = smov 0  }
   0x2   :  { %s1332_s16 = smov 0  }
   0x3 LB: > { %s22_s17 = sadd.s32 1, %s1297_s15  ;;  %s1079_s18 = sadd.s32 4294967295, %s1301_s16   ;;  %s1301_s16 = sphi %s1332_s16, %s13_s16   ;;  %s1297_s15 = sphi %s1330_s15, %s1626_s15   ;;  %s1293_s14 = sphi %s1328_s14, %s1625_s14   ;;  %s1289_s13 = sphi %s1326_s13, %s1624_s13   ;;  %s1285_s12 = sphi %s1324_s12, %s1623_s12  }
   0x4   : > { %p23_p0 = scmp.ge.s32.totalorder %s22_s17, 2  ;;  %p65_p1 = scmp.ne.s32.totalorder %s1289_s13, %s1285_s12 }
   0x5   : > { %p66_p2 = scmp.eq.s32.totalorder %s1301_s16, 0  ;;  %p123_p4 = scmp.eq.s32.totalorder %s1079_s18, 1 }
   0x6   : > { %s1628_s17 = smov (%p23_p0, %s22_s17), 0  ;;  %s58_s20 = sadd.s32 1, %s1289_s13 }
   0x7   : > { %p67_p3 = por %p66_p2, %p65_p1  ;;  %s55_s19 = ssub.s32 %s1297_s15, %s1628_s17 }
   0x8   : > { %p56_p5 = scmp.eq.s32.totalorder %s55_s19, 0  ;;  %p1359_p6 = por %p123_p4, %p65_p1 }
   0x9   : > { %p1084_p7 = scmp.ge.s32.totalorder %s1301_s16, 2 }
   0xa   : > { %s1364_s22 = scalar_select %p56_p5, %s1289_s13, %s58_s20  }
   0xb   : > { %164 = sbr.rel (%p1084_p7) target bundleno = 38 (0x26), region = 24 }
  0x10   : > { %167 = sbr.rel (!%p67_p3) target bundleno = 38 (0x26), region = 28  ;;  %s169_s23 = sand.u32 (%p67_p3), 1, %s1289_s13  }
  0x11   : > { %s1146_s24 = sshll.u32 (%p67_p3), %s1297_s15, 3  ;;  %s1148_s25 = smul.u32 (%p67_p3), 288, %s169_s23 }
  0x12   : > { %s1372_s28 = scalar_lea.vmem (%p67_p3), %s1619_s1, %s1146_s24 }
  0x13   : > { %v273_v0 = vld [vmem:[%s1372_s28] sm:$0xff] (%p67_p3)  ;;  %v275_v1 = vld [vmem:[%s1372_s28 + $0x10] sm:$0xff] (%p67_p3)  ;;  %s1380_s29 = scalar_lea.vmem (%p67_p3), [#allocation2], %s1148_s25 }
  0x14   : > { %v277_v2 = vld [vmem:[%s1372_s28 + $0x20] sm:$0xff] (%p67_p3)  ;;  %v279_v3 = vld [vmem:[%s1372_s28 + $0x30] sm:$0xff] (%p67_p3)  ;;  %274 = vst [vmem:[%s1380_s29] sm:$0xff] (%p67_p3), %v273_v0  ;;  %276 = vst [vmem:[%s1380_s29 + $0x8] sm:$0xff] (%p67_p3), %v275_v1 }
  0x15   : > { %v281_v4 = vld [vmem:[%s1372_s28 + $0x40] sm:$0xff]  ;;  %v283_v5 = vld [vmem:[%s1372_s28 + $0x50] sm:$0xff]  ;;  %278 = vst [vmem:[%s1380_s29 + $0x10] sm:$0xff] %v277_v2  ;;  %280 = vst [vmem:[%s1380_s29 + $0x18] sm:$0xff] %v279_v3 }
  0x16   : > { %282 = vst [vmem:[%s1380_s29 + $0x20] sm:$0xff] %v281_v4  ;;  %284 = vst [vmem:[%s1380_s29 + $0x28] sm:$0xff] %v283_v5  ;;  %v285_v6 = vld [vmem:[%s1372_s28 + $0x60] sm:$0xff]  ;;  %v287_v7 = vld [vmem:[%s1372_s28 + $0x70] sm:$0xff] }
  0x17   : > { %v289_v8 = vld [vmem:[%s1372_s28 + $0x80] sm:$0xff]  ;;  %286 = vst [vmem:[%s1380_s29 + $0x30] sm:$0xff] %v285_v6  ;;  %288 = vst [vmem:[%s1380_s29 + $0x38] sm:$0xff] %v287_v7  ;;  %v291_v9 = vld [vmem:[%s1372_s28 + $0x90] sm:$0xff] }
  0x18   : > { %290 = vst [vmem:[%s1380_s29 + $0x40] sm:$0xff] %v289_v8  ;;  %v293_v10 = vld [vmem:[%s1372_s28 + $0xa0] sm:$0xff]  ;;  %v295_v11 = vld [vmem:[%s1372_s28 + $0xb0] sm:$0xff]  ;;  %292 = vst [vmem:[%s1380_s29 + $0x48] sm:$0xff] %v291_v9 }
  0x19   : > { %294 = vst [vmem:[%s1380_s29 + $0x50] sm:$0xff] %v293_v10  ;;  %296 = vst [vmem:[%s1380_s29 + $0x58] sm:$0xff] %v295_v11  ;;  %v297_v12 = vld [vmem:[%s1372_s28 + $0xc0] sm:$0xff]  ;;  %v299_v13 = vld [vmem:[%s1372_s28 + $0xd0] sm:$0xff] }
  0x1a   : > { %v301_v14 = vld [vmem:[%s1372_s28 + $0xe0] sm:$0xff]  ;;  %298 = vst [vmem:[%s1380_s29 + $0x60] sm:$0xff] %v297_v12  ;;  %300 = vst [vmem:[%s1380_s29 + $0x68] sm:$0xff] %v299_v13  ;;  %v303_v15 = vld [vmem:[%s1372_s28 + $0xf0] sm:$0xff] }
  0x1b   : > { %302 = vst [vmem:[%s1380_s29 + $0x70] sm:$0xff] %v301_v14  ;;  %v305_v16 = vld [vmem:[%s1372_s28 + $0x100] sm:$0xff]  ;;  %v307_v17 = vld [vmem:[%s1372_s28 + $0x110] sm:$0xff]  ;;  %304 = vst [vmem:[%s1380_s29 + $0x78] sm:$0xff] %v303_v15 }
  0x1c   : > { %306 = vst [vmem:[%s1380_s29 + $0x80] sm:$0xff] %v305_v16  ;;  %308 = vst [vmem:[%s1380_s29 + $0x88] sm:$0xff] %v307_v17  ;;  %v309_v18 = vld [vmem:[%s1372_s28 + $0x120] sm:$0xff]  ;;  %v311_v19 = vld [vmem:[%s1372_s28 + $0x130] sm:$0xff] }
  0x1d   : > { %v313_v20 = vld [vmem:[%s1372_s28 + $0x140] sm:$0xff]  ;;  %310 = vst [vmem:[%s1380_s29 + $0x90] sm:$0xff] %v309_v18  ;;  %312 = vst [vmem:[%s1380_s29 + $0x98] sm:$0xff] %v311_v19  ;;  %v315_v21 = vld [vmem:[%s1372_s28 + $0x150] sm:$0xff] }
  0x1e   : > { %314 = vst [vmem:[%s1380_s29 + $0xa0] sm:$0xff] %v313_v20  ;;  %v317_v22 = vld [vmem:[%s1372_s28 + $0x160] sm:$0xff]  ;;  %v319_v23 = vld [vmem:[%s1372_s28 + $0x170] sm:$0xff]  ;;  %316 = vst [vmem:[%s1380_s29 + $0xa8] sm:$0xff] %v315_v21 }
  0x1f   : > { %318 = vst [vmem:[%s1380_s29 + $0xb0] sm:$0xff] %v317_v22  ;;  %320 = vst [vmem:[%s1380_s29 + $0xb8] sm:$0xff] %v319_v23  ;;  %v321_v24 = vld [vmem:[%s1372_s28 + $0x180] sm:$0xff]  ;;  %v323_v25 = vld [vmem:[%s1372_s28 + $0x190] sm:$0xff] }
  0x20   : > { %v325_v26 = vld [vmem:[%s1372_s28 + $0x1a0] sm:$0xff]  ;;  %322 = vst [vmem:[%s1380_s29 + $0xc0] sm:$0xff] %v321_v24  ;;  %324 = vst [vmem:[%s1380_s29 + $0xc8] sm:$0xff] %v323_v25  ;;  %v327_v27 = vld [vmem:[%s1372_s28 + $0x1b0] sm:$0xff] }
  0x21   : > { %326 = vst [vmem:[%s1380_s29 + $0xd0] sm:$0xff] %v325_v26  ;;  %v329_v28 = vld [vmem:[%s1372_s28 + $0x1c0] sm:$0xff]  ;;  %v331_v29 = vld [vmem:[%s1372_s28 + $0x1d0] sm:$0xff]  ;;  %328 = vst [vmem:[%s1380_s29 + $0xd8] sm:$0xff] %v327_v27 }
  0x22   : > { %330 = vst [vmem:[%s1380_s29 + $0xe0] sm:$0xff] %v329_v28  ;;  %332 = vst [vmem:[%s1380_s29 + $0xe8] sm:$0xff] %v331_v29  ;;  %v333_v30 = vld [vmem:[%s1372_s28 + $0x1e0] sm:$0xff]  ;;  %v335_v31 = vld [vmem:[%s1372_s28 + $0x1f0] sm:$0xff] }
  0x23   : > { %v337_v32 = vld [vmem:[%s1372_s28 + $0x200] sm:$0xff]  ;;  %334 = vst [vmem:[%s1380_s29 + $0xf0] sm:$0xff] %v333_v30  ;;  %336 = vst [vmem:[%s1380_s29 + $0xf8] sm:$0xff] %v335_v31  ;;  %v339_v33 = vld [vmem:[%s1372_s28 + $0x210] sm:$0xff] }
  0x24   : > { %338 = vst [vmem:[%s1380_s29 + $0x100] sm:$0xff] %v337_v32  ;;  %v341_v34 = vld [vmem:[%s1372_s28 + $0x220] sm:$0xff]  ;;  %v343_v35 = vld [vmem:[%s1372_s28 + $0x230] sm:$0xff]  ;;  %340 = vst [vmem:[%s1380_s29 + $0x108] sm:$0xff] %v339_v33 }
  0x25   : > { %342 = vst [vmem:[%s1380_s29 + $0x110] sm:$0xff] %v341_v34  ;;  %344 = vst [vmem:[%s1380_s29 + $0x118] sm:$0xff] %v343_v35 }
  0x26 PF: > { %p1087_p8 = scmp.ge.s32.totalorder %s1301_s16, 1  ;;  %p349_p9 = scmp.lt.s32.totalorder %s1301_s16, 3 }
  0x28   : > { %p350_p10 = pnand %p1087_p8, %p349_p9 }
  0x29   : > { %s356_s30 = sand.u32 (!%p350_p10), 1, %s1285_s12  }
  0x2a   : > { %353 = sbr.rel (%p350_p10) target bundleno = 350 (0x15e), region = 66  ;;  %s1088_s11 = sshll.u32 (!%p350_p10), %s356_s30, 7 }
  0x2b   : > { %s1149_s4 = smul.u32 (!%p350_p10), 288, %s356_s30  ;;  %s1563_s18 = scalar_lea.vmem (!%p350_p10), [#allocation3], %s1088_s11 }
  0x2d   : > { %s1459_s7 = scalar_lea.vmem (!%p350_p10), [#allocation2], %s1149_s4 }
  0x2f   : > { %v1303_v36 = vmov 0   ;;  %v1250_v37 = vld [vmem:[%s1618_s0 + $0x4] ss:$12 sps:$4 sm:$0xff]   ;;  %v1193_v38 = vld [vmem:[%s1459_s7 + $0x74] ss:$8 sps:$4 sm:$0xff]   ;;  %vm746_vm0 = vcmask 261120  }
  0x30   : > { %864 = vmatprep.mubr.bf16.mxu1 %v1303_v36  ;;  %1191 = vset.pattern.permute.xlu0 %v1303_v36  ;;  %v1195_v39 = vld [vmem:[%s1459_s7 + $0x70] ss:$8 sps:$4 sm:$0xff]   ;;  %v1196_v40 = vld [vmem:[%s1459_s7 + $0x64] ss:$8 sps:$4 sm:$0xff]   ;;  %v1198_v41 = vld [vmem:[%s1459_s7 + $0x60] ss:$8 sps:$4 sm:$0xff]  }
  0x31   : > { %1192 = vset.pattern.permute.xlu1 %v1303_v36  ;;  %791 = vmatprep.mubr.bf16.mxu0 %v1250_v37  ;;  %v1199_v42 = vld [vmem:[%s1459_s7 + $0x54] ss:$8 sps:$4 sm:$0xff]   ;;  %v1201_v43 = vld [vmem:[%s1459_s7 + $0x50] ss:$8 sps:$4 sm:$0xff]   ;;  %v1202_v44 = vld [vmem:[%s1459_s7 + $0x44] ss:$8 sps:$4 sm:$0xff]  }
  0x32   : > { %759 = vmatprep.subr.bf16.mxu0 %v1193_v38  ;;  %v1204_v45 = vld [vmem:[%s1459_s7 + $0x40] ss:$8 sps:$4 sm:$0xff]   ;;  %v1205_v46 = vld [vmem:[%s1459_s7 + $0x34] ss:$8 sps:$4 sm:$0xff]   ;;  %v1207_v47 = vld [vmem:[%s1459_s7 + $0x30] ss:$8 sps:$4 sm:$0xff]  }
  0x33   : > { %760 = vmatpush1.bf16.msra.mxu0 %v1195_v39  ;;  %v1208_v48 = vld [vmem:[%s1459_s7 + $0x24] ss:$8 sps:$4 sm:$0xff]   ;;  %v1210_v49 = vld [vmem:[%s1459_s7 + $0x20] ss:$8 sps:$4 sm:$0xff]   ;;  %v1234_v50 = vld [vmem:[%s1459_s7 + $0x114] ss:$8 sps:$4 sm:$0xff]  }
  0x34   : > { %761 = vmatprep.subr.bf16.mxu0 %v1196_v40  ;;  %v1237_v51 = vld [vmem:[%s1459_s7 + $0x110] ss:$8 sps:$4 sm:$0xff]   ;;  %v1211_v52 = vld [vmem:[%s1459_s7 + $0x14] ss:$8 sps:$4 sm:$0xff]   ;;  %844 = vmatprep.subr.bf16.mxu1 %v1234_v50  ;;  %v1240_v53 = vld [vmem:[%s1459_s7 + $0x104] ss:$8 sps:$4 sm:$0xff]  }
  0x35   : > { %845 = vmatpush1.bf16.msra.mxu1 %v1237_v51  ;;  %v1243_v54 = vld [vmem:[%s1459_s7 + $0x100] ss:$8 sps:$4 sm:$0xff]   ;;  %v1213_v55 = vld [vmem:[%s1459_s7 + $0x10] ss:$8 sps:$4 sm:$0xff]   ;;  %v1214_v56 = vld [vmem:[%s1459_s7 + $0x4] ss:$8 sps:$4 sm:$0xff]  }
  0x36   : > { %846 = vmatprep.subr.bf16.mxu1 %v1240_v53  ;;  %v1246_v57 = vld [vmem:[%s1618_s0 + $0x8] ss:$12 sps:$4 sm:$0xff]   ;;  %v458_v60 = vld [vmem:[%s1620_s2] sm:$0xff]  ;;  %v1219_v62 = vld [vmem:[%s1459_s7 + $0xf0] ss:$8 sps:$4 sm:$0xff]   ;;  %s1147_s12 = sshll.u32 (%p1359_p6), %s1293_s14, 4 }
  0x37   : > { %762 = vmatpush1.bf16.msra.mxu0 %v1198_v41  ;;  %v1216_v58 = vld [vmem:[%s1459_s7] ss:$8 sps:$4 sm:$0xff]   ;;  %v1217_v59 = vld [vmem:[%s1459_s7 + $0xf4] ss:$8 sps:$4 sm:$0xff]   ;;  %468 = vperm.xlu0 %1191, %v458_v60   ;;  %v1220_v0 = vld [vmem:[%s1459_s7 + $0xe4] ss:$8 sps:$4 sm:$0xff]   ;;  %s933_s20 = scalar_lea.vmem (%p1359_p6), %s1621_s3, %s1147_s12 }
  0x38   : > { %763 = vmatprep.subr.bf16.mxu0 %v1199_v42  ;;  %v460_v61 = vld [vmem:[%s1620_s2 + $0x10] sm:$0xff]  ;;  %v459_v63 = vld [vmem:[%s1620_s2 + $0x8] sm:$0xff]  ;;  %v461_v1 = vld [vmem:[%s1620_s2 + $0x18] sm:$0xff] }
  0x39   : > { %847 = vmatpush1.bf16.msra.mxu1 %v1243_v54  ;;  %478 = vperm.xlu1 %1192, %v460_v61   ;;  %v1251_v2 = vld [vmem:[%s1618_s0 + $0x20] ss:$12 sps:$4 sm:$0xff]   ;;  %v1223_v5 = vld [vmem:[%s1459_s7 + $0xd4] ss:$8 sps:$4 sm:$0xff]   ;;  %v1225_v7 = vld [vmem:[%s1459_s7 + $0xd0] ss:$8 sps:$4 sm:$0xff]  }
  0x3a   : > { %v1222_v3 = vld [vmem:[%s1459_s7 + $0xe0] ss:$8 sps:$4 sm:$0xff]   ;;  %v464_v8 = vld [vmem:[%s1620_s2 + $0x30] sm:$0xff]  ;;  %v1226_v9 = vld [vmem:[%s1459_s7 + $0xc4] ss:$8 sps:$4 sm:$0xff]  }
  0x3b   : > { %764 = vmatpush1.bf16.msra.mxu0 %v1201_v43  ;;  %473 = vperm.xlu0 %1191, %v459_v63   ;;  %v462_v4 = vld [vmem:[%s1620_s2 + $0x20] sm:$0xff]  ;;  %v463_v6 = vld [vmem:[%s1620_s2 + $0x28] sm:$0xff]  ;;  %v465_v10 = vld [vmem:[%s1620_s2 + $0x38] sm:$0xff] }
  0x3c   : > { %765 = vmatprep.subr.bf16.mxu0 %v1202_v44  ;;  %1137 = vmatmul.mubr.msk.bf16.vlgmr.msra.gmra.mxu1 %vm746_vm0, %v1246_v57  ;;  %v1255_v11 = vld [vmem:[%s1618_s0 + $0x38] ss:$12 sps:$4 sm:$0xff]   ;;  %v1228_v12 = vld [vmem:[%s1459_s7 + $0xc0] ss:$8 sps:$4 sm:$0xff]   ;;  %v1229_v13 = vld [vmem:[%s1459_s7 + $0xb4] ss:$8 sps:$4 sm:$0xff]  }
  0x3d   : > { %874 = vmatprep.mubr.bf16.mxu1 %v1303_v36  ;;  %483 = vperm.xlu1 %1192, %v461_v1   ;;  %v1231_v14 = vld [vmem:[%s1459_s7 + $0xb0] ss:$8 sps:$4 sm:$0xff]   ;;  %v1232_v15 = vld [vmem:[%s1459_s7 + $0xa4] ss:$8 sps:$4 sm:$0xff]   ;;  %v1236_v17 = vld [vmem:[%s1459_s7 + $0xa0] ss:$8 sps:$4 sm:$0xff]  }
  0x3e   : > { %v1259_v16 = vld [vmem:[%s1618_s0 + $0x50] ss:$12 sps:$4 sm:$0xff]   ;;  %v1244_v20 = vld [vmem:[%s1459_s7 + $0x84] ss:$8 sps:$4 sm:$0xff]   ;;  %v1247_v21 = vld [vmem:[%s1459_s7 + $0x80] ss:$8 sps:$4 sm:$0xff]  }
  0x3f   : > { %766 = vmatpush1.bf16.msra.mxu0 %v1204_v45  ;;  %488 = vperm.xlu0 %1191, %v462_v4   ;;  %v1238_v18 = vld [vmem:[%s1459_s7 + $0x94] ss:$8 sps:$4 sm:$0xff]   ;;  %v1242_v19 = vld [vmem:[%s1459_s7 + $0x90] ss:$8 sps:$4 sm:$0xff]   ;;  %v1248_v22 = vld [vmem:[%s1618_s0] ss:$12 sps:$4 sm:$0xff]  }
  0x40   : > { %767 = vmatprep.subr.bf16.mxu0 %v1205_v46  ;;  %v1252_v23 = vld [vmem:[%s1618_s0 + $0x1c] ss:$12 sps:$4 sm:$0xff]   ;;  %v1254_v24 = vld [vmem:[%s1618_s0 + $0x18] ss:$12 sps:$4 sm:$0xff]   ;;  %v1256_v25 = vld [vmem:[%s1618_s0 + $0x34] ss:$12 sps:$4 sm:$0xff]  }
  0x41   : > { %493 = vperm.xlu1 %1192, %v463_v6   ;;  %v1258_v26 = vld [vmem:[%s1618_s0 + $0x30] ss:$12 sps:$4 sm:$0xff]   ;;  %v1260_v27 = vld [vmem:[%s1618_s0 + $0x4c] ss:$12 sps:$4 sm:$0xff]   ;;  %v1262_v28 = vld [vmem:[%s1618_s0 + $0x48] ss:$12 sps:$4 sm:$0xff]  }
  0x43   : > { %768 = vmatpush1.bf16.msra.mxu0 %v1207_v47  ;;  %498 = vperm.xlu0 %1191, %v464_v8  }
  0x44   : > { %769 = vmatprep.subr.bf16.mxu0 %v1208_v48  ;;  %1138 = vmatmul.mubr.msk.bf16.gmra.mxu1 %vm746_vm0, %v1251_v2 }
  0x45   : > { %884 = vmatprep.mubr.bf16.mxu1 %v1303_v36  ;;  %503 = vperm.xlu1 %1192, %v465_v10  }
  0x47   : > { %770 = vmatpush1.bf16.msra.mxu0 %v1210_v49 }
  0x48   : > { %771 = vmatprep.subr.bf16.mxu0 %v1211_v52 }
  0x4b   : > { %772 = vmatpush1.bf16.msra.mxu0 %v1213_v55 }
  0x4c   : > { %773 = vmatprep.subr.bf16.mxu0 %v1214_v56  ;;  %1139 = vmatmul.mubr.msk.bf16.gmra.mxu1 %vm746_vm0, %v1255_v11 }
  0x4d   : > { %894 = vmatprep.mubr.bf16.mxu1 %v1303_v36 }
  0x4f   : > { %774 = vmatpush1.bf16.msra.mxu0 %v1216_v58 }
  0x50   : > { %775 = vmatprep.subr.bf16.mxu0 %v1217_v59 }
  0x53   : > { %776 = vmatpush2.bf16.msra.mxu0 %v1219_v62 }
  0x54   : > { %777 = vmatprep.subr.bf16.mxu0 %v1220_v0  ;;  %1140 = vmatmul.mubr.msk.bf16.gmra.mxu1 %vm746_vm0, %v1259_v16 }
  0x57   : > { %778 = vmatpush2.bf16.msra.mxu0 %v1222_v3 }
  0x58   : > { %779 = vmatprep.subr.bf16.mxu0 %v1223_v5 }
  0x5b   : > { %780 = vmatpush2.bf16.msra.mxu0 %v1225_v7 }
  0x5c   : > { %781 = vmatprep.subr.bf16.mxu0 %v1226_v9 }
  0x5f   : > { %782 = vmatpush2.bf16.msra.mxu0 %v1228_v12 }
  0x60   : > { %783 = vmatprep.subr.bf16.mxu0 %v1229_v13 }
  0x63   : > { %784 = vmatpush2.bf16.msra.mxu0 %v1231_v14 }
  0x64   : > { %785 = vmatprep.subr.bf16.mxu0 %v1232_v15 }
  0x67   : > { %786 = vmatpush2.bf16.msra.mxu0 %v1236_v17 }
  0x68   : > { %787 = vmatprep.subr.bf16.mxu0 %v1238_v18 }
  0x6b   : > { %788 = vmatpush2.bf16.msra.mxu0 %v1242_v19 }
  0x6c   : > { %789 = vmatprep.subr.bf16.mxu0 %v1244_v20 }
  0x6f   : > { %790 = vmatpush2.bf16.msra.mxu0 %v1247_v21 }
  0x72   : > { %792 = vmatmul.mubr.bf16.vlgmr.msra.gmra.mxu0 %v1248_v22 }
  0x73   : > { %801 = vmatprep.mubr.bf16.mxu0 %v1252_v23 }
  0x7a   : > { %802 = vmatmul.mubr.bf16.gmra.mxu0 %v1254_v24 }
  0x7b   : > { %811 = vmatprep.mubr.bf16.mxu0 %v1256_v25 }
  0x82   : > { %812 = vmatmul.mubr.bf16.gmra.mxu0 %v1258_v26 }
  0x83   : > { %821 = vmatprep.mubr.bf16.mxu0 %v1260_v27 }
  0x8a   : > { %822 = vmatmul.mubr.bf16.gmra.mxu0 %v1262_v28 }
  0xb2   : > { %v469_v35 = vpop.permute.xlu0 %468 }
  0xb4   : > { %v479_v48 = vpop.permute.xlu1 %478 }
  0xb6   : > { %v474_v41 = vpop.permute.xlu0 %473 }
  0xb8   : > { %v484_v58 = vpop.permute.xlu1 %483 }
  0xba   : > { %v489_v2 = vpop.permute.xlu0 %488 }
  0xbc   : > { %v494_v9 = vpop.permute.xlu1 %493 }
  0xbe   : > { %v499_v17 = vpop.permute.xlu0 %498 }
  0xc0   : > { %v504_v25 = vpop.permute.xlu1 %503 }
  0xfc   : > { %v866_v29 = vpop.f32.mrf.mxu1 }
  0xfe   : > { %v868_v30 = vpop.f32.mrf.mxu1 }
 0x100   : > { %v870_v31 = vpop.f32.mrf.mxu1 }
 0x102   : > { %v872_v32 = vpop.f32.mrf.mxu1 }
 0x104   : > { %v876_v33 = vpop.f32.mrf.mxu1 }
 0x106   : > { %v878_v34 = vpop.f32.mrf.mxu1 }
 0x108   : > { %v880_v36 = vpop.f32.mrf.mxu1 }
 0x10a   : > { %v882_v38 = vpop.f32.mrf.mxu1 }
 0x10c   : > { %v886_v45 = vpop.f32.mrf.mxu1 }
 0x10e   : > { %v888_v53 = vpop.f32.mrf.mxu1 }
 0x110   : > { %v890_v61 = vpop.f32.mrf.mxu1 }
 0x112   : > { %v892_v5 = vpop.f32.mrf.mxu1 }
 0x114   : > { %v896_v13 = vpop.f32.mrf.mxu1 }
 0x116   : > { %v898_v20 = vpop.f32.mrf.mxu1 }
 0x118   : > { %v900_v28 = vpop.f32.mrf.mxu1 }
 0x132   : > { %v793_v37 = vpop.f32.mrf.mxu0 }
 0x133   : > { %v794_v39 = vadd.f32 %v793_v37, %v469_v35 }
 0x134   : > { %v795_v40 = vpop.f32.mrf.mxu0 }
 0x135   : > { %v867_v42 = vadd.f32 %v866_v29, %v794_v39  ;;  %v796_v43 = vadd.f32 %v795_v40, %v469_v35  ;;  %v902_v35 = vpop.f32.mrf.mxu1 }
 0x136   : > { %v797_v44 = vpop.f32.mrf.mxu0 }
 0x137   : > { %905 = vst [vmem:[%s1563_s18] sm:$0xff] %v867_v42  ;;  %v869_v46 = vadd.f32 %v868_v30, %v796_v43  ;;  %v798_v47 = vadd.f32 %v797_v44, %v474_v41 }
 0x138   : > { %v799_v49 = vpop.f32.mrf.mxu0 }
 0x139   : > { %906 = vst [vmem:[%s1563_s18 + $0x8] sm:$0xff] %v869_v46  ;;  %v871_v50 = vadd.f32 %v870_v31, %v798_v47  ;;  %v800_v51 = vadd.f32 %v799_v49, %v474_v41 }
 0x13a   : > { %v803_v52 = vpop.f32.mrf.mxu0 }
 0x13b   : > { %907 = vst [vmem:[%s1563_s18 + $0x10] sm:$0xff] %v871_v50  ;;  %v873_v54 = vadd.f32 %v872_v32, %v800_v51  ;;  %v804_v55 = vadd.f32 %v803_v52, %v479_v48 }
 0x13c   : > { %v805_v56 = vpop.f32.mrf.mxu0 }
 0x13d   : > { %908 = vst [vmem:[%s1563_s18 + $0x18] sm:$0xff] %v873_v54  ;;  %v877_v57 = vadd.f32 %v876_v33, %v804_v55  ;;  %v806_v59 = vadd.f32 %v805_v56, %v479_v48 }
 0x13e   : > { %v807_v60 = vpop.f32.mrf.mxu0  ;;  %v946_v37 = vld [vmem:[%s1563_s18] sm:$0xff] (%p1359_p6) }
 0x13f   : > { %909 = vst [vmem:[%s1563_s18 + $0x20] sm:$0xff] %v877_v57  ;;  %v879_v62 = vadd.f32 %v878_v34, %v806_v59  ;;  %v808_v63 = vadd.f32 %v807_v60, %v484_v58  ;;  %947 = vst [vmem:[%s933_s20] sm:$0xff] (%p1359_p6), %v946_v37 }
 0x140   : > { %v809_v0 = vpop.f32.mrf.mxu0 }
 0x141   : > { %910 = vst [vmem:[%s1563_s18 + $0x28] sm:$0xff] %v879_v62  ;;  %v881_v1 = vadd.f32 %v880_v36, %v808_v63  ;;  %v810_v3 = vadd.f32 %v809_v0, %v484_v58 }
 0x142   : > { %v813_v4 = vpop.f32.mrf.mxu0  ;;  %v950_v39 = vld [vmem:[%s1563_s18 + $0x10] sm:$0xff] (%p1359_p6) }
 0x143   : > { %911 = vst [vmem:[%s1563_s18 + $0x30] sm:$0xff] %v881_v1  ;;  %v883_v6 = vadd.f32 %v882_v38, %v810_v3  ;;  %v814_v7 = vadd.f32 %v813_v4, %v489_v2  ;;  %v948_v38 = vld [vmem:[%s1563_s18 + $0x8] sm:$0xff] (%p1359_p6)  ;;  %951 = vst [vmem:[%s933_s20 + $0x20] sm:$0xff] (%p1359_p6), %v950_v39 }
 0x144   : > { %v815_v8 = vpop.f32.mrf.mxu0  ;;  %v952_v40 = vld [vmem:[%s1563_s18 + $0x18] sm:$0xff] (%p1359_p6)  ;;  %949 = vst [vmem:[%s933_s20 + $0x8] sm:$0xff] (%p1359_p6), %v948_v38 }
 0x145   : > { %912 = vst [vmem:[%s1563_s18 + $0x38] sm:$0xff] %v883_v6  ;;  %v887_v10 = vadd.f32 %v886_v45, %v814_v7  ;;  %v816_v11 = vadd.f32 %v815_v8, %v489_v2  ;;  %953 = vst [vmem:[%s933_s20 + $0x28] sm:$0xff] (%p1359_p6), %v952_v40 }
 0x146   : > { %v817_v12 = vpop.f32.mrf.mxu0  ;;  %v954_v41 = vld [vmem:[%s1563_s18 + $0x20] sm:$0xff] (%p1359_p6) }
 0x147   : > { %913 = vst [vmem:[%s1563_s18 + $0x40] sm:$0xff] %v887_v10  ;;  %v889_v14 = vadd.f32 %v888_v53, %v816_v11  ;;  %v818_v15 = vadd.f32 %v817_v12, %v494_v9  ;;  %955 = vst [vmem:[%s933_s20 + $0x40] sm:$0xff] (%p1359_p6), %v954_v41 }
 0x148   : > { %v819_v16 = vpop.f32.mrf.mxu0  ;;  %v956_v42 = vld [vmem:[%s1563_s18 + $0x28] sm:$0xff] (%p1359_p6) }
 0x149   : > { %914 = vst [vmem:[%s1563_s18 + $0x48] sm:$0xff] %v889_v14  ;;  %v891_v18 = vadd.f32 %v890_v61, %v818_v15  ;;  %v820_v19 = vadd.f32 %v819_v16, %v494_v9  ;;  %957 = vst [vmem:[%s933_s20 + $0x48] sm:$0xff] (%p1359_p6), %v956_v42 }
 0x14a   : > { %v823_v21 = vpop.f32.mrf.mxu0  ;;  %v958_v43 = vld [vmem:[%s1563_s18 + $0x30] sm:$0xff] (%p1359_p6) }
 0x14b   : > { %915 = vst [vmem:[%s1563_s18 + $0x50] sm:$0xff] %v891_v18  ;;  %v893_v22 = vadd.f32 %v892_v5, %v820_v19  ;;  %v824_v23 = vadd.f32 %v823_v21, %v499_v17  ;;  %959 = vst [vmem:[%s933_s20 + $0x60] sm:$0xff] (%p1359_p6), %v958_v43 }
 0x14c   : > { %v825_v24 = vpop.f32.mrf.mxu0  ;;  %v960_v44 = vld [vmem:[%s1563_s18 + $0x38] sm:$0xff] (%p1359_p6) }
 0x14d   : > { %916 = vst [vmem:[%s1563_s18 + $0x58] sm:$0xff] %v893_v22  ;;  %v897_v26 = vadd.f32 %v896_v13, %v824_v23  ;;  %v826_v27 = vadd.f32 %v825_v24, %v499_v17  ;;  %961 = vst [vmem:[%s933_s20 + $0x68] sm:$0xff] (%p1359_p6), %v960_v44 }
 0x14e   : > { %v827_v29 = vpop.f32.mrf.mxu0  ;;  %v962_v45 = vld [vmem:[%s1563_s18 + $0x40] sm:$0xff] (%p1359_p6) }
 0x14f   : > { %917 = vst [vmem:[%s1563_s18 + $0x60] sm:$0xff] %v897_v26  ;;  %v899_v30 = vadd.f32 %v898_v20, %v826_v27  ;;  %v828_v31 = vadd.f32 %v827_v29, %v504_v25  ;;  %963 = vst [vmem:[%s933_s20 + $0x80] sm:$0xff] (%p1359_p6), %v962_v45 }
 0x150   : > { %v829_v32 = vpop.f32.mrf.mxu0  ;;  %v964_v46 = vld [vmem:[%s1563_s18 + $0x48] sm:$0xff] (%p1359_p6) }
 0x151   : > { %918 = vst [vmem:[%s1563_s18 + $0x68] sm:$0xff] %v899_v30  ;;  %v901_v33 = vadd.f32 %v900_v28, %v828_v31  ;;  %v830_v34 = vadd.f32 %v829_v32, %v504_v25  ;;  %927 = sbr.rel (!%p1359_p6) target bundleno = 350 (0x15e), region = 74  ;;  %965 = vst [vmem:[%s933_s20 + $0x88] sm:$0xff] (%p1359_p6), %v964_v46 }
 0x152   : > { %v966_v47 = vld [vmem:[%s1563_s18 + $0x50] sm:$0xff] (%p1359_p6) }
 0x153   : > { %919 = vst [vmem:[%s1563_s18 + $0x70] sm:$0xff] %v901_v33  ;;  %v903_v36 = vadd.f32 %v902_v35, %v830_v34  ;;  %967 = vst [vmem:[%s933_s20 + $0xa0] sm:$0xff] (%p1359_p6), %v966_v47 }
 0x154   : > { %v968_v48 = vld [vmem:[%s1563_s18 + $0x58] sm:$0xff] (%p1359_p6) }
 0x155   : > { %920 = vst [vmem:[%s1563_s18 + $0x78] sm:$0xff] %v903_v36  ;;  %969 = vst [vmem:[%s933_s20 + $0xa8] sm:$0xff] (%p1359_p6), %v968_v48 }
 0x156   : > { %v970_v49 = vld [vmem:[%s1563_s18 + $0x60] sm:$0xff] }
 0x157   : > { %971 = vst [vmem:[%s933_s20 + $0xc0] sm:$0xff] %v970_v49 }
 0x158   : > { %v972_v50 = vld [vmem:[%s1563_s18 + $0x68] sm:$0xff] }
 0x159   : > { %973 = vst [vmem:[%s933_s20 + $0xc8] sm:$0xff] %v972_v50 }
 0x15a   : > { %v974_v51 = vld [vmem:[%s1563_s18 + $0x70] sm:$0xff] }
 0x15b   : > { %975 = vst [vmem:[%s933_s20 + $0xe0] sm:$0xff] %v974_v51 }
 0x15c   : > { %v976_v52 = vld [vmem:[%s1563_s18 + $0x78] sm:$0xff] }
 0x15d   : > { %977 = vst [vmem:[%s933_s20 + $0xe8] sm:$0xff] %v976_v52 }
 0x15e PF: > { %s13_s16 = sadd.s32 1, %s1301_s16   ;;  %s1623_s12 = smov %s1289_s13 }
 0x15f   : > { %p10_p11 = scmp.ge.s32.totalorder %s13_s16, 4   ;;  %s1624_s13 = smov %s1364_s22 }
 0x160   : > { %s1625_s14 = smov %s1297_s15  ;;  %s1626_s15 = smov %s1628_s17 }
 0x161   :  { %12 = sbr.rel (!%p10_p11) target bundleno = 3 (0x3), region = 134 }

// kernel: _lambda_.14
= control target key start
LH: loop header
LB: loop body
LE: loop exit
PB: predicated region body
PF: predicated region fallthrough
CT: control target
= control target key end

     0   :  { %s648_s12 = smov 0   ;;  %s650_s13 = smov 0   ;;  %s814_s0 = inlined_call_operand.vmem [shape: f32[16,2048], index: 0, kind: input, shape index: {}]   ;;  %s815_s1 = inlined_call_operand.vmem [shape: f32[16,1], index: 1, kind: input, shape index: {}]   ;;  %s816_s2 = inlined_call_operand.vmem [shape: f32[16,1], index: 2, kind: input, shape index: {}]   ;;  %s817_s3 = inlined_call_operand.vmem [shape: bf16[16,2048], index: 3, kind: output, shape index: {}]  }
   0x1   :  { %s652_s14 = smov 0   ;;  %s654_s15 = smov 0  }
   0x2   :  { %s656_s16 = smov 0   ;;  %s658_s17 = smov 0  }
   0x3   :  { %s660_s18 = smov 0  }
   0x4 LB: > { %s479_s19 = sadd.s32 4294967295, %s624_s18   ;;  %s22_s20 = sadd.s32 1, %s616_s16  ;;  %s624_s18 = sphi %s660_s18, %s13_s18   ;;  %s620_s17 = sphi %s658_s17, %s824_s17   ;;  %s616_s16 = sphi %s656_s16, %s823_s16   ;;  %s612_s15 = sphi %s654_s15, %s822_s15   ;;  %s608_s14 = sphi %s652_s14, %s821_s14   ;;  %s604_s13 = sphi %s650_s13, %s820_s13   ;;  %s600_s12 = sphi %s648_s12, %s819_s12  }
   0x5   : > { %p23_p0 = scmp.ge.s32.totalorder %s22_s20, 4  ;;  %s25_s21 = sadd.s32 1, %s620_s17 }
   0x6   : > { %s32_s22 = sadd.s32 1, %s604_s13  ;;  %p39_p1 = scmp.ne.s32.totalorder %s604_s13, %s600_s12 }
   0x7   : > { %s826_s20 = smov (%p23_p0, %s22_s20), 0  ;;  %s828_s21 = smov (!%p23_p0, %s25_s21), %s620_s17 }
   0x8   : > { %s29_s23 = ssub.s32 %s616_s16, %s826_s20  ;;  %p40_p2 = scmp.eq.s32.totalorder %s624_s18, 0 }
   0x9   : > { %p27_p3 = scmp.ge.s32.totalorder %s828_s21, 2  ;;  %p30_p4 = scmp.eq.s32.totalorder %s29_s23, 0 }
   0xa   : > { %p41_p5 = por %p40_p2, %p39_p1  ;;  %p111_p6 = scmp.eq.s32.totalorder %s479_s19, 7 }
   0xb   : > { %s830_s21 = smov (%p27_p3, %s828_s21), 0  ;;  %p482_p8 = scmp.ge.s32.totalorder %s624_s18, 8 }
   0xc   : > { %s698_s24 = scalar_select %p30_p4, %s604_s13, %s32_s22  }
   0xd   : > { %p700_p7 = por %p111_p6, %p39_p1  ;;  %139 = sbr.rel (%p482_p8) target bundleno = 26 (0x1a), region = 24 }
  0x12   : > { %142 = sbr.rel (!%p41_p5) target bundleno = 26 (0x1a), region = 28  ;;  %s144_s26 = sand.u32 (%p41_p5), 1, %s604_s13  }
  0x13   : > { %s500_s27 = sshll.u32 (%p41_p5), %s616_s16, 5  ;;  %s483_s28 = sshll.u32 (%p41_p5), %s144_s26, 6 }
  0x14   : > { %s149_s4 = scalar_lea.vmem (%p41_p5), %s814_s0, %s500_s27  ;;  %s146_s5 = scalar_lea.vmem (%p41_p5), [#allocation4], %s483_s28 }
  0x15   : > { %v162_v0 = vld [vmem:[%s149_s4] sm:$0xff] (%p41_p5)  ;;  %v164_v1 = vld [vmem:[%s149_s4 + $0x8] sm:$0xff] (%p41_p5)  ;;  %v166_v2 = vld [vmem:[%s149_s4 + $0x10] sm:$0xff] (%p41_p5) }
  0x16   : > { %163 = vst [vmem:[%s146_s5] sm:$0xff] (%p41_p5), %v162_v0  ;;  %165 = vst [vmem:[%s146_s5 + $0x8] sm:$0xff] (%p41_p5), %v164_v1  ;;  %v168_v3 = vld [vmem:[%s149_s4 + $0x18] sm:$0xff] (%p41_p5)  ;;  %v170_v4 = vld [vmem:[%s149_s4 + $0x80] sm:$0xff] (%p41_p5) }
  0x17   : > { %167 = vst [vmem:[%s146_s5 + $0x10] sm:$0xff] %v166_v2  ;;  %v172_v5 = vld [vmem:[%s149_s4 + $0x88] sm:$0xff]  ;;  %169 = vst [vmem:[%s146_s5 + $0x18] sm:$0xff] %v168_v3  ;;  %v174_v6 = vld [vmem:[%s149_s4 + $0x90] sm:$0xff] }
  0x18   : > { %171 = vst [vmem:[%s146_s5 + $0x20] sm:$0xff] %v170_v4  ;;  %173 = vst [vmem:[%s146_s5 + $0x28] sm:$0xff] %v172_v5  ;;  %v176_v7 = vld [vmem:[%s149_s4 + $0x98] sm:$0xff] }
  0x19   : > { %175 = vst [vmem:[%s146_s5 + $0x30] sm:$0xff] %v174_v6  ;;  %177 = vst [vmem:[%s146_s5 + $0x38] sm:$0xff] %v176_v7 }
  0x1a PF: > { %p486_p9 = scmp.ge.s32.totalorder %s624_s18, 1  ;;  %p182_p10 = scmp.lt.s32.totalorder %s624_s18, 9 }
  0x1c   : > { %p183_p11 = pnand %p486_p9, %p182_p10 }
  0x1d   : > { %s189_s6 = sand.u32 (!%p183_p11), 1, %s600_s12   ;;  %p213_p12 = scmp.eq.s32.totalorder (!%p183_p11), %s612_s15, 0 }
  0x1e   : > { %186 = sbr.rel (%p183_p11) target bundleno = 382 (0x17e), region = 51  ;;  %s487_s7 = sshll.u32 (!%p183_p11), %s189_s6, 6 }
  0x1f   : > { %s488_s8 = sshll.u32 (!%p183_p11), %s189_s6, 5  ;;  %p214_p13 = scmp.eq.s32.totalorder (!%p183_p11), %s608_s14, 0 }
  0x20   : > { %s191_s9 = scalar_lea.vmem (!%p183_p11), [#allocation4], %s487_s7  ;;  %s715_s10 = scalar_lea.vmem (!%p183_p11), [#allocation5], %s488_s8 }
  0x21   : > { %p215_p0 = pnand (!%p183_p11), %p214_p13, %p213_p12 }
  0x23   : > { %218 = sbr.rel (%p215_p0) target bundleno = 43 (0x2b), region = 59 }
  0x28   : > { %vm219_vm0 = vcmask 7168   ;;  %v626_v8 = vmov 0.0  }
  0x29   : > { %220 = vst.msk [vmem:[#allocation2] sm:$0xff] %vm219_vm0, %v626_v8  ;;  %221 = vst.msk [vmem:[#allocation2 + $0x8] sm:$0xff] %vm219_vm0, %v626_v8 }
  0x2a   : > { %222 = vst.msk [vmem:[#allocation3] sm:$0xff] %vm219_vm0, %v626_v8  ;;  %223 = vst.msk [vmem:[#allocation3 + $0x8] sm:$0xff] %vm219_vm0, %v626_v8 }
  0x2b PF: > { %v717_v9 = vld [vmem:[%s191_s9] sm:$0xff]  ;;  %v719_v10 = vld [vmem:[%s191_s9 + $0x8] sm:$0xff]  ;;  %v721_v11 = vld [vmem:[%s191_s9 + $0x10] sm:$0xff]  ;;  %p489_p1 = scmp.ne.s32.totalorder %s612_s15, 0 }
  0x2c   : > { %v723_v12 = vld [vmem:[%s191_s9 + $0x18] sm:$0xff]  ;;  %v725_v13 = vld [vmem:[%s191_s9 + $0x20] sm:$0xff]  ;;  %v727_v14 = vld [vmem:[%s191_s9 + $0x28] sm:$0xff] }
  0x2d   : > { %v729_v15 = vld [vmem:[%s191_s9 + $0x30] sm:$0xff]  ;;  %v731_v16 = vld [vmem:[%s191_s9 + $0x38] sm:$0xff]  ;;  %234 = sbr.rel (%p489_p1) target bundleno = 203 (0xcb), region = 63 }
  0x32   : > { %v254_v17 = vmul.f32 %v717_v9, %v717_v9  ;;  %v255_v18 = vmul.f32 %v719_v10, %v719_v10  ;;  %v256_v19 = vmul.f32 %v721_v11, %v721_v11  ;;  %v237_v20 = vadd.f32 %v719_v10, %v717_v9  ;;  %v235_v37 = vld [vmem:[#allocation2] sm:$0xff]  ;;  %v252_v38 = vld [vmem:[#allocation3] sm:$0xff]  ;;  %v236_v43 = vld [vmem:[#allocation2 + $0x8] sm:$0xff] }
  0x33   : > { %v258_v21 = vmul.f32 %v725_v13, %v725_v13  ;;  %v259_v22 = vmul.f32 %v727_v14, %v727_v14  ;;  %v260_v23 = vmul.f32 %v729_v15, %v729_v15  ;;  %v257_v24 = vmul.f32 %v723_v12, %v723_v12  ;;  %v253_v44 = vld [vmem:[#allocation3 + $0x8] sm:$0xff] }
  0x34   : > { %v262_v25 = vadd.f32 %v255_v18, %v254_v17  ;;  %v242_v26 = vadd.f32 %v727_v14, %v725_v13  ;;  %v238_v27 = vadd.f32 %v237_v20, %v721_v11  ;;  %v261_v30 = vmul.f32 %v731_v16, %v731_v16 }
  0x35   : > { %v267_v28 = vadd.f32 %v259_v22, %v258_v21  ;;  %vm249_vm1 = vcmask 7168  }
  0x36   : > { %v263_v29 = vadd.f32 %v262_v25, %v256_v19  ;;  %v243_v31 = vadd.f32 %v242_v26, %v729_v15  ;;  %v239_v32 = vadd.f32 %v238_v27, %v723_v12 }
  0x37   : > { %v268_v33 = vadd.f32 %v267_v28, %v260_v23 }
  0x38   : > { %v264_v34 = vadd.f32 %v263_v29, %v257_v24  ;;  %240 = vadd.xlane.f32.xlu0 %v239_v32  ;;  %v244_v35 = vadd.f32 %v243_v31, %v731_v16 }
  0x39   : > { %v269_v36 = vadd.f32 %v268_v33, %v261_v30 }
  0x3a   : > { %265 = vadd.xlane.f32.xlu1 %v264_v34 }
  0x3c   : > { %245 = vadd.xlane.f32.xlu0 %v244_v35 }
  0x3e   : > { %270 = vadd.xlane.f32.xlu1 %v269_v36 }
  0xc1   : > { %v241_v39 = vpop.xlane.xlu0 %240 }
  0xc2   : > { %v247_v41 = vadd.f32 %v241_v39, %v235_v37 }
  0xc3   : > { %v266_v40 = vpop.xlane.xlu1 %265 }
  0xc4   : > { %v272_v42 = vadd.f32 %v266_v40, %v252_v38  ;;  %250 = vst.msk [vmem:[#allocation2] sm:$0xff] %vm249_vm1, %v247_v41 }
  0xc5   : > { %v246_v45 = vpop.xlane.xlu0 %245 }
  0xc6   : > { %274 = vst.msk [vmem:[#allocation3] sm:$0xff] %vm249_vm1, %v272_v42  ;;  %v248_v47 = vadd.f32 %v246_v45, %v236_v43 }
  0xc7   : > { %v271_v46 = vpop.xlane.xlu1 %270 }
  0xc8   : > { %v273_v48 = vadd.f32 %v271_v46, %v253_v44  ;;  %251 = vst.msk [vmem:[#allocation2 + $0x8] sm:$0xff] %vm249_vm1, %v248_v47 }
  0xca   : > { %275 = vst.msk [vmem:[#allocation3 + $0x8] sm:$0xff] %vm249_vm1, %v273_v48 }
  0xcb PF: > { %p490_p2 = scmp.ne.s32.totalorder %s612_s15, 1 }
  0xcd   : > { %279 = sbr.rel (%p490_p2) target bundleno = 374 (0x176), region = 67 }
  0xd2   : > { %v280_v49 = vld [vmem:[#allocation2] sm:$0xff]  ;;  %v284_v50 = vld [vmem:[#allocation3] sm:$0xff]  ;;  %v627_v51 = vmov 0   ;;  %v281_v54 = vld [vmem:[#allocation2 + $0x8] sm:$0xff] }
  0xd3   : > { %564 = vset.pattern.permute.xlu0 %v627_v51  ;;  %v282_v52 = vmul.f32 0.00048828125, %v280_v49  ;;  %v286_v53 = vmul.f32 0.00048828125, %v284_v50  ;;  %565 = vset.pattern.permute.xlu1 %v627_v51  ;;  %v285_v55 = vld [vmem:[#allocation3 + $0x8] sm:$0xff]  ;;  %v283_v56 = vmul.f32 0.00048828125, %v281_v54  ;;  %v296_v0 = vld [vmem:[%s815_s1] sm:$0xff]  ;;  %v297_v1 = vld [vmem:[%s815_s1 + $0x8] sm:$0xff] }
  0xd4   : > { %v287_v57 = vmul.f32 0.00048828125, %v285_v55  ;;  %v300_v6 = vld [vmem:[%s816_s2] sm:$0xff]  ;;  %v301_v8 = vld [vmem:[%s816_s2 + $0x8] sm:$0xff] }
  0xd5   : > { %v288_v58 = vmul.f32 %v282_v52, %v282_v52  ;;  %v289_v59 = vmul.f32 %v283_v56, %v283_v56 }
  0xd7   : > { %v290_v60 = vsub.f32 %v286_v53, %v288_v58  ;;  %v291_v61 = vsub.f32 %v287_v57, %v289_v59 }
  0xd9   : > { %v292_v62 = vadd.f32 1e-05, %v290_v60  ;;  %v293_v63 = vadd.f32 1e-05, %v291_v61 }
  0xdb   : > { %566 = vrsqrt.f32 %v292_v62 }
  0xdc   : > { %568 = vrsqrt.f32 %v293_v63 }
  0xe8   : > { %v567_v2 = vpop.eup %566 }
  0xe9   : > { %v569_v3 = vpop.eup %568  ;;  %v298_v4 = vmul.f32 %v567_v2, %v296_v0 }
  0xea   : > { %v299_v5 = vmul.f32 %v569_v3, %v297_v1 }
  0xeb   : > { %308 = vperm.xlu0 %564, %v298_v4   ;;  %v302_v7 = vmul.f32 %v298_v4, %v282_v52 }
  0xec   : > { %v303_v17 = vmul.f32 %v299_v5, %v283_v56 }
  0xed   : > { %v304_v18 = vsub.f32 %v300_v6, %v302_v7 }
  0xee   : > { %v305_v19 = vsub.f32 %v301_v8, %v303_v17 }
  0xef   : > { %313 = vperm.xlu0 %564, %v299_v5   ;;  %326 = vperm.xlu1 %565, %v304_v18  }
  0xf3   : > { %331 = vperm.xlu1 %565, %v305_v19  }
 0x166   : > { %v309_v20 = vpop.permute.xlu0 %308 }
 0x167   : > { %v316_v21 = vmul.f32 %v309_v20, %v717_v9  ;;  %v317_v22 = vmul.f32 %v309_v20, %v719_v10  ;;  %v318_v23 = vmul.f32 %v309_v20, %v721_v11  ;;  %v319_v24 = vmul.f32 %v309_v20, %v723_v12 }
 0x16a   : > { %v314_v25 = vpop.permute.xlu0 %313  ;;  %v327_v26 = vpop.permute.xlu1 %326 }
 0x16b   : > { %v334_v27 = vadd.f32 %v327_v26, %v316_v21  ;;  %v335_v28 = vadd.f32 %v327_v26, %v317_v22  ;;  %v336_v29 = vadd.f32 %v327_v26, %v318_v23  ;;  %v337_v30 = vadd.f32 %v327_v26, %v319_v24 }
 0x16c   : > { %v320_v31 = vmul.f32 %v314_v25, %v725_v13  ;;  %v321_v32 = vmul.f32 %v314_v25, %v727_v14  ;;  %v322_v33 = vmul.f32 %v314_v25, %v729_v15  ;;  %v323_v9 = vmul.f32 %v314_v25, %v731_v16 }
 0x16d   : > { %v342_v10 = vmax.f32 %v334_v27, 0.0  ;;  %v343_v11 = vmax.f32 %v335_v28, 0.0  ;;  %v344_v34 = vmax.f32 %v336_v29, 0.0  ;;  %v345_v12 = vmax.f32 %v337_v30, 0.0 }
 0x16e   : > { %v332_v35 = vpop.permute.xlu1 %331 }
 0x16f   : > { %v338_v36 = vadd.f32 %v332_v35, %v320_v31  ;;  %v339_v37 = vadd.f32 %v332_v35, %v321_v32  ;;  %v340_v38 = vadd.f32 %v332_v35, %v322_v33  ;;  %v341_v39 = vadd.f32 %v332_v35, %v323_v9 }
 0x170   : > { %v501_v13 = vpack.c.bf16 %v343_v11, %v342_v10  ;;  %v502_v40 = vpack.c.bf16 %v345_v12, %v344_v34 }
 0x171   : > { %v346_v14 = vmax.f32 %v338_v36, 0.0  ;;  %v347_v41 = vmax.f32 %v339_v37, 0.0  ;;  %v348_v15 = vmax.f32 %v340_v38, 0.0  ;;  %v349_v42 = vmax.f32 %v341_v39, 0.0 }
 0x172   : > { %374 = vst [vmem:[%s715_s10] sm:$0xff] %v501_v13  ;;  %375 = vst [vmem:[%s715_s10 + $0x8] sm:$0xff] %v502_v40 }
 0x173   : > { %v503_v16 = vpack.c.bf16 %v347_v41, %v346_v14  ;;  %v504_v43 = vpack.c.bf16 %v349_v42, %v348_v15 }
 0x175   : > { %376 = vst [vmem:[%s715_s10 + $0x10] sm:$0xff] %v503_v16  ;;  %377 = vst [vmem:[%s715_s10 + $0x18] sm:$0xff] %v504_v43 }
 0x176 PF: > { %384 = sbr.rel (!%p700_p7) target bundleno = 382 (0x17e), region = 71  ;;  %s505_s28 = sshll.u32 (%p700_p7), %s608_s14, 4 }
 0x177   : > { %s387_s4 = scalar_lea.vmem (%p700_p7), %s817_s3, %s505_s28 }
 0x179   : > { %v400_v44 = vld [vmem:[%s715_s10] sm:$0xff] (%p700_p7)  ;;  %v402_v45 = vld [vmem:[%s715_s10 + $0x8] sm:$0xff] (%p700_p7) }
 0x17a   : > { %401 = vst [vmem:[%s387_s4] sm:$0xff] (%p700_p7), %v400_v44  ;;  %403 = vst [vmem:[%s387_s4 + $0x8] sm:$0xff] (%p700_p7), %v402_v45 }
 0x17c   : > { %v404_v46 = vld [vmem:[%s715_s10 + $0x10] sm:$0xff]  ;;  %v406_v47 = vld [vmem:[%s715_s10 + $0x18] sm:$0xff] }
 0x17d   : > { %405 = vst [vmem:[%s387_s4 + $0x40] sm:$0xff] %v404_v46  ;;  %407 = vst [vmem:[%s387_s4 + $0x48] sm:$0xff] %v406_v47 }
 0x17e PF: > { %s13_s18 = sadd.s32 1, %s624_s18   ;;  %s819_s12 = smov %s604_s13 }
 0x17f   : > { %p10_p3 = scmp.ge.s32.totalorder %s13_s18, 10   ;;  %s820_s13 = smov %s698_s24 }
 0x180   : > { %s821_s14 = smov %s616_s16  ;;  %s822_s15 = smov %s620_s17 }
 0x181   : > { %s823_s16 = smov %s826_s20  ;;  %s824_s17 = smov %s830_s21 }
 0x182   :  { %12 = sbr.rel (!%p10_p3) target bundleno = 4 (0x4), region = 125 }

// kernel: _lambda_.15
= control target key start
LH: loop header
LB: loop body
LE: loop exit
PB: predicated region body
PF: predicated region fallthrough
CT: control target
= control target key end

     0   :  { %s823_s12 = smov 0   ;;  %s825_s13 = smov 0   ;;  %s951_s0 = inlined_call_operand.vmem [shape: bf16[12,144], index: 0, kind: input, shape index: {}]   ;;  %s952_s1 = inlined_call_operand.vmem [shape: bf16[144,2048], index: 1, kind: input, shape index: {}]   ;;  %s953_s2 = inlined_call_operand.vmem [shape: f32[12,1], index: 2, kind: input, shape index: {}]   ;;  %s954_s3 = inlined_call_operand.vmem [shape: f32[12,2048], index: 3, kind: output, shape index: {}]  }
   0x1   :  { %s827_s14 = smov 0   ;;  %s829_s15 = smov 0  }
   0x2   :  { %s831_s16 = smov 0  }
   0x3 LB: > { %s22_s17 = sadd.s32 1, %s796_s15  ;;  %s650_s18 = sadd.s32 4294967295, %s800_s16   ;;  %s800_s16 = sphi %s831_s16, %s13_s16   ;;  %s796_s15 = sphi %s829_s15, %s959_s15   ;;  %s792_s14 = sphi %s827_s14, %s958_s14   ;;  %s788_s13 = sphi %s825_s13, %s957_s13   ;;  %s784_s12 = sphi %s823_s12, %s956_s12  }
   0x4   : > { %p23_p0 = scmp.ge.s32.totalorder %s22_s17, 8  ;;  %p65_p1 = scmp.ne.s32.totalorder %s788_s13, %s784_s12 }
   0x5   : > { %p66_p2 = scmp.eq.s32.totalorder %s800_s16, 0  ;;  %p123_p4 = scmp.eq.s32.totalorder %s650_s18, 7 }
   0x6   : > { %s961_s17 = smov (%p23_p0, %s22_s17), 0  ;;  %s58_s20 = sadd.s32 1, %s788_s13 }
   0x7   : > { %p67_p3 = por %p66_p2, %p65_p1  ;;  %s55_s19 = ssub.s32 %s796_s15, %s961_s17 }
   0x8   : > { %p56_p5 = scmp.eq.s32.totalorder %s55_s19, 0  ;;  %p858_p6 = por %p123_p4, %p65_p1 }
   0x9   : > { %p655_p7 = scmp.ge.s32.totalorder %s800_s16, 8 }
   0xa   : > { %s863_s22 = scalar_select %p56_p5, %s788_s13, %s58_s20  }
   0xb   : > { %164 = sbr.rel (%p655_p7) target bundleno = 38 (0x26), region = 24 }
  0x10   : > { %167 = sbr.rel (!%p67_p3) target bundleno = 38 (0x26), region = 28  ;;  %s169_s23 = sand.u32 (%p67_p3), 1, %s788_s13  }
  0x11   : > { %s686_s24 = sshll.u32 (%p67_p3), %s796_s15, 3  ;;  %s688_s25 = smul.u32 (%p67_p3), 144, %s169_s23 }
  0x12   : > { %s871_s28 = scalar_lea.vmem (%p67_p3), %s952_s1, %s686_s24 }
  0x13   : > { %v237_v0 = vld [vmem:[%s871_s28] sm:$0xff] (%p67_p3)  ;;  %s171_s29 = scalar_lea.vmem (%p67_p3), [#allocation2], %s688_s25 }
  0x14   : > { %v239_v1 = vld [vmem:[%s871_s28 + $0x40] sm:$0xff] (%p67_p3)  ;;  %238 = vst [vmem:[%s171_s29] sm:$0xff] (%p67_p3), %v237_v0 }
  0x15   : > { %v241_v2 = vld [vmem:[%s871_s28 + $0x80] sm:$0xff]  ;;  %240 = vst [vmem:[%s171_s29 + $0x8] sm:$0xff] %v239_v1 }
  0x16   : > { %v243_v3 = vld [vmem:[%s871_s28 + $0xc0] sm:$0xff]  ;;  %242 = vst [vmem:[%s171_s29 + $0x10] sm:$0xff] %v241_v2 }
  0x17   : > { %v245_v4 = vld [vmem:[%s871_s28 + $0x100] sm:$0xff]  ;;  %244 = vst [vmem:[%s171_s29 + $0x18] sm:$0xff] %v243_v3 }
  0x18   : > { %v247_v5 = vld [vmem:[%s871_s28 + $0x140] sm:$0xff]  ;;  %246 = vst [vmem:[%s171_s29 + $0x20] sm:$0xff] %v245_v4 }
  0x19   : > { %248 = vst [vmem:[%s171_s29 + $0x28] sm:$0xff] %v247_v5  ;;  %v249_v6 = vld [vmem:[%s871_s28 + $0x180] sm:$0xff] }
  0x1a   : > { %v251_v7 = vld [vmem:[%s871_s28 + $0x1c0] sm:$0xff]  ;;  %250 = vst [vmem:[%s171_s29 + $0x30] sm:$0xff] %v249_v6 }
  0x1b   : > { %v253_v8 = vld [vmem:[%s871_s28 + $0x200] sm:$0xff]  ;;  %252 = vst [vmem:[%s171_s29 + $0x38] sm:$0xff] %v251_v7 }
  0x1c   : > { %254 = vst [vmem:[%s171_s29 + $0x40] sm:$0xff] %v253_v8  ;;  %v255_v9 = vld [vmem:[%s871_s28 + $0x240] sm:$0xff] }
  0x1d   : > { %v257_v10 = vld [vmem:[%s871_s28 + $0x280] sm:$0xff]  ;;  %256 = vst [vmem:[%s171_s29 + $0x48] sm:$0xff] %v255_v9 }
  0x1e   : > { %v259_v11 = vld [vmem:[%s871_s28 + $0x2c0] sm:$0xff]  ;;  %258 = vst [vmem:[%s171_s29 + $0x50] sm:$0xff] %v257_v10 }
  0x1f   : > { %260 = vst [vmem:[%s171_s29 + $0x58] sm:$0xff] %v259_v11  ;;  %v261_v12 = vld [vmem:[%s871_s28 + $0x300] sm:$0xff] }
  0x20   : > { %v263_v13 = vld [vmem:[%s871_s28 + $0x340] sm:$0xff]  ;;  %262 = vst [vmem:[%s171_s29 + $0x60] sm:$0xff] %v261_v12 }
  0x21   : > { %v265_v14 = vld [vmem:[%s871_s28 + $0x380] sm:$0xff]  ;;  %264 = vst [vmem:[%s171_s29 + $0x68] sm:$0xff] %v263_v13 }
  0x22   : > { %266 = vst [vmem:[%s171_s29 + $0x70] sm:$0xff] %v265_v14  ;;  %v267_v15 = vld [vmem:[%s871_s28 + $0x3c0] sm:$0xff] }
  0x23   : > { %v269_v16 = vld [vmem:[%s871_s28 + $0x400] sm:$0xff]  ;;  %268 = vst [vmem:[%s171_s29 + $0x78] sm:$0xff] %v267_v15 }
  0x24   : > { %v271_v17 = vld [vmem:[%s871_s28 + $0x440] sm:$0xff]  ;;  %270 = vst [vmem:[%s171_s29 + $0x80] sm:$0xff] %v269_v16 }
  0x25   : > { %272 = vst [vmem:[%s171_s29 + $0x88] sm:$0xff] %v271_v17 }
  0x26 PF: > { %p658_p8 = scmp.ge.s32.totalorder %s800_s16, 1  ;;  %p277_p9 = scmp.lt.s32.totalorder %s800_s16, 9 }
  0x28   : > { %p278_p10 = pnand %p658_p8, %p277_p9 }
  0x29   : > { %s284_s30 = sand.u32 (!%p278_p10), 1, %s784_s12  }
  0x2a   : > { %281 = sbr.rel (%p278_p10) target bundleno = 296 (0x128), region = 66  ;;  %s659_s20 = sshll.u32 (!%p278_p10), %s284_s30, 5 }
  0x2b   : > { %s689_s4 = smul.u32 (!%p278_p10), 144, %s284_s30  ;;  %s316_s23 = scalar_lea.vmem (!%p278_p10), [#allocation3], %s659_s20 }
  0x2d   : > { %s905_s11 = scalar_lea.vmem (!%p278_p10), [#allocation2], %s689_s4 }
  0x2f   : > { %vm465_vm0 = vcmask 130048   ;;  %v802_v18 = vmov 0   ;;  %v354_v19 = vld [vmem:[%s953_s2] sm:$0xff]  ;;  %v355_v21 = vld [vmem:[%s953_s2 + $0x8] sm:$0xf]  ;;  %s687_s12 = sshll.u32 (%p858_p6), %s792_s14, 4 }
  0x30   : > { %731 = vset.pattern.permute.xlu0 %v802_v18  ;;  %v761_v20 = vld [vmem:[%s951_s0 + $0x4] ss:$8 sps:$4 sm:$0x3f]   ;;  %v734_v23 = vld [vmem:[%s905_s11 + $0x70] ss:$8 sps:$4 sm:$0xff]   ;;  %s528_s26 = scalar_lea.vmem (%p858_p6), %s954_s3, %s687_s12 }
  0x31   : > { %358 = vperm.xlu0 %731, %v354_v19   ;;  %v732_v22 = vld [vmem:[%s905_s11 + $0x74] ss:$8 sps:$4 sm:$0xff]   ;;  %680 = vmatprep.mubr.msk.bf16.mxu0 %vm465_vm0, %v761_v20  ;;  %v735_v24 = vld [vmem:[%s905_s11 + $0x64] ss:$8 sps:$4 sm:$0xff]   ;;  %v737_v25 = vld [vmem:[%s905_s11 + $0x60] ss:$8 sps:$4 sm:$0xff]  }
  0x32   : > { %469 = vmatprep.subr.bf16.mxu0 %v732_v22  ;;  %v738_v26 = vld [vmem:[%s905_s11 + $0x54] ss:$8 sps:$4 sm:$0xff]   ;;  %v740_v27 = vld [vmem:[%s905_s11 + $0x50] ss:$8 sps:$4 sm:$0xff]   ;;  %v741_v28 = vld [vmem:[%s905_s11 + $0x44] ss:$8 sps:$4 sm:$0xff]  }
  0x33   : > { %470 = vmatpush1.bf16.msra.mxu0 %v734_v23  ;;  %v743_v29 = vld [vmem:[%s905_s11 + $0x40] ss:$8 sps:$4 sm:$0xff]   ;;  %v744_v30 = vld [vmem:[%s905_s11 + $0x34] ss:$8 sps:$4 sm:$0xff]   ;;  %v746_v31 = vld [vmem:[%s905_s11 + $0x30] ss:$8 sps:$4 sm:$0xff]  }
  0x34   : > { %471 = vmatprep.subr.bf16.mxu0 %v735_v24  ;;  %v747_v32 = vld [vmem:[%s905_s11 + $0x24] ss:$8 sps:$4 sm:$0xff]   ;;  %v749_v33 = vld [vmem:[%s905_s11 + $0x20] ss:$8 sps:$4 sm:$0xff]   ;;  %v750_v34 = vld [vmem:[%s905_s11 + $0x14] ss:$8 sps:$4 sm:$0xff]  }
  0x35   : > { %363 = vperm.xlu0 %731, %v355_v21   ;;  %v752_v35 = vld [vmem:[%s905_s11 + $0x10] ss:$8 sps:$4 sm:$0xff]   ;;  %v753_v36 = vld [vmem:[%s905_s11 + $0x4] ss:$8 sps:$4 sm:$0xff]   ;;  %v755_v37 = vld [vmem:[%s905_s11] ss:$8 sps:$4 sm:$0xff]  }
  0x36   : > { %v756_v38 = vld [vmem:[%s905_s11 + $0x84] ss:$8 sps:$4 sm:$0xff]   ;;  %v758_v39 = vld [vmem:[%s905_s11 + $0x80] ss:$8 sps:$4 sm:$0xff]  }
  0x37   : > { %472 = vmatpush1.bf16.msra.mxu0 %v737_v25  ;;  %v759_v40 = vld [vmem:[%s951_s0] ss:$8 sps:$4 sm:$0x3f]  }
  0x38   : > { %473 = vmatprep.subr.bf16.mxu0 %v738_v26 }
  0x3b   : > { %474 = vmatpush1.bf16.msra.mxu0 %v740_v27 }
  0x3c   : > { %475 = vmatprep.subr.bf16.mxu0 %v741_v28 }
  0x3f   : > { %476 = vmatpush1.bf16.msra.mxu0 %v743_v29 }
  0x40   : > { %477 = vmatprep.subr.bf16.mxu0 %v744_v30 }
  0x43   : > { %478 = vmatpush1.bf16.msra.mxu0 %v746_v31 }
  0x44   : > { %479 = vmatprep.subr.bf16.mxu0 %v747_v32 }
  0x47   : > { %480 = vmatpush1.bf16.msra.mxu0 %v749_v33 }
  0x48   : > { %481 = vmatprep.subr.bf16.mxu0 %v750_v34 }
  0x4b   : > { %482 = vmatpush1.bf16.msra.mxu0 %v752_v35 }
  0x4c   : > { %483 = vmatprep.subr.bf16.mxu0 %v753_v36 }
  0x4f   : > { %484 = vmatpush1.bf16.msra.mxu0 %v755_v37 }
  0x50   : > { %499 = vmatprep.subr.bf16.mxu0 %v756_v38 }
  0x53   : > { %500 = vmatpush2.bf16.msra.mxu0 %v758_v39 }
  0x56   : > { %502 = vmatmul.mubr.bf16.vlgmr.msra.gmra.mxu0 %v759_v40 }
  0xac   : > { %v359_v41 = vpop.permute.xlu0 %358 }
  0xb0   : > { %v364_v46 = vpop.permute.xlu0 %363 }
 0x116   : > { %v503_v42 = vpop.f32.mrf.mxu0 }
 0x117   : > { %v504_v43 = vadd.f32 %v503_v42, %v359_v41 }
 0x118   : > { %v505_v44 = vpop.f32.mrf.mxu0 }
 0x119   : > { %512 = vst [vmem:[%s316_s23] sm:$0xff] %v504_v43  ;;  %v506_v45 = vadd.f32 %v505_v44, %v359_v41 }
 0x11a   : > { %v507_v47 = vpop.f32.mrf.mxu0 }
 0x11b   : > { %513 = vst [vmem:[%s316_s23 + $0x8] sm:$0xff] %v506_v45  ;;  %v508_v48 = vadd.f32 %v507_v47, %v364_v46  ;;  %522 = sbr.rel (!%p858_p6) target bundleno = 296 (0x128), region = 74 }
 0x11c   : > { %v509_v49 = vpop.f32.mrf.mxu0 }
 0x11d   : > { %514 = vst [vmem:[%s316_s23 + $0x10] sm:$0xf] %v508_v48  ;;  %v510_v50 = vadd.f32 %v509_v49, %v364_v46 }
 0x11f   : > { %515 = vst [vmem:[%s316_s23 + $0x18] sm:$0xf] %v510_v50 }
 0x120   : > { %v541_v51 = vld [vmem:[%s316_s23] sm:$0xff] }
 0x121   : > { %542 = vst [vmem:[%s528_s26] sm:$0xff] %v541_v51 }
 0x122   : > { %v543_v52 = vld [vmem:[%s316_s23 + $0x8] sm:$0xff] }
 0x123   : > { %544 = vst [vmem:[%s528_s26 + $0x8] sm:$0xff] %v543_v52 }
 0x124   : > { %v545_v53 = vld [vmem:[%s316_s23 + $0x10] sm:$0xff] }
 0x125   : > { %546 = vst [vmem:[%s528_s26 + $0x80] sm:$0xff] %v545_v53 }
 0x126   : > { %v547_v54 = vld [vmem:[%s316_s23 + $0x18] sm:$0xff] }
 0x127   : > { %548 = vst [vmem:[%s528_s26 + $0x88] sm:$0xff] %v547_v54 }
 0x128 PF: > { %s13_s16 = sadd.s32 1, %s800_s16   ;;  %s956_s12 = smov %s788_s13 }
 0x129   : > { %p10_p11 = scmp.ge.s32.totalorder %s13_s16, 10   ;;  %s957_s13 = smov %s863_s22 }
 0x12a   : > { %s958_s14 = smov %s796_s15  ;;  %s959_s15 = smov %s961_s17 }
 0x12b   :  { %12 = sbr.rel (!%p10_p11) target bundleno = 3 (0x3), region = 134 }

</bundles_post_ra>
